<compile_context>
chip_gen: v7x
topology: tpu7x:2x2x1
jax: 0.10.0
libtpu: 0.0.40
codegen_flags: <defaults>
</compile_context>

<pallas_src>
import functools

import jax
import jax.numpy as jnp
from jax.experimental import pallas as pl
from jax.experimental.pallas import tpu as pltpu

EPS = 1e-5
_HALO = 8  # left-halo width in the staging scratch -> sublane-aligned interior store


def _round_up(x, m):
    return (x + m - 1) // m * m


def _conv_bn_stage_kernel(x_ref, scale_ref, shift_ref, w_ref,
                          y_ref, stats_ref, apad_ref, *, pre_affine_relu):
    """[optional a = relu(x*scale+shift)] -> 3x3 conv (pad=1, stride=1) ->
    raw conv output + per-tile BN partial sums (sum, sum-of-squares)."""
    NB, H, W, C = x_ref.shape
    Mb = NB * H * W

    xv = x_ref[...]
    if pre_affine_relu:
        a = jnp.maximum(xv * scale_ref[...] + shift_ref[...], 0.0)  # f32 BN math
    else:
        a = xv
    a = a.astype(jnp.bfloat16)  # MXU operand dtype

    # --- stage activation into the zero-haloed scratch (aligned interior) ---
    zrow = jnp.zeros((NB, 1, W + 2, C), jnp.bfloat16)
    zcol = jnp.zeros((NB, H, 1, C), jnp.bfloat16)
    apad_ref[:, 0:1, _HALO - 1:_HALO + W + 1, :] = zrow            # top halo row
    apad_ref[:, H + 1:H + 2, _HALO - 1:_HALO + W + 1, :] = zrow    # bottom halo row
    apad_ref[:, 1:H + 1, _HALO - 1:_HALO, :] = zcol                # left halo col
    apad_ref[:, 1:H + 1, _HALO + W:_HALO + W + 1, :] = zcol        # right halo col
    apad_ref[:, 1:H + 1, _HALO:_HALO + W, :] = a                   # aligned store

    # --- 3x3 conv: 9 accumulated K=C matmuls, f32 accumulation ---
    wv = w_ref[...]                                                # (9, C, C) bf16
    acc = jnp.zeros((Mb, C), jnp.float32)
    for dx in range(3):                                            # hoisted dx shift
        slab = apad_ref[:, :, _HALO - 1 + dx:_HALO - 1 + dx + W, :]  # (NB,H+2,W,C)
        for dy in range(3):                                        # free leading slice
            tap = slab[:, dy:dy + H, :, :].reshape(Mb, C)
            acc = acc + jnp.dot(tap, wv[dy * 3 + dx],
                                preferred_element_type=jnp.float32)

    # --- outputs: raw conv result + single-pass BN partial sums (f32) ---
    y_ref[...] = acc.reshape(NB, H, W, C)
    s = jnp.sum(acc, axis=0, keepdims=True)
    q = jnp.sum(acc * acc, axis=0, keepdims=True)
    stats_ref[0:1, 0:1, :] = s.reshape(1, 1, C)
    stats_ref[0:1, 1:2, :] = q.reshape(1, 1, C)


def _bn_residual_relu_kernel(y_ref, scale_ref, shift_ref, res_ref, out_ref):
    out_ref[...] = jnp.maximum(
        y_ref[...] * scale_ref[...] + shift_ref[...] + res_ref[...], 0.0)


def residual_block_nhwc(x_nhwc, w1_oihw, g1, b1, w2_oihw, g2, b2, *, batch_block=1):
    """ResidualBlock forward on NHWC activations (stride=1, downsample=None)."""
    N, H, W, C = x_nhwc.shape
    Cout = w1_oihw.shape[0]
    assert Cout == C and w1_oihw.shape[1] == C, \
        "stride=1 / downsample=None path requires in_channels == out_channels"

    Cp = _round_up(max(C, 16), 16)     # bf16-packing-friendly channel pad, NOT 128
    NB = max(1, min(batch_block, N))
    while N % NB:
        NB -= 1
    T = N // NB
    M = N * H * W
    Wscr = _round_up(_HALO + W + 1, 8)

    x = x_nhwc.astype(jnp.float32)
    if Cp != C:
        x = jnp.pad(x, ((0, 0), (0, 0), (0, 0), (0, Cp - C)))

    def prep_w(w_oihw):
        w = jnp.transpose(w_oihw.astype(jnp.float32), (2, 3, 1, 0))   # (3,3,Ci,Co)
        w = jnp.pad(w, ((0, 0), (0, 0), (0, Cp - C), (0, Cp - Cout)))
        return w.reshape(9, Cp, Cp).astype(jnp.bfloat16)

    def prep_vec(v):
        return jnp.pad(v.astype(jnp.float32), (0, Cp - Cout)).reshape(1, Cp)

    w1 = prep_w(w1_oihw)
    w2 = prep_w(w2_oihw)
    g1p, b1p, g2p, b2p = (prep_vec(v) for v in (g1, b1, g2, b2))
    ones = jnp.ones((1, Cp), jnp.float32)
    zeros = jnp.zeros((1, Cp), jnp.float32)

    tile_spec = pl.BlockSpec((NB, H, W, Cp), lambda i: (i, 0, 0, 0))
    vec_spec = pl.BlockSpec((1, Cp), lambda i: (0, 0))

    def conv_stage(x_in, scale, shift, w, pre):
        kern = functools.partial(_conv_bn_stage_kernel, pre_affine_relu=pre)
        cost = pl.CostEstimate(
            flops=2 * M * 9 * Cp * Cp,
            transcendentals=0,
            bytes_accessed=int(x_in.size * x_in.dtype.itemsize + 2 * w.size
                               + 4 * M * Cp + 4 * T * 2 * Cp))
        return pl.pallas_call(
            kern,
            grid=(T,),
            in_specs=[tile_spec, vec_spec, vec_spec,
                      pl.BlockSpec((9, Cp, Cp), lambda i: (0, 0, 0))],
            out_specs=[tile_spec, pl.BlockSpec((1, 2, Cp), lambda i: (i, 0, 0))],
            out_shape=[jax.ShapeDtypeStruct((N, H, W, Cp), jnp.float32),
                       jax.ShapeDtypeStruct((T, 2, Cp), jnp.float32)],
            scratch_shapes=[pltpu.VMEM((NB, H + 2, Wscr, Cp), jnp.bfloat16)],
            compiler_params=pltpu.CompilerParams(
                dimension_semantics=("parallel",)),
            cost_estimate=cost,
        )(x_in, scale, shift, w)

    def finalize_stats(stats, g, b):
        # sum per-tile partials (tiny (T, 2, Cp) reduction) -> BN affine params.
        s = jnp.sum(stats[:, 0, :], axis=0)
        q = jnp.sum(stats[:, 1, :], axis=0)
        mean = s / M
        var = q / M - mean * mean       # single-pass form; accumulated in f32
        scale = g.reshape(Cp) * jax.lax.rsqrt(var + EPS)
        shift = b.reshape(Cp) - mean * scale
        return scale.reshape(1, Cp), shift.reshape(1, Cp)

    y1, st1 = conv_stage(x, ones, zeros, w1, pre=False)      # conv1
    sc1, sh1 = finalize_stats(st1, g1p, b1p)                  # bn1 scale/shift
    y2, st2 = conv_stage(y1, sc1, sh1, w2, pre=True)          # bn1+relu -> conv2
    sc2, sh2 = finalize_stats(st2, g2p, b2p)                  # bn2 scale/shift

    out = pl.pallas_call(                                     # bn2 + residual + relu
        _bn_residual_relu_kernel,
        grid=(T,),
        in_specs=[tile_spec, vec_spec, vec_spec, tile_spec],
        out_specs=tile_spec,
        out_shape=jax.ShapeDtypeStruct((N, H, W, Cp), jnp.float32),
        compiler_params=pltpu.CompilerParams(dimension_semantics=("parallel",)),
    )(y2, sc2, sh2, x)

    return out[..., :C] if Cp != C else out


@functools.partial(jax.jit, static_argnames=("batch_block",))
def residual_block(x_nchw, w1, g1, b1, w2, g2, b2, *, batch_block=1):
    """PyTorch-layout entry point: x (N,C,H,W), conv weights (O,I,3,3)."""
    # TODO(synk): feed NHWC activations directly (residual_block_nhwc) in a real
    # pipeline so these two HBM relayout passes stay out of the hot path.
    x_nhwc = jnp.transpose(x_nchw, (0, 2, 3, 1))
    out = residual_block_nhwc(x_nhwc, w1, g1, b1, w2, g2, b2,
                              batch_block=batch_block)
    return jnp.transpose(out, (0, 3, 1, 2))


def reference(x, w1, g1, b1, w2, g2, b2):
    """Plain-JAX NCHW reference; conv operands cast to bf16 with f32 accumulation
    (same MXU precision as the kernel), training-mode BatchNorm."""
    def conv(x, w):
        return jax.lax.conv_general_dilated(
            x.astype(jnp.bfloat16), w.astype(jnp.bfloat16), (1, 1),
            ((1, 1), (1, 1)), dimension_numbers=("NCHW", "OIHW", "NCHW"),
            preferred_element_type=jnp.float32)

    def bn(y, g, b):
        mean = jnp.mean(y, axis=(0, 2, 3), keepdims=True)
        var = jnp.mean((y - mean) ** 2, axis=(0, 2, 3), keepdims=True)
        return ((y - mean) * jax.lax.rsqrt(var + EPS) * g.reshape(1, -1, 1, 1)
                + b.reshape(1, -1, 1, 1))

    out = jnp.maximum(bn(conv(x, w1), g1, b1), 0.0)
    out = bn(conv(out, w2), g2, b2)
    return jnp.maximum(out + x, 0.0)


if __name__ == "__main__":
    N, C, H, W = 2, 4, 16, 16          # in_channels == out_channels, stride=1
    key = jax.random.PRNGKey(0)
    k1, k2, k3 = jax.random.split(key, 3)

    x = jax.random.normal(k1, (N, C, H, W), jnp.float32)
    fan_in = C * 3 * 3
    w1 = jax.random.normal(k2, (C, C, 3, 3), jnp.float32) * (2.0 / fan_in) ** 0.5
    w2 = jax.random.normal(k3, (C, C, 3, 3), jnp.float32) * (2.0 / fan_in) ** 0.5
    g1 = jnp.ones((C,), jnp.float32)
    b1 = jnp.zeros((C,), jnp.float32)
    g2 = jnp.ones((C,), jnp.float32)
    b2 = jnp.zeros((C,), jnp.float32)

    out = jax.block_until_ready(residual_block(x, w1, g1, b1, w2, g2, b2))
    ref = reference(x, w1, g1, b1, w2, g2, b2)
    assert out.shape == (N, C, H, W)
    max_err = float(jnp.max(jnp.abs(out - ref)))
    # bf16 MXU operands -> compare against the bf16-matched reference.
    assert jnp.allclose(out, ref, rtol=5e-3, atol=5e-3), f"max_err={max_err}"
    print("KERNEL_OK")
</pallas_src>

<mosaic_0001>
module attributes {stable_mosaic.version = 11 : i64} {
  func.func @_conv_bn_stage_kernel(%arg0: i32, %arg1: memref<1x16x16x16xf32, #tpu.memory_space<vmem>>, %arg2: memref<1x16xf32, #tpu.memory_space<vmem>>, %arg3: memref<1x16xf32, #tpu.memory_space<vmem>>, %arg4: memref<9x16x16xbf16, #tpu.memory_space<vmem>>, %arg5: memref<1x16x16x16xf32, #tpu.memory_space<vmem>>, %arg6: memref<1x2x16xf32, #tpu.memory_space<vmem>>, %arg7: memref<1x18x32x16xbf16, #tpu.memory_space<vmem>>) attributes {dimension_semantics = [#tpu.dimension_semantics<parallel>], iteration_bounds = array<i64: 2>, scalar_prefetch = 0 : i64, scratch_operands = 1 : i64, tpu.core_type = #tpu.core_type<tc>, window_params = [{transform_indices = @transform_0, window_bounds = array<i64: 1, 16, 16, 16>}, {pipeline_mode = #tpu.pipeline_mode<synchronous>, transform_indices = @transform_1, window_bounds = array<i64: 1, 16>}, {pipeline_mode = #tpu.pipeline_mode<synchronous>, transform_indices = @transform_2, window_bounds = array<i64: 1, 16>}, {pipeline_mode = #tpu.pipeline_mode<synchronous>, transform_indices = @transform_3, window_bounds = array<i64: 9, 16, 16>}, {transform_indices = @transform_4, window_bounds = array<i64: 1, 16, 16, 16>}, {transform_indices = @transform_5, window_bounds = array<i64: 1, 2, 16>}]} {
    %c0 = arith.constant 0 : index
    %c0_0 = arith.constant 0 : index
    %c0_1 = arith.constant 0 : index
    %c0_2 = arith.constant 0 : index
    %0 = vector.load %arg1[%c0, %c0_0, %c0_1, %c0_2] : memref<1x16x16x16xf32, #tpu.memory_space<vmem>>, vector<1x16x16x16xf32>
    %1 = arith.truncf %0 : vector<1x16x16x16xf32> to vector<1x16x16x16xbf16>
    %cst = arith.constant 0.000000e+00 : bf16
    %2 = vector.broadcast %cst : bf16 to vector<1x1x18x16xbf16>
    %cst_3 = arith.constant 0.000000e+00 : bf16
    %3 = vector.broadcast %cst_3 : bf16 to vector<1x16x1x16xbf16>
    %c0_4 = arith.constant 0 : index
    %c0_5 = arith.constant 0 : index
    %c7 = arith.constant 7 : index
    %c0_6 = arith.constant 0 : index
    %4 = vector.load %arg7[%c0_4, %c0_5, %c7, %c0_6] : memref<1x18x32x16xbf16, #tpu.memory_space<vmem>>, vector<1x1x18x16xbf16>
    tpu.vector_store %arg7[%c0_4, %c0_5, %c7, %c0_6], %2 {strides = array<i32>} : memref<1x18x32x16xbf16, #tpu.memory_space<vmem>>, vector<1x1x18x16xbf16>,
    %c0_7 = arith.constant 0 : index
    %c17 = arith.constant 17 : index
    %c7_8 = arith.constant 7 : index
    %c0_9 = arith.constant 0 : index
    %5 = vector.load %arg7[%c0_7, %c17, %c7_8, %c0_9] : memref<1x18x32x16xbf16, #tpu.memory_space<vmem>>, vector<1x1x18x16xbf16>
    tpu.vector_store %arg7[%c0_7, %c17, %c7_8, %c0_9], %2 {strides = array<i32>} : memref<1x18x32x16xbf16, #tpu.memory_space<vmem>>, vector<1x1x18x16xbf16>,
    %c0_10 = arith.constant 0 : index
    %c1 = arith.constant 1 : index
    %c7_11 = arith.constant 7 : index
    %c0_12 = arith.constant 0 : index
    %6 = vector.load %arg7[%c0_10, %c1, %c7_11, %c0_12] : memref<1x18x32x16xbf16, #tpu.memory_space<vmem>>, vector<1x16x1x16xbf16>
    tpu.vector_store %arg7[%c0_10, %c1, %c7_11, %c0_12], %3 {strides = array<i32>} : memref<1x18x32x16xbf16, #tpu.memory_space<vmem>>, vector<1x16x1x16xbf16>,
    %c0_13 = arith.constant 0 : index
    %c1_14 = arith.constant 1 : index
    %c24 = arith.constant 24 : index
    %c0_15 = arith.constant 0 : index
    %7 = vector.load %arg7[%c0_13, %c1_14, %c24, %c0_15] : memref<1x18x32x16xbf16, #tpu.memory_space<vmem>>, vector<1x16x1x16xbf16>
    tpu.vector_store %arg7[%c0_13, %c1_14, %c24, %c0_15], %3 {strides = array<i32>} : memref<1x18x32x16xbf16, #tpu.memory_space<vmem>>, vector<1x16x1x16xbf16>,
    %c0_16 = arith.constant 0 : index
    %c1_17 = arith.constant 1 : index
    %c8 = arith.constant 8 : index
    %c0_18 = arith.constant 0 : index
    %8 = vector.load %arg7[%c0_16, %c1_17, %c8, %c0_18] : memref<1x18x32x16xbf16, #tpu.memory_space<vmem>>, vector<1x16x16x16xbf16>
    tpu.vector_store %arg7[%c0_16, %c1_17, %c8, %c0_18], %1 {strides = array<i32>} : memref<1x18x32x16xbf16, #tpu.memory_space<vmem>>, vector<1x16x16x16xbf16>,
    %c0_19 = arith.constant 0 : index
    %c0_20 = arith.constant 0 : index
    %c0_21 = arith.constant 0 : index
    %9 = vector.load %arg4[%c0_19, %c0_20, %c0_21] : memref<9x16x16xbf16, #tpu.memory_space<vmem>>, vector<9x16x16xbf16>
    %cst_22 = arith.constant 0.000000e+00 : f32
    %10 = vector.broadcast %cst_22 : f32 to vector<256x16xf32>
    %c0_23 = arith.constant 0 : index
    %c0_24 = arith.constant 0 : index
    %c7_25 = arith.constant 7 : index
    %c0_26 = arith.constant 0 : index
    %11 = vector.load %arg7[%c0_23, %c0_24, %c7_25, %c0_26] : memref<1x18x32x16xbf16, #tpu.memory_space<vmem>>, vector<1x18x16x16xbf16>
    %12 = vector.extract_strided_slice %11 {offsets = [0, 0, 0, 0], sizes = [1, 16, 16, 16], strides = [1, 1, 1, 1]} : vector<1x18x16x16xbf16> to vector<1x16x16x16xbf16>
    %13 = vector.shape_cast %12 : vector<1x16x16x16xbf16> to vector<256x16xbf16>
    %14 = vector.extract_strided_slice %9 {offsets = [0, 0, 0], sizes = [1, 16, 16], strides = [1, 1, 1]} : vector<9x16x16xbf16> to vector<1x16x16xbf16>
    %15 = vector.shape_cast %14 : vector<1x16x16xbf16> to vector<16x16xbf16>
    %cst_27 = arith.constant dense<0.000000e+00> : vector<256x16xf32>
    %16 = tpu.matmul %13, %15, %cst_27 {dimension_numbers = #tpu.dot_dimension_numbers<[1], [0], [0], [1], [0, 0, 1, 1], [], []>} : vector<256x16xbf16>, vector<16x16xbf16>, vector<256x16xf32> -> vector<256x16xf32>
    %17 = arith.addf %10, %16 : vector<256x16xf32>
    %18 = vector.extract_strided_slice %11 {offsets = [0, 1, 0, 0], sizes = [1, 16, 16, 16], strides = [1, 1, 1, 1]} : vector<1x18x16x16xbf16> to vector<1x16x16x16xbf16>
    %19 = vector.shape_cast %18 : vector<1x16x16x16xbf16> to vector<256x16xbf16>
    %20 = vector.extract_strided_slice %9 {offsets = [3, 0, 0], sizes = [1, 16, 16], strides = [1, 1, 1]} : vector<9x16x16xbf16> to vector<1x16x16xbf16>
    %21 = vector.shape_cast %20 : vector<1x16x16xbf16> to vector<16x16xbf16>
    %cst_28 = arith.constant dense<0.000000e+00> : vector<256x16xf32>
    %22 = tpu.matmul %19, %21, %cst_28 {dimension_numbers = #tpu.dot_dimension_numbers<[1], [0], [0], [1], [0, 0, 1, 1], [], []>} : vector<256x16xbf16>, vector<16x16xbf16>, vector<256x16xf32> -> vector<256x16xf32>
    %23 = arith.addf %17, %22 : vector<256x16xf32>
    %24 = vector.extract_strided_slice %11 {offsets = [0, 2, 0, 0], sizes = [1, 16, 16, 16], strides = [1, 1, 1, 1]} : vector<1x18x16x16xbf16> to vector<1x16x16x16xbf16>
    %25 = vector.shape_cast %24 : vector<1x16x16x16xbf16> to vector<256x16xbf16>
    %26 = vector.extract_strided_slice %9 {offsets = [6, 0, 0], sizes = [1, 16, 16], strides = [1, 1, 1]} : vector<9x16x16xbf16> to vector<1x16x16xbf16>
    %27 = vector.shape_cast %26 : vector<1x16x16xbf16> to vector<16x16xbf16>
    %cst_29 = arith.constant dense<0.000000e+00> : vector<256x16xf32>
    %28 = tpu.matmul %25, %27, %cst_29 {dimension_numbers = #tpu.dot_dimension_numbers<[1], [0], [0], [1], [0, 0, 1, 1], [], []>} : vector<256x16xbf16>, vector<16x16xbf16>, vector<256x16xf32> -> vector<256x16xf32>
    %29 = arith.addf %23, %28 : vector<256x16xf32>
    %c0_30 = arith.constant 0 : index
    %c0_31 = arith.constant 0 : index
    %c8_32 = arith.constant 8 : index
    %c0_33 = arith.constant 0 : index
    %30 = vector.load %arg7[%c0_30, %c0_31, %c8_32, %c0_33] : memref<1x18x32x16xbf16, #tpu.memory_space<vmem>>, vector<1x18x16x16xbf16>
    %31 = vector.extract_strided_slice %30 {offsets = [0, 0, 0, 0], sizes = [1, 16, 16, 16], strides = [1, 1, 1, 1]} : vector<1x18x16x16xbf16> to vector<1x16x16x16xbf16>
    %32 = vector.shape_cast %31 : vector<1x16x16x16xbf16> to vector<256x16xbf16>
    %33 = vector.extract_strided_slice %9 {offsets = [1, 0, 0], sizes = [1, 16, 16], strides = [1, 1, 1]} : vector<9x16x16xbf16> to vector<1x16x16xbf16>
    %34 = vector.shape_cast %33 : vector<1x16x16xbf16> to vector<16x16xbf16>
    %cst_34 = arith.constant dense<0.000000e+00> : vector<256x16xf32>
    %35 = tpu.matmul %32, %34, %cst_34 {dimension_numbers = #tpu.dot_dimension_numbers<[1], [0], [0], [1], [0, 0, 1, 1], [], []>} : vector<256x16xbf16>, vector<16x16xbf16>, vector<256x16xf32> -> vector<256x16xf32>
    %36 = arith.addf %29, %35 : vector<256x16xf32>
    %37 = vector.extract_strided_slice %30 {offsets = [0, 1, 0, 0], sizes = [1, 16, 16, 16], strides = [1, 1, 1, 1]} : vector<1x18x16x16xbf16> to vector<1x16x16x16xbf16>
    %38 = vector.shape_cast %37 : vector<1x16x16x16xbf16> to vector<256x16xbf16>
    %39 = vector.extract_strided_slice %9 {offsets = [4, 0, 0], sizes = [1, 16, 16], strides = [1, 1, 1]} : vector<9x16x16xbf16> to vector<1x16x16xbf16>
    %40 = vector.shape_cast %39 : vector<1x16x16xbf16> to vector<16x16xbf16>
    %cst_35 = arith.constant dense<0.000000e+00> : vector<256x16xf32>
    %41 = tpu.matmul %38, %40, %cst_35 {dimension_numbers = #tpu.dot_dimension_numbers<[1], [0], [0], [1], [0, 0, 1, 1], [], []>} : vector<256x16xbf16>, vector<16x16xbf16>, vector<256x16xf32> -> vector<256x16xf32>
    %42 = arith.addf %36, %41 : vector<256x16xf32>
    %43 = vector.extract_strided_slice %30 {offsets = [0, 2, 0, 0], sizes = [1, 16, 16, 16], strides = [1, 1, 1, 1]} : vector<1x18x16x16xbf16> to vector<1x16x16x16xbf16>
    %44 = vector.shape_cast %43 : vector<1x16x16x16xbf16> to vector<256x16xbf16>
    %45 = vector.extract_strided_slice %9 {offsets = [7, 0, 0], sizes = [1, 16, 16], strides = [1, 1, 1]} : vector<9x16x16xbf16> to vector<1x16x16xbf16>
    %46 = vector.shape_cast %45 : vector<1x16x16xbf16> to vector<16x16xbf16>
    %cst_36 = arith.constant dense<0.000000e+00> : vector<256x16xf32>
    %47 = tpu.matmul %44, %46, %cst_36 {dimension_numbers = #tpu.dot_dimension_numbers<[1], [0], [0], [1], [0, 0, 1, 1], [], []>} : vector<256x16xbf16>, vector<16x16xbf16>, vector<256x16xf32> -> vector<256x16xf32>
    %48 = arith.addf %42, %47 : vector<256x16xf32>
    %c0_37 = arith.constant 0 : index
    %c0_38 = arith.constant 0 : index
    %c9 = arith.constant 9 : index
    %c0_39 = arith.constant 0 : index
    %49 = vector.load %arg7[%c0_37, %c0_38, %c9, %c0_39] : memref<1x18x32x16xbf16, #tpu.memory_space<vmem>>, vector<1x18x16x16xbf16>
    %50 = vector.extract_strided_slice %49 {offsets = [0, 0, 0, 0], sizes = [1, 16, 16, 16], strides = [1, 1, 1, 1]} : vector<1x18x16x16xbf16> to vector<1x16x16x16xbf16>
    %51 = vector.shape_cast %50 : vector<1x16x16x16xbf16> to vector<256x16xbf16>
    %52 = vector.extract_strided_slice %9 {offsets = [2, 0, 0], sizes = [1, 16, 16], strides = [1, 1, 1]} : vector<9x16x16xbf16> to vector<1x16x16xbf16>
    %53 = vector.shape_cast %52 : vector<1x16x16xbf16> to vector<16x16xbf16>
    %cst_40 = arith.constant dense<0.000000e+00> : vector<256x16xf32>
    %54 = tpu.matmul %51, %53, %cst_40 {dimension_numbers = #tpu.dot_dimension_numbers<[1], [0], [0], [1], [0, 0, 1, 1], [], []>} : vector<256x16xbf16>, vector<16x16xbf16>, vector<256x16xf32> -> vector<256x16xf32>
    %55 = arith.addf %48, %54 : vector<256x16xf32>
    %56 = vector.extract_strided_slice %49 {offsets = [0, 1, 0, 0], sizes = [1, 16, 16, 16], strides = [1, 1, 1, 1]} : vector<1x18x16x16xbf16> to vector<1x16x16x16xbf16>
    %57 = vector.shape_cast %56 : vector<1x16x16x16xbf16> to vector<256x16xbf16>
    %58 = vector.extract_strided_slice %9 {offsets = [5, 0, 0], sizes = [1, 16, 16], strides = [1, 1, 1]} : vector<9x16x16xbf16> to vector<1x16x16xbf16>
    %59 = vector.shape_cast %58 : vector<1x16x16xbf16> to vector<16x16xbf16>
    %cst_41 = arith.constant dense<0.000000e+00> : vector<256x16xf32>
    %60 = tpu.matmul %57, %59, %cst_41 {dimension_numbers = #tpu.dot_dimension_numbers<[1], [0], [0], [1], [0, 0, 1, 1], [], []>} : vector<256x16xbf16>, vector<16x16xbf16>, vector<256x16xf32> -> vector<256x16xf32>
    %61 = arith.addf %55, %60 : vector<256x16xf32>
    %62 = vector.extract_strided_slice %49 {offsets = [0, 2, 0, 0], sizes = [1, 16, 16, 16], strides = [1, 1, 1, 1]} : vector<1x18x16x16xbf16> to vector<1x16x16x16xbf16>
    %63 = vector.shape_cast %62 : vector<1x16x16x16xbf16> to vector<256x16xbf16>
    %64 = vector.extract_strided_slice %9 {offsets = [8, 0, 0], sizes = [1, 16, 16], strides = [1, 1, 1]} : vector<9x16x16xbf16> to vector<1x16x16xbf16>
    %65 = vector.shape_cast %64 : vector<1x16x16xbf16> to vector<16x16xbf16>
    %cst_42 = arith.constant dense<0.000000e+00> : vector<256x16xf32>
    %66 = tpu.matmul %63, %65, %cst_42 {dimension_numbers = #tpu.dot_dimension_numbers<[1], [0], [0], [1], [0, 0, 1, 1], [], []>} : vector<256x16xbf16>, vector<16x16xbf16>, vector<256x16xf32> -> vector<256x16xf32>
    %67 = arith.addf %61, %66 : vector<256x16xf32>
    %68 = vector.shape_cast %67 : vector<256x16xf32> to vector<1x16x16x16xf32>
    %c0_43 = arith.constant 0 : index
    %c0_44 = arith.constant 0 : index
    %c0_45 = arith.constant 0 : index
    %c0_46 = arith.constant 0 : index
    %69 = vector.load %arg5[%c0_43, %c0_44, %c0_45, %c0_46] : memref<1x16x16x16xf32, #tpu.memory_space<vmem>>, vector<1x16x16x16xf32>
    tpu.vector_store %arg5[%c0_43, %c0_44, %c0_45, %c0_46], %68 {strides = array<i32>} : memref<1x16x16x16xf32, #tpu.memory_space<vmem>>, vector<1x16x16x16xf32>,
    %cst_47 = arith.constant dense<0.000000e+00> : vector<16xf32>
    %70 = vector.multi_reduction <add>, %67, %cst_47 [0] : vector<256x16xf32> to vector<16xf32>
    %71 = vector.shape_cast %70 : vector<16xf32> to vector<1x16xf32>
    %72 = arith.mulf %67, %67 : vector<256x16xf32>
    %cst_48 = arith.constant dense<0.000000e+00> : vector<16xf32>
    %73 = vector.multi_reduction <add>, %72, %cst_48 [0] : vector<256x16xf32> to vector<16xf32>
    %74 = vector.shape_cast %73 : vector<16xf32> to vector<1x16xf32>
    %75 = vector.shape_cast %71 : vector<1x16xf32> to vector<1x1x16xf32>
    %c0_49 = arith.constant 0 : index
    %c0_50 = arith.constant 0 : index
    %c0_51 = arith.constant 0 : index
    %76 = vector.load %arg6[%c0_49, %c0_50, %c0_51] : memref<1x2x16xf32, #tpu.memory_space<vmem>>, vector<1x1x16xf32>
    tpu.vector_store %arg6[%c0_49, %c0_50, %c0_51], %75 {strides = array<i32>} : memref<1x2x16xf32, #tpu.memory_space<vmem>>, vector<1x1x16xf32>,
    %77 = vector.shape_cast %74 : vector<1x16xf32> to vector<1x1x16xf32>
    %c0_52 = arith.constant 0 : index
    %c1_53 = arith.constant 1 : index
    %c0_54 = arith.constant 0 : index
    %78 = vector.load %arg6[%c0_52, %c1_53, %c0_54] : memref<1x2x16xf32, #tpu.memory_space<vmem>>, vector<1x1x16xf32>
    tpu.vector_store %arg6[%c0_52, %c1_53, %c0_54], %77 {strides = array<i32>} : memref<1x2x16xf32, #tpu.memory_space<vmem>>, vector<1x1x16xf32>,
    return
  }
  func.func @transform_0(%arg0: i32) -> (i32, i32, i32, i32) {
    %c0_i32 = arith.constant 0 : i32
    %c0_i32_0 = arith.constant 0 : i32
    %c0_i32_1 = arith.constant 0 : i32
    %c0_i32_2 = arith.constant 0 : i32
    return %arg0, %c0_i32, %c0_i32_0, %c0_i32_1 : i32, i32, i32, i32
  }
  func.func @transform_1(%arg0: i32) -> (i32, i32) {
    %c0_i32 = arith.constant 0 : i32
    %c0_i32_0 = arith.constant 0 : i32
    %c0_i32_1 = arith.constant 0 : i32
    return %c0_i32, %c0_i32_0 : i32, i32
  }
  func.func @transform_2(%arg0: i32) -> (i32, i32) {
    %c0_i32 = arith.constant 0 : i32
    %c0_i32_0 = arith.constant 0 : i32
    %c0_i32_1 = arith.constant 0 : i32
    return %c0_i32, %c0_i32_0 : i32, i32
  }
  func.func @transform_3(%arg0: i32) -> (i32, i32, i32) {
    %c0_i32 = arith.constant 0 : i32
    %c0_i32_0 = arith.constant 0 : i32
    %c0_i32_1 = arith.constant 0 : i32
    %c0_i32_2 = arith.constant 0 : i32
    return %c0_i32, %c0_i32_0, %c0_i32_1 : i32, i32, i32
  }
  func.func @transform_4(%arg0: i32) -> (i32, i32, i32, i32) {
    %c0_i32 = arith.constant 0 : i32
    %c0_i32_0 = arith.constant 0 : i32
    %c0_i32_1 = arith.constant 0 : i32
    %c0_i32_2 = arith.constant 0 : i32
    return %arg0, %c0_i32, %c0_i32_0, %c0_i32_1 : i32, i32, i32, i32
  }
  func.func @transform_5(%arg0: i32) -> (i32, i32, i32) {
    %c0_i32 = arith.constant 0 : i32
    %c0_i32_0 = arith.constant 0 : i32
    %c0_i32_1 = arith.constant 0 : i32
    return %arg0, %c0_i32, %c0_i32_0 : i32, i32, i32
  }
}

module attributes {stable_mosaic.version = 11 : i64} {
  func.func @_conv_bn_stage_kernel(%arg0: i32, %arg1: memref<1x16x16x16xf32, #tpu.memory_space<vmem>>, %arg2: memref<1x16xf32, #tpu.memory_space<vmem>>, %arg3: memref<1x16xf32, #tpu.memory_space<vmem>>, %arg4: memref<9x16x16xbf16, #tpu.memory_space<vmem>>, %arg5: memref<1x16x16x16xf32, #tpu.memory_space<vmem>>, %arg6: memref<1x2x16xf32, #tpu.memory_space<vmem>>, %arg7: memref<1x18x32x16xbf16, #tpu.memory_space<vmem>>) attributes {dimension_semantics = [#tpu.dimension_semantics<parallel>], iteration_bounds = array<i64: 2>, scalar_prefetch = 0 : i64, scratch_operands = 1 : i64, tpu.core_type = #tpu.core_type<tc>, window_params = [{transform_indices = @transform_0, window_bounds = array<i64: 1, 16, 16, 16>}, {pipeline_mode = #tpu.pipeline_mode<synchronous>, transform_indices = @transform_1, window_bounds = array<i64: 1, 16>}, {pipeline_mode = #tpu.pipeline_mode<synchronous>, transform_indices = @transform_2, window_bounds = array<i64: 1, 16>}, {pipeline_mode = #tpu.pipeline_mode<synchronous>, transform_indices = @transform_3, window_bounds = array<i64: 9, 16, 16>}, {transform_indices = @transform_4, window_bounds = array<i64: 1, 16, 16, 16>}, {transform_indices = @transform_5, window_bounds = array<i64: 1, 2, 16>}]} {
    %c0 = arith.constant 0 : index
    %c0_0 = arith.constant 0 : index
    %c0_1 = arith.constant 0 : index
    %c0_2 = arith.constant 0 : index
    %0 = vector.load %arg1[%c0, %c0_0, %c0_1, %c0_2] : memref<1x16x16x16xf32, #tpu.memory_space<vmem>>, vector<1x16x16x16xf32>
    %c0_3 = arith.constant 0 : index
    %c0_4 = arith.constant 0 : index
    %1 = vector.load %arg2[%c0_3, %c0_4] : memref<1x16xf32, #tpu.memory_space<vmem>>, vector<1x16xf32>
    %2 = vector.shape_cast %1 : vector<1x16xf32> to vector<1x1x1x16xf32>
    %3 = vector.broadcast %2 : vector<1x1x1x16xf32> to vector<1x16x16x16xf32>
    %4 = arith.mulf %0, %3 : vector<1x16x16x16xf32>
    %c0_5 = arith.constant 0 : index
    %c0_6 = arith.constant 0 : index
    %5 = vector.load %arg3[%c0_5, %c0_6] : memref<1x16xf32, #tpu.memory_space<vmem>>, vector<1x16xf32>
    %6 = vector.shape_cast %5 : vector<1x16xf32> to vector<1x1x1x16xf32>
    %7 = vector.broadcast %6 : vector<1x1x1x16xf32> to vector<1x16x16x16xf32>
    %8 = arith.addf %4, %7 : vector<1x16x16x16xf32>
    %cst = arith.constant 0.000000e+00 : f32
    %9 = vector.broadcast %cst : f32 to vector<1x16x16x16xf32>
    %10 = arith.maximumf %8, %9 : vector<1x16x16x16xf32>
    %11 = arith.truncf %10 : vector<1x16x16x16xf32> to vector<1x16x16x16xbf16>
    %cst_7 = arith.constant 0.000000e+00 : bf16
    %12 = vector.broadcast %cst_7 : bf16 to vector<1x1x18x16xbf16>
    %cst_8 = arith.constant 0.000000e+00 : bf16
    %13 = vector.broadcast %cst_8 : bf16 to vector<1x16x1x16xbf16>
    %c0_9 = arith.constant 0 : index
    %c0_10 = arith.constant 0 : index
    %c7 = arith.constant 7 : index
    %c0_11 = arith.constant 0 : index
    %14 = vector.load %arg7[%c0_9, %c0_10, %c7, %c0_11] : memref<1x18x32x16xbf16, #tpu.memory_space<vmem>>, vector<1x1x18x16xbf16>
    tpu.vector_store %arg7[%c0_9, %c0_10, %c7, %c0_11], %12 {strides = array<i32>} : memref<1x18x32x16xbf16, #tpu.memory_space<vmem>>, vector<1x1x18x16xbf16>,
    %c0_12 = arith.constant 0 : index
    %c17 = arith.constant 17 : index
    %c7_13 = arith.constant 7 : index
    %c0_14 = arith.constant 0 : index
    %15 = vector.load %arg7[%c0_12, %c17, %c7_13, %c0_14] : memref<1x18x32x16xbf16, #tpu.memory_space<vmem>>, vector<1x1x18x16xbf16>
    tpu.vector_store %arg7[%c0_12, %c17, %c7_13, %c0_14], %12 {strides = array<i32>} : memref<1x18x32x16xbf16, #tpu.memory_space<vmem>>, vector<1x1x18x16xbf16>,
    %c0_15 = arith.constant 0 : index
    %c1 = arith.constant 1 : index
    %c7_16 = arith.constant 7 : index
    %c0_17 = arith.constant 0 : index
    %16 = vector.load %arg7[%c0_15, %c1, %c7_16, %c0_17] : memref<1x18x32x16xbf16, #tpu.memory_space<vmem>>, vector<1x16x1x16xbf16>
    tpu.vector_store %arg7[%c0_15, %c1, %c7_16, %c0_17], %13 {strides = array<i32>} : memref<1x18x32x16xbf16, #tpu.memory_space<vmem>>, vector<1x16x1x16xbf16>,
    %c0_18 = arith.constant 0 : index
    %c1_19 = arith.constant 1 : index
    %c24 = arith.constant 24 : index
    %c0_20 = arith.constant 0 : index
    %17 = vector.load %arg7[%c0_18, %c1_19, %c24, %c0_20] : memref<1x18x32x16xbf16, #tpu.memory_space<vmem>>, vector<1x16x1x16xbf16>
    tpu.vector_store %arg7[%c0_18, %c1_19, %c24, %c0_20], %13 {strides = array<i32>} : memref<1x18x32x16xbf16, #tpu.memory_space<vmem>>, vector<1x16x1x16xbf16>,
    %c0_21 = arith.constant 0 : index
    %c1_22 = arith.constant 1 : index
    %c8 = arith.constant 8 : index
    %c0_23 = arith.constant 0 : index
    %18 = vector.load %arg7[%c0_21, %c1_22, %c8, %c0_23] : memref<1x18x32x16xbf16, #tpu.memory_space<vmem>>, vector<1x16x16x16xbf16>
    tpu.vector_store %arg7[%c0_21, %c1_22, %c8, %c0_23], %11 {strides = array<i32>} : memref<1x18x32x16xbf16, #tpu.memory_space<vmem>>, vector<1x16x16x16xbf16>,
    %c0_24 = arith.constant 0 : index
    %c0_25 = arith.constant 0 : index
    %c0_26 = arith.constant 0 : index
    %19 = vector.load %arg4[%c0_24, %c0_25, %c0_26] : memref<9x16x16xbf16, #tpu.memory_space<vmem>>, vector<9x16x16xbf16>
    %cst_27 = arith.constant 0.000000e+00 : f32
    %20 = vector.broadcast %cst_27 : f32 to vector<256x16xf32>
    %c0_28 = arith.constant 0 : index
    %c0_29 = arith.constant 0 : index
    %c7_30 = arith.constant 7 : index
    %c0_31 = arith.constant 0 : index
    %21 = vector.load %arg7[%c0_28, %c0_29, %c7_30, %c0_31] : memref<1x18x32x16xbf16, #tpu.memory_space<vmem>>, vector<1x18x16x16xbf16>
    %22 = vector.extract_strided_slice %21 {offsets = [0, 0, 0, 0], sizes = [1, 16, 16, 16], strides = [1, 1, 1, 1]} : vector<1x18x16x16xbf16> to vector<1x16x16x16xbf16>
    %23 = vector.shape_cast %22 : vector<1x16x16x16xbf16> to vector<256x16xbf16>
    %24 = vector.extract_strided_slice %19 {offsets = [0, 0, 0], sizes = [1, 16, 16], strides = [1, 1, 1]} : vector<9x16x16xbf16> to vector<1x16x16xbf16>
    %25 = vector.shape_cast %24 : vector<1x16x16xbf16> to vector<16x16xbf16>
    %cst_32 = arith.constant dense<0.000000e+00> : vector<256x16xf32>
    %26 = tpu.matmul %23, %25, %cst_32 {dimension_numbers = #tpu.dot_dimension_numbers<[1], [0], [0], [1], [0, 0, 1, 1], [], []>} : vector<256x16xbf16>, vector<16x16xbf16>, vector<256x16xf32> -> vector<256x16xf32>
    %27 = arith.addf %20, %26 : vector<256x16xf32>
    %28 = vector.extract_strided_slice %21 {offsets = [0, 1, 0, 0], sizes = [1, 16, 16, 16], strides = [1, 1, 1, 1]} : vector<1x18x16x16xbf16> to vector<1x16x16x16xbf16>
    %29 = vector.shape_cast %28 : vector<1x16x16x16xbf16> to vector<256x16xbf16>
    %30 = vector.extract_strided_slice %19 {offsets = [3, 0, 0], sizes = [1, 16, 16], strides = [1, 1, 1]} : vector<9x16x16xbf16> to vector<1x16x16xbf16>
    %31 = vector.shape_cast %30 : vector<1x16x16xbf16> to vector<16x16xbf16>
    %cst_33 = arith.constant dense<0.000000e+00> : vector<256x16xf32>
    %32 = tpu.matmul %29, %31, %cst_33 {dimension_numbers = #tpu.dot_dimension_numbers<[1], [0], [0], [1], [0, 0, 1, 1], [], []>} : vector<256x16xbf16>, vector<16x16xbf16>, vector<256x16xf32> -> vector<256x16xf32>
    %33 = arith.addf %27, %32 : vector<256x16xf32>
    %34 = vector.extract_strided_slice %21 {offsets = [0, 2, 0, 0], sizes = [1, 16, 16, 16], strides = [1, 1, 1, 1]} : vector<1x18x16x16xbf16> to vector<1x16x16x16xbf16>
    %35 = vector.shape_cast %34 : vector<1x16x16x16xbf16> to vector<256x16xbf16>
    %36 = vector.extract_strided_slice %19 {offsets = [6, 0, 0], sizes = [1, 16, 16], strides = [1, 1, 1]} : vector<9x16x16xbf16> to vector<1x16x16xbf16>
    %37 = vector.shape_cast %36 : vector<1x16x16xbf16> to vector<16x16xbf16>
    %cst_34 = arith.constant dense<0.000000e+00> : vector<256x16xf32>
    %38 = tpu.matmul %35, %37, %cst_34 {dimension_numbers = #tpu.dot_dimension_numbers<[1], [0], [0], [1], [0, 0, 1, 1], [], []>} : vector<256x16xbf16>, vector<16x16xbf16>, vector<256x16xf32> -> vector<256x16xf32>
    %39 = arith.addf %33, %38 : vector<256x16xf32>
    %c0_35 = arith.constant 0 : index
    %c0_36 = arith.constant 0 : index
    %c8_37 = arith.constant 8 : index
    %c0_38 = arith.constant 0 : index
    %40 = vector.load %arg7[%c0_35, %c0_36, %c8_37, %c0_38] : memref<1x18x32x16xbf16, #tpu.memory_space<vmem>>, vector<1x18x16x16xbf16>
    %41 = vector.extract_strided_slice %40 {offsets = [0, 0, 0, 0], sizes = [1, 16, 16, 16], strides = [1, 1, 1, 1]} : vector<1x18x16x16xbf16> to vector<1x16x16x16xbf16>
    %42 = vector.shape_cast %41 : vector<1x16x16x16xbf16> to vector<256x16xbf16>
    %43 = vector.extract_strided_slice %19 {offsets = [1, 0, 0], sizes = [1, 16, 16], strides = [1, 1, 1]} : vector<9x16x16xbf16> to vector<1x16x16xbf16>
    %44 = vector.shape_cast %43 : vector<1x16x16xbf16> to vector<16x16xbf16>
    %cst_39 = arith.constant dense<0.000000e+00> : vector<256x16xf32>
    %45 = tpu.matmul %42, %44, %cst_39 {dimension_numbers = #tpu.dot_dimension_numbers<[1], [0], [0], [1], [0, 0, 1, 1], [], []>} : vector<256x16xbf16>, vector<16x16xbf16>, vector<256x16xf32> -> vector<256x16xf32>
    %46 = arith.addf %39, %45 : vector<256x16xf32>
    %47 = vector.extract_strided_slice %40 {offsets = [0, 1, 0, 0], sizes = [1, 16, 16, 16], strides = [1, 1, 1, 1]} : vector<1x18x16x16xbf16> to vector<1x16x16x16xbf16>
    %48 = vector.shape_cast %47 : vector<1x16x16x16xbf16> to vector<256x16xbf16>
    %49 = vector.extract_strided_slice %19 {offsets = [4, 0, 0], sizes = [1, 16, 16], strides = [1, 1, 1]} : vector<9x16x16xbf16> to vector<1x16x16xbf16>
    %50 = vector.shape_cast %49 : vector<1x16x16xbf16> to vector<16x16xbf16>
    %cst_40 = arith.constant dense<0.000000e+00> : vector<256x16xf32>
    %51 = tpu.matmul %48, %50, %cst_40 {dimension_numbers = #tpu.dot_dimension_numbers<[1], [0], [0], [1], [0, 0, 1, 1], [], []>} : vector<256x16xbf16>, vector<16x16xbf16>, vector<256x16xf32> -> vector<256x16xf32>
    %52 = arith.addf %46, %51 : vector<256x16xf32>
    %53 = vector.extract_strided_slice %40 {offsets = [0, 2, 0, 0], sizes = [1, 16, 16, 16], strides = [1, 1, 1, 1]} : vector<1x18x16x16xbf16> to vector<1x16x16x16xbf16>
    %54 = vector.shape_cast %53 : vector<1x16x16x16xbf16> to vector<256x16xbf16>
    %55 = vector.extract_strided_slice %19 {offsets = [7, 0, 0], sizes = [1, 16, 16], strides = [1, 1, 1]} : vector<9x16x16xbf16> to vector<1x16x16xbf16>
    %56 = vector.shape_cast %55 : vector<1x16x16xbf16> to vector<16x16xbf16>
    %cst_41 = arith.constant dense<0.000000e+00> : vector<256x16xf32>
    %57 = tpu.matmul %54, %56, %cst_41 {dimension_numbers = #tpu.dot_dimension_numbers<[1], [0], [0], [1], [0, 0, 1, 1], [], []>} : vector<256x16xbf16>, vector<16x16xbf16>, vector<256x16xf32> -> vector<256x16xf32>
    %58 = arith.addf %52, %57 : vector<256x16xf32>
    %c0_42 = arith.constant 0 : index
    %c0_43 = arith.constant 0 : index
    %c9 = arith.constant 9 : index
    %c0_44 = arith.constant 0 : index
    %59 = vector.load %arg7[%c0_42, %c0_43, %c9, %c0_44] : memref<1x18x32x16xbf16, #tpu.memory_space<vmem>>, vector<1x18x16x16xbf16>
    %60 = vector.extract_strided_slice %59 {offsets = [0, 0, 0, 0], sizes = [1, 16, 16, 16], strides = [1, 1, 1, 1]} : vector<1x18x16x16xbf16> to vector<1x16x16x16xbf16>
    %61 = vector.shape_cast %60 : vector<1x16x16x16xbf16> to vector<256x16xbf16>
    %62 = vector.extract_strided_slice %19 {offsets = [2, 0, 0], sizes = [1, 16, 16], strides = [1, 1, 1]} : vector<9x16x16xbf16> to vector<1x16x16xbf16>
    %63 = vector.shape_cast %62 : vector<1x16x16xbf16> to vector<16x16xbf16>
    %cst_45 = arith.constant dense<0.000000e+00> : vector<256x16xf32>
    %64 = tpu.matmul %61, %63, %cst_45 {dimension_numbers = #tpu.dot_dimension_numbers<[1], [0], [0], [1], [0, 0, 1, 1], [], []>} : vector<256x16xbf16>, vector<16x16xbf16>, vector<256x16xf32> -> vector<256x16xf32>
    %65 = arith.addf %58, %64 : vector<256x16xf32>
    %66 = vector.extract_strided_slice %59 {offsets = [0, 1, 0, 0], sizes = [1, 16, 16, 16], strides = [1, 1, 1, 1]} : vector<1x18x16x16xbf16> to vector<1x16x16x16xbf16>
    %67 = vector.shape_cast %66 : vector<1x16x16x16xbf16> to vector<256x16xbf16>
    %68 = vector.extract_strided_slice %19 {offsets = [5, 0, 0], sizes = [1, 16, 16], strides = [1, 1, 1]} : vector<9x16x16xbf16> to vector<1x16x16xbf16>
    %69 = vector.shape_cast %68 : vector<1x16x16xbf16> to vector<16x16xbf16>
    %cst_46 = arith.constant dense<0.000000e+00> : vector<256x16xf32>
    %70 = tpu.matmul %67, %69, %cst_46 {dimension_numbers = #tpu.dot_dimension_numbers<[1], [0], [0], [1], [0, 0, 1, 1], [], []>} : vector<256x16xbf16>, vector<16x16xbf16>, vector<256x16xf32> -> vector<256x16xf32>
    %71 = arith.addf %65, %70 : vector<256x16xf32>
    %72 = vector.extract_strided_slice %59 {offsets = [0, 2, 0, 0], sizes = [1, 16, 16, 16], strides = [1, 1, 1, 1]} : vector<1x18x16x16xbf16> to vector<1x16x16x16xbf16>
    %73 = vector.shape_cast %72 : vector<1x16x16x16xbf16> to vector<256x16xbf16>
    %74 = vector.extract_strided_slice %19 {offsets = [8, 0, 0], sizes = [1, 16, 16], strides = [1, 1, 1]} : vector<9x16x16xbf16> to vector<1x16x16xbf16>
    %75 = vector.shape_cast %74 : vector<1x16x16xbf16> to vector<16x16xbf16>
    %cst_47 = arith.constant dense<0.000000e+00> : vector<256x16xf32>
    %76 = tpu.matmul %73, %75, %cst_47 {dimension_numbers = #tpu.dot_dimension_numbers<[1], [0], [0], [1], [0, 0, 1, 1], [], []>} : vector<256x16xbf16>, vector<16x16xbf16>, vector<256x16xf32> -> vector<256x16xf32>
    %77 = arith.addf %71, %76 : vector<256x16xf32>
    %78 = vector.shape_cast %77 : vector<256x16xf32> to vector<1x16x16x16xf32>
    %c0_48 = arith.constant 0 : index
    %c0_49 = arith.constant 0 : index
    %c0_50 = arith.constant 0 : index
    %c0_51 = arith.constant 0 : index
    %79 = vector.load %arg5[%c0_48, %c0_49, %c0_50, %c0_51] : memref<1x16x16x16xf32, #tpu.memory_space<vmem>>, vector<1x16x16x16xf32>
    tpu.vector_store %arg5[%c0_48, %c0_49, %c0_50, %c0_51], %78 {strides = array<i32>} : memref<1x16x16x16xf32, #tpu.memory_space<vmem>>, vector<1x16x16x16xf32>,
    %cst_52 = arith.constant dense<0.000000e+00> : vector<16xf32>
    %80 = vector.multi_reduction <add>, %77, %cst_52 [0] : vector<256x16xf32> to vector<16xf32>
    %81 = vector.shape_cast %80 : vector<16xf32> to vector<1x16xf32>
    %82 = arith.mulf %77, %77 : vector<256x16xf32>
    %cst_53 = arith.constant dense<0.000000e+00> : vector<16xf32>
    %83 = vector.multi_reduction <add>, %82, %cst_53 [0] : vector<256x16xf32> to vector<16xf32>
    %84 = vector.shape_cast %83 : vector<16xf32> to vector<1x16xf32>
    %85 = vector.shape_cast %81 : vector<1x16xf32> to vector<1x1x16xf32>
    %c0_54 = arith.constant 0 : index
    %c0_55 = arith.constant 0 : index
    %c0_56 = arith.constant 0 : index
    %86 = vector.load %arg6[%c0_54, %c0_55, %c0_56] : memref<1x2x16xf32, #tpu.memory_space<vmem>>, vector<1x1x16xf32>
    tpu.vector_store %arg6[%c0_54, %c0_55, %c0_56], %85 {strides = array<i32>} : memref<1x2x16xf32, #tpu.memory_space<vmem>>, vector<1x1x16xf32>,
    %87 = vector.shape_cast %84 : vector<1x16xf32> to vector<1x1x16xf32>
    %c0_57 = arith.constant 0 : index
    %c1_58 = arith.constant 1 : index
    %c0_59 = arith.constant 0 : index
    %88 = vector.load %arg6[%c0_57, %c1_58, %c0_59] : memref<1x2x16xf32, #tpu.memory_space<vmem>>, vector<1x1x16xf32>
    tpu.vector_store %arg6[%c0_57, %c1_58, %c0_59], %87 {strides = array<i32>} : memref<1x2x16xf32, #tpu.memory_space<vmem>>, vector<1x1x16xf32>,
    return
  }
  func.func @transform_0(%arg0: i32) -> (i32, i32, i32, i32) {
    %c0_i32 = arith.constant 0 : i32
    %c0_i32_0 = arith.constant 0 : i32
    %c0_i32_1 = arith.constant 0 : i32
    %c0_i32_2 = arith.constant 0 : i32
    return %arg0, %c0_i32, %c0_i32_0, %c0_i32_1 : i32, i32, i32, i32
  }
  func.func @transform_1(%arg0: i32) -> (i32, i32) {
    %c0_i32 = arith.constant 0 : i32
    %c0_i32_0 = arith.constant 0 : i32
    %c0_i32_1 = arith.constant 0 : i32
    return %c0_i32, %c0_i32_0 : i32, i32
  }
  func.func @transform_2(%arg0: i32) -> (i32, i32) {
    %c0_i32 = arith.constant 0 : i32
    %c0_i32_0 = arith.constant 0 : i32
    %c0_i32_1 = arith.constant 0 : i32
    return %c0_i32, %c0_i32_0 : i32, i32
  }
  func.func @transform_3(%arg0: i32) -> (i32, i32, i32) {
    %c0_i32 = arith.constant 0 : i32
    %c0_i32_0 = arith.constant 0 : i32
    %c0_i32_1 = arith.constant 0 : i32
    %c0_i32_2 = arith.constant 0 : i32
    return %c0_i32, %c0_i32_0, %c0_i32_1 : i32, i32, i32
  }
  func.func @transform_4(%arg0: i32) -> (i32, i32, i32, i32) {
    %c0_i32 = arith.constant 0 : i32
    %c0_i32_0 = arith.constant 0 : i32
    %c0_i32_1 = arith.constant 0 : i32
    %c0_i32_2 = arith.constant 0 : i32
    return %arg0, %c0_i32, %c0_i32_0, %c0_i32_1 : i32, i32, i32, i32
  }
  func.func @transform_5(%arg0: i32) -> (i32, i32, i32) {
    %c0_i32 = arith.constant 0 : i32
    %c0_i32_0 = arith.constant 0 : i32
    %c0_i32_1 = arith.constant 0 : i32
    return %arg0, %c0_i32, %c0_i32_0 : i32, i32, i32
  }
}

module attributes {stable_mosaic.version = 11 : i64} {
  func.func @_bn_residual_relu_kernel(%arg0: i32, %arg1: memref<1x16x16x16xf32, #tpu.memory_space<vmem>>, %arg2: memref<1x16xf32, #tpu.memory_space<vmem>>, %arg3: memref<1x16xf32, #tpu.memory_space<vmem>>, %arg4: memref<1x16x16x16xf32, #tpu.memory_space<vmem>>, %arg5: memref<1x16x16x16xf32, #tpu.memory_space<vmem>>) attributes {dimension_semantics = [#tpu.dimension_semantics<parallel>], iteration_bounds = array<i64: 2>, scalar_prefetch = 0 : i64, scratch_operands = 0 : i64, tpu.core_type = #tpu.core_type<tc>, window_params = [{transform_indices = @transform_0, window_bounds = array<i64: 1, 16, 16, 16>}, {pipeline_mode = #tpu.pipeline_mode<synchronous>, transform_indices = @transform_1, window_bounds = array<i64: 1, 16>}, {pipeline_mode = #tpu.pipeline_mode<synchronous>, transform_indices = @transform_2, window_bounds = array<i64: 1, 16>}, {transform_indices = @transform_3, window_bounds = array<i64: 1, 16, 16, 16>}, {transform_indices = @transform_4, window_bounds = array<i64: 1, 16, 16, 16>}]} {
    %c0 = arith.constant 0 : index
    %c0_0 = arith.constant 0 : index
    %c0_1 = arith.constant 0 : index
    %c0_2 = arith.constant 0 : index
    %0 = vector.load %arg1[%c0, %c0_0, %c0_1, %c0_2] : memref<1x16x16x16xf32, #tpu.memory_space<vmem>>, vector<1x16x16x16xf32>
    %c0_3 = arith.constant 0 : index
    %c0_4 = arith.constant 0 : index
    %1 = vector.load %arg2[%c0_3, %c0_4] : memref<1x16xf32, #tpu.memory_space<vmem>>, vector<1x16xf32>
    %2 = vector.shape_cast %1 : vector<1x16xf32> to vector<1x1x1x16xf32>
    %3 = vector.broadcast %2 : vector<1x1x1x16xf32> to vector<1x16x16x16xf32>
    %4 = arith.mulf %0, %3 : vector<1x16x16x16xf32>
    %c0_5 = arith.constant 0 : index
    %c0_6 = arith.constant 0 : index
    %5 = vector.load %arg3[%c0_5, %c0_6] : memref<1x16xf32, #tpu.memory_space<vmem>>, vector<1x16xf32>
    %6 = vector.shape_cast %5 : vector<1x16xf32> to vector<1x1x1x16xf32>
    %7 = vector.broadcast %6 : vector<1x1x1x16xf32> to vector<1x16x16x16xf32>
    %8 = arith.addf %4, %7 : vector<1x16x16x16xf32>
    %c0_7 = arith.constant 0 : index
    %c0_8 = arith.constant 0 : index
    %c0_9 = arith.constant 0 : index
    %c0_10 = arith.constant 0 : index
    %9 = vector.load %arg4[%c0_7, %c0_8, %c0_9, %c0_10] : memref<1x16x16x16xf32, #tpu.memory_space<vmem>>, vector<1x16x16x16xf32>
    %10 = arith.addf %8, %9 : vector<1x16x16x16xf32>
    %cst = arith.constant 0.000000e+00 : f32
    %11 = vector.broadcast %cst : f32 to vector<1x16x16x16xf32>
    %12 = arith.maximumf %10, %11 : vector<1x16x16x16xf32>
    %c0_11 = arith.constant 0 : index
    %c0_12 = arith.constant 0 : index
    %c0_13 = arith.constant 0 : index
    %c0_14 = arith.constant 0 : index
    %13 = vector.load %arg5[%c0_11, %c0_12, %c0_13, %c0_14] : memref<1x16x16x16xf32, #tpu.memory_space<vmem>>, vector<1x16x16x16xf32>
    tpu.vector_store %arg5[%c0_11, %c0_12, %c0_13, %c0_14], %12 {strides = array<i32>} : memref<1x16x16x16xf32, #tpu.memory_space<vmem>>, vector<1x16x16x16xf32>,
    return
  }
  func.func @transform_0(%arg0: i32) -> (i32, i32, i32, i32) {
    %c0_i32 = arith.constant 0 : i32
    %c0_i32_0 = arith.constant 0 : i32
    %c0_i32_1 = arith.constant 0 : i32
    %c0_i32_2 = arith.constant 0 : i32
    return %arg0, %c0_i32, %c0_i32_0, %c0_i32_1 : i32, i32, i32, i32
  }
  func.func @transform_1(%arg0: i32) -> (i32, i32) {
    %c0_i32 = arith.constant 0 : i32
    %c0_i32_0 = arith.constant 0 : i32
    %c0_i32_1 = arith.constant 0 : i32
    return %c0_i32, %c0_i32_0 : i32, i32
  }
  func.func @transform_2(%arg0: i32) -> (i32, i32) {
    %c0_i32 = arith.constant 0 : i32
    %c0_i32_0 = arith.constant 0 : i32
    %c0_i32_1 = arith.constant 0 : i32
    return %c0_i32, %c0_i32_0 : i32, i32
  }
  func.func @transform_3(%arg0: i32) -> (i32, i32, i32, i32) {
    %c0_i32 = arith.constant 0 : i32
    %c0_i32_0 = arith.constant 0 : i32
    %c0_i32_1 = arith.constant 0 : i32
    %c0_i32_2 = arith.constant 0 : i32
    return %arg0, %c0_i32, %c0_i32_0, %c0_i32_1 : i32, i32, i32, i32
  }
  func.func @transform_4(%arg0: i32) -> (i32, i32, i32, i32) {
    %c0_i32 = arith.constant 0 : i32
    %c0_i32_0 = arith.constant 0 : i32
    %c0_i32_1 = arith.constant 0 : i32
    %c0_i32_2 = arith.constant 0 : i32
    return %arg0, %c0_i32, %c0_i32_0, %c0_i32_1 : i32, i32, i32, i32
  }
}

</mosaic_0001>

<bundles_post_ra>
// kernel: residual_block.5
= control target key start
LH: loop header
LB: loop body
LE: loop exit
PB: predicated region body
PF: predicated region fallthrough
CT: control target
= control target key end

     0   :  { %s583_s15 = smov 0   ;;  %s816_s0 = inlined_call_operand.vmem [shape: f32[2,16,16,16], index: 0, kind: input, shape index: {}]   ;;  %s817_s1 = inlined_call_operand.vmem [shape: f32[1,16], index: 1, kind: input, shape index: {}]   ;;  %s818_s2 = inlined_call_operand.vmem [shape: f32[1,16], index: 2, kind: input, shape index: {}]   ;;  %s819_s3 = inlined_call_operand.vmem [shape: f32[2,16,16,16], index: 3, kind: input, shape index: {}]   ;;  %s820_s4 = inlined_call_operand.vmem [shape: f32[2,16,16,16], index: 4, kind: output, shape index: {}]  }
   0x1 LB: > { %s524_s16 = sadd.s32 4294967295, %s556_s15   ;;  %p528_p0 = scmp.ge.s32.totalorder %s556_s15, 1  ;;  %s556_s15 = sphi %s583_s15, %s14_s15  }
   0x2   : > { %p172_p1 = scmp.lt.s32.totalorder %s556_s15, 3 }
   0x4   : > { %p173_p2 = pnand %p528_p0, %p172_p1 }
   0x5   : > { %p203_p3 = scmp.lt.s32.totalorder (!%p173_p2), %s524_s16, 1  ;;  %v596_v0 = vld [vmem:[%s817_s1] ss:$0 sm:$0xff] (!%p173_p2)  ;;  %vm424_vm0 = vcmask (!%p173_p2), 130048  }
   0x6   : > { %176 = sbr.rel (%p173_p2) target bundleno = 55 (0x37), region = 36  ;;  %v614_v2 = vld [vmem:[%s818_s2] ss:$0 sm:$0xff] (!%p173_p2) }
   0xd   : > { %s822_s16 = smov (!%p203_p3, %s524_s16), 1 }
   0xe   : > { %s591_s17 = sshll.u32 %s822_s16, 8 }
   0xf   : > { %s602_s22 = scalar_lea.vmem %s816_s0, %s591_s17  ;;  %s608_s25 = scalar_lea.vmem %s819_s3, %s591_s17 }
  0x10   : > { %v218_v1 = vld [vmem:[%s602_s22] sm:$0xff]  ;;  %v219_v3 = vld [vmem:[%s602_s22 + $0x8] sm:$0xff]  ;;  %v220_v7 = vld [vmem:[%s602_s22 + $0x10] sm:$0xff]  ;;  %s644_s30 = scalar_lea.vmem %s820_s4, %s591_s17 }
  0x11   : > { %v257_v4 = vmul.f32 %v596_v0, %v218_v1  ;;  %v328_v5 = vld [vmem:[%s608_s25] sm:$0xff]  ;;  %v258_v6 = vmul.f32 %v596_v0, %v219_v3  ;;  %v329_v8 = vld [vmem:[%s608_s25 + $0x8] sm:$0xff]  ;;  %v259_v9 = vmul.f32 %v596_v0, %v220_v7  ;;  %v221_v10 = vld [vmem:[%s602_s22 + $0x18] sm:$0xff] }
  0x12   : > { %v222_v11 = vld [vmem:[%s602_s22 + $0x20] sm:$0xff]  ;;  %v330_v14 = vld [vmem:[%s608_s25 + $0x10] sm:$0xff]  ;;  %v260_v15 = vmul.f32 %v596_v0, %v221_v10  ;;  %v331_v16 = vld [vmem:[%s608_s25 + $0x18] sm:$0xff] }
  0x13   : > { %v296_v12 = vadd.f32 %v614_v2, %v257_v4  ;;  %v297_v13 = vadd.f32 %v614_v2, %v258_v6  ;;  %v261_v17 = vmul.f32 %v596_v0, %v222_v11  ;;  %v223_v18 = vld [vmem:[%s602_s22 + $0x28] sm:$0xff]  ;;  %v298_v19 = vadd.f32 %v614_v2, %v259_v9  ;;  %v332_v20 = vld [vmem:[%s608_s25 + $0x20] sm:$0xff]  ;;  %v224_v22 = vld [vmem:[%s602_s22 + $0x30] sm:$0xff] }
  0x14   : > { %v262_v21 = vmul.f32 %v596_v0, %v223_v18  ;;  %v225_v23 = vld [vmem:[%s602_s22 + $0x38] sm:$0xff]  ;;  %v299_v26 = vadd.f32 %v614_v2, %v260_v15  ;;  %v333_v28 = vld [vmem:[%s608_s25 + $0x28] sm:$0xff]  ;;  %v263_v31 = vmul.f32 %v596_v0, %v224_v22  ;;  %v226_v33 = vld [vmem:[%s602_s22 + $0x40] sm:$0xff] }
  0x15   : > { %v360_v24 = vadd.f32 %v328_v5, %v296_v12  ;;  %v361_v25 = vadd.f32 %v329_v8, %v297_v13  ;;  %v300_v27 = vadd.f32 %v614_v2, %v261_v17  ;;  %v362_v29 = vadd.f32 %v330_v14, %v298_v19  ;;  %v227_v34 = vld [vmem:[%s602_s22 + $0x48] sm:$0xff]  ;;  %v334_v39 = vld [vmem:[%s608_s25 + $0x30] sm:$0xff]  ;;  %v335_v40 = vld [vmem:[%s608_s25 + $0x38] sm:$0xff] }
  0x16   : > { %v301_v30 = vadd.f32 %v614_v2, %v262_v21  ;;  %v264_v32 = vmul.f32 %v596_v0, %v225_v23  ;;  %v363_v37 = vadd.f32 %v331_v16, %v299_v26  ;;  %v228_v41 = vld [vmem:[%s602_s22 + $0x50] sm:$0xff]  ;;  %v302_v44 = vadd.f32 %v614_v2, %v263_v31  ;;  %v229_v46 = vld [vmem:[%s602_s22 + $0x58] sm:$0xff]  ;;  %v230_v47 = vld [vmem:[%s602_s22 + $0x60] sm:$0xff] }
  0x17   : > { %v392_v35 = vmax.f32 %v360_v24, 0.0  ;;  %v393_v36 = vmax.f32 %v361_v25, 0.0  ;;  %v364_v38 = vadd.f32 %v332_v20, %v300_v27  ;;  %v394_v42 = vmax.f32 %v362_v29, 0.0  ;;  %v231_v52 = vld [vmem:[%s602_s22 + $0x68] sm:$0xff]  ;;  %v336_v56 = vld [vmem:[%s608_s25 + $0x40] sm:$0xff]  ;;  %v338_v61 = vld [vmem:[%s608_s25 + $0x50] sm:$0xff] }
  0x18   : > { %v365_v43 = vadd.f32 %v333_v28, %v301_v30  ;;  %v303_v45 = vadd.f32 %v614_v2, %v264_v32  ;;  %v395_v48 = vmax.f32 %v363_v37, 0.0  ;;  %v265_v50 = vmul.f32 %v596_v0, %v226_v33  ;;  %v337_v57 = vld [vmem:[%s608_s25 + $0x48] sm:$0xff]  ;;  %v232_v1 = vld [vmem:[%s602_s22 + $0x70] sm:$0xff]  ;;  %v233_v3 = vld [vmem:[%s602_s22 + $0x78] sm:$0xff] }
  0x19   : > { %425 = vst.msk [vmem:[%s644_s30] sm:$0xff] %vm424_vm0, %v392_v35  ;;  %426 = vst.msk [vmem:[%s644_s30 + $0x8] sm:$0xff] %vm424_vm0, %v393_v36  ;;  %v396_v49 = vmax.f32 %v364_v38, 0.0  ;;  %v266_v51 = vmul.f32 %v596_v0, %v227_v34  ;;  %v366_v54 = vadd.f32 %v334_v39, %v302_v44  ;;  %v267_v58 = vmul.f32 %v596_v0, %v228_v41  ;;  %v339_v7 = vld [vmem:[%s608_s25 + $0x58] sm:$0xff]  ;;  %v340_v8 = vld [vmem:[%s608_s25 + $0x60] sm:$0xff] }
  0x1a   : > { %427 = vst.msk [vmem:[%s644_s30 + $0x10] sm:$0xff] %vm424_vm0, %v394_v42  ;;  %v397_v53 = vmax.f32 %v365_v43, 0.0  ;;  %v367_v55 = vadd.f32 %v335_v40, %v303_v45  ;;  %428 = vst.msk [vmem:[%s644_s30 + $0x18] sm:$0xff] %vm424_vm0, %v395_v48  ;;  %v304_v59 = vadd.f32 %v614_v2, %v265_v50  ;;  %v268_v62 = vmul.f32 %v596_v0, %v229_v46  ;;  %v341_v14 = vld [vmem:[%s608_s25 + $0x68] sm:$0xff]  ;;  %v234_v19 = vld [vmem:[%s602_s22 + $0x80] sm:$0xff] }
  0x1b   : > { %429 = vst.msk [vmem:[%s644_s30 + $0x20] sm:$0xff] %vm424_vm0, %v396_v49  ;;  %v305_v60 = vadd.f32 %v614_v2, %v266_v51  ;;  %v269_v63 = vmul.f32 %v596_v0, %v230_v47  ;;  %v398_v4 = vmax.f32 %v366_v54, 0.0  ;;  %v306_v6 = vadd.f32 %v614_v2, %v267_v58  ;;  %v235_v20 = vld [vmem:[%s602_s22 + $0x88] sm:$0xff]  ;;  %v342_v25 = vld [vmem:[%s608_s25 + $0x70] sm:$0xff]  ;;  %v343_v26 = vld [vmem:[%s608_s25 + $0x78] sm:$0xff] }
  0x1c   : > { %430 = vst.msk [vmem:[%s644_s30 + $0x28] sm:$0xff] %vm424_vm0, %v397_v53  ;;  %v399_v5 = vmax.f32 %v367_v55, 0.0  ;;  %v270_v9 = vmul.f32 %v596_v0, %v231_v52  ;;  %v368_v10 = vadd.f32 %v336_v56, %v304_v59  ;;  %v307_v12 = vadd.f32 %v614_v2, %v268_v62  ;;  %v236_v27 = vld [vmem:[%s602_s22 + $0x90] sm:$0xff]  ;;  %v237_v32 = vld [vmem:[%s602_s22 + $0x98] sm:$0xff]  ;;  %v238_v33 = vld [vmem:[%s602_s22 + $0xa0] sm:$0xff] }
  0x1d   : > { %v369_v11 = vadd.f32 %v337_v57, %v305_v60  ;;  %v308_v13 = vadd.f32 %v614_v2, %v269_v63  ;;  %431 = vst.msk [vmem:[%s644_s30 + $0x30] sm:$0xff] %vm424_vm0, %v398_v4  ;;  %v370_v15 = vadd.f32 %v338_v61, %v306_v6  ;;  %v271_v17 = vmul.f32 %v596_v0, %v232_v1  ;;  %v239_v38 = vld [vmem:[%s602_s22 + $0xa8] sm:$0xff]  ;;  %v344_v42 = vld [vmem:[%s608_s25 + $0x80] sm:$0xff]  ;;  %v346_v47 = vld [vmem:[%s608_s25 + $0x90] sm:$0xff] }
  0x1e   : > { %432 = vst.msk [vmem:[%s644_s30 + $0x38] sm:$0xff] %vm424_vm0, %v399_v5  ;;  %v309_v16 = vadd.f32 %v614_v2, %v270_v9  ;;  %v272_v18 = vmul.f32 %v596_v0, %v233_v3  ;;  %v400_v21 = vmax.f32 %v368_v10, 0.0  ;;  %v371_v23 = vadd.f32 %v339_v7, %v307_v12  ;;  %v345_v43 = vld [vmem:[%s608_s25 + $0x88] sm:$0xff]  ;;  %v240_v50 = vld [vmem:[%s602_s22 + $0xb0] sm:$0xff]  ;;  %v241_v51 = vld [vmem:[%s602_s22 + $0xb8] sm:$0xff] }
  0x1f   : > { %v401_v22 = vmax.f32 %v369_v11, 0.0  ;;  %v372_v24 = vadd.f32 %v340_v8, %v308_v13  ;;  %v402_v28 = vmax.f32 %v370_v15, 0.0  ;;  %v310_v30 = vadd.f32 %v614_v2, %v271_v17  ;;  %v347_v55 = vld [vmem:[%s608_s25 + $0x98] sm:$0xff]  ;;  %v348_v56 = vld [vmem:[%s608_s25 + $0xa0] sm:$0xff]  ;;  %v349_v62 = vld [vmem:[%s608_s25 + $0xa8] sm:$0xff] }
  0x20   : > { %v373_v29 = vadd.f32 %v341_v14, %v309_v16  ;;  %v311_v31 = vadd.f32 %v614_v2, %v272_v18  ;;  %433 = vst.msk [vmem:[%s644_s30 + $0x40] sm:$0xff] %vm424_vm0, %v400_v21  ;;  %v403_v34 = vmax.f32 %v371_v23, 0.0  ;;  %v273_v36 = vmul.f32 %v596_v0, %v234_v19  ;;  %v242_v5 = vld [vmem:[%s602_s22 + $0xc0] sm:$0xff]  ;;  %v243_v6 = vld [vmem:[%s602_s22 + $0xc8] sm:$0xff]  ;;  %v350_v11 = vld [vmem:[%s608_s25 + $0xb0] sm:$0xff] }
  0x21   : > { %434 = vst.msk [vmem:[%s644_s30 + $0x48] sm:$0xff] %vm424_vm0, %v401_v22  ;;  %v404_v35 = vmax.f32 %v372_v24, 0.0  ;;  %v274_v37 = vmul.f32 %v596_v0, %v235_v20  ;;  %435 = vst.msk [vmem:[%s644_s30 + $0x50] sm:$0xff] %vm424_vm0, %v402_v28  ;;  %v374_v40 = vadd.f32 %v342_v25, %v310_v30  ;;  %v275_v44 = vmul.f32 %v596_v0, %v236_v27  ;;  %v351_v12 = vld [vmem:[%s608_s25 + $0xb8] sm:$0xff]  ;;  %v244_v13 = vld [vmem:[%s602_s22 + $0xd0] sm:$0xff] }
  0x22   : > { %v405_v39 = vmax.f32 %v373_v29, 0.0  ;;  %v375_v41 = vadd.f32 %v343_v26, %v311_v31  ;;  %436 = vst.msk [vmem:[%s644_s30 + $0x58] sm:$0xff] %vm424_vm0, %v403_v34  ;;  %v312_v45 = vadd.f32 %v614_v2, %v273_v36  ;;  %v276_v48 = vmul.f32 %v596_v0, %v237_v32  ;;  %v245_v18 = vld [vmem:[%s602_s22 + $0xd8] sm:$0xff]  ;;  %v246_v19 = vld [vmem:[%s602_s22 + $0xe0] sm:$0xff]  ;;  %v247_v24 = vld [vmem:[%s602_s22 + $0xe8] sm:$0xff] }
  0x23   : > { %437 = vst.msk [vmem:[%s644_s30 + $0x60] sm:$0xff] %vm424_vm0, %v404_v35  ;;  %v313_v46 = vadd.f32 %v614_v2, %v274_v37  ;;  %v277_v49 = vmul.f32 %v596_v0, %v238_v33  ;;  %v406_v52 = vmax.f32 %v374_v40, 0.0  ;;  %v314_v54 = vadd.f32 %v614_v2, %v275_v44  ;;  %v352_v28 = vld [vmem:[%s608_s25 + $0xc0] sm:$0xff]  ;;  %v353_v29 = vld [vmem:[%s608_s25 + $0xc8] sm:$0xff]  ;;  %v354_v33 = vld [vmem:[%s608_s25 + $0xd0] sm:$0xff] }
  0x24   : > { %438 = vst.msk [vmem:[%s644_s30 + $0x68] sm:$0xff] %vm424_vm0, %v405_v39  ;;  %v407_v53 = vmax.f32 %v375_v41, 0.0  ;;  %v278_v57 = vmul.f32 %v596_v0, %v239_v38  ;;  %v376_v58 = vadd.f32 %v344_v42, %v312_v45  ;;  %v315_v60 = vadd.f32 %v614_v2, %v276_v48  ;;  %v248_v36 = vld [vmem:[%s602_s22 + $0xf0] sm:$0xff]  ;;  %v249_v37 = vld [vmem:[%s602_s22 + $0xf8] sm:$0xff]  ;;  %v356_v42 = vld [vmem:[%s608_s25 + $0xe0] sm:$0xff] }
  0x25   : > { %v377_v59 = vadd.f32 %v345_v43, %v313_v46  ;;  %v316_v61 = vadd.f32 %v614_v2, %v277_v49  ;;  %439 = vst.msk [vmem:[%s644_s30 + $0x70] sm:$0xff] %vm424_vm0, %v406_v52  ;;  %v378_v63 = vadd.f32 %v346_v47, %v314_v54  ;;  %v279_v3 = vmul.f32 %v596_v0, %v240_v50  ;;  %v355_v41 = vld [vmem:[%s608_s25 + $0xd8] sm:$0xff]  ;;  %v357_v48 = vld [vmem:[%s608_s25 + $0xe8] sm:$0xff] }
  0x26   : > { %440 = vst.msk [vmem:[%s644_s30 + $0x78] sm:$0xff] %vm424_vm0, %v407_v53  ;;  %v317_v1 = vadd.f32 %v614_v2, %v278_v57  ;;  %v280_v4 = vmul.f32 %v596_v0, %v241_v51  ;;  %v408_v7 = vmax.f32 %v376_v58, 0.0  ;;  %v379_v9 = vadd.f32 %v347_v55, %v315_v60  ;;  %v358_v57 = vld [vmem:[%s608_s25 + $0xf0] sm:$0xff]  ;;  %v359_v58 = vld [vmem:[%s608_s25 + $0xf8] sm:$0xff] }
  0x27   : > { %v409_v8 = vmax.f32 %v377_v59, 0.0  ;;  %v380_v10 = vadd.f32 %v348_v56, %v316_v61  ;;  %v410_v14 = vmax.f32 %v378_v63, 0.0  ;;  %v318_v16 = vadd.f32 %v614_v2, %v279_v3 }
  0x28   : > { %v381_v15 = vadd.f32 %v349_v62, %v317_v1  ;;  %v319_v17 = vadd.f32 %v614_v2, %v280_v4  ;;  %441 = vst.msk [vmem:[%s644_s30 + $0x80] sm:$0xff] %vm424_vm0, %v408_v7  ;;  %v411_v20 = vmax.f32 %v379_v9, 0.0  ;;  %v281_v22 = vmul.f32 %v596_v0, %v242_v5 }
  0x29   : > { %442 = vst.msk [vmem:[%s644_s30 + $0x88] sm:$0xff] %vm424_vm0, %v409_v8  ;;  %v412_v21 = vmax.f32 %v380_v10, 0.0  ;;  %v282_v23 = vmul.f32 %v596_v0, %v243_v6  ;;  %443 = vst.msk [vmem:[%s644_s30 + $0x90] sm:$0xff] %vm424_vm0, %v410_v14  ;;  %v382_v26 = vadd.f32 %v350_v11, %v318_v16  ;;  %v283_v30 = vmul.f32 %v596_v0, %v244_v13 }
  0x2a   : > { %v413_v25 = vmax.f32 %v381_v15, 0.0  ;;  %v383_v27 = vadd.f32 %v351_v12, %v319_v17  ;;  %444 = vst.msk [vmem:[%s644_s30 + $0x98] sm:$0xff] %vm424_vm0, %v411_v20  ;;  %v320_v31 = vadd.f32 %v614_v2, %v281_v22  ;;  %v284_v34 = vmul.f32 %v596_v0, %v245_v18 }
  0x2b   : > { %445 = vst.msk [vmem:[%s644_s30 + $0xa0] sm:$0xff] %vm424_vm0, %v412_v21  ;;  %v321_v32 = vadd.f32 %v614_v2, %v282_v23  ;;  %v285_v35 = vmul.f32 %v596_v0, %v246_v19  ;;  %v414_v38 = vmax.f32 %v382_v26, 0.0  ;;  %v322_v40 = vadd.f32 %v614_v2, %v283_v30 }
  0x2c   : > { %446 = vst.msk [vmem:[%s644_s30 + $0xa8] sm:$0xff] %vm424_vm0, %v413_v25  ;;  %v415_v39 = vmax.f32 %v383_v27, 0.0  ;;  %v286_v43 = vmul.f32 %v596_v0, %v247_v24  ;;  %v384_v44 = vadd.f32 %v352_v28, %v320_v31  ;;  %v323_v46 = vadd.f32 %v614_v2, %v284_v34 }
  0x2d   : > { %v385_v45 = vadd.f32 %v353_v29, %v321_v32  ;;  %v324_v47 = vadd.f32 %v614_v2, %v285_v35  ;;  %447 = vst.msk [vmem:[%s644_s30 + $0xb0] sm:$0xff] %vm424_vm0, %v414_v38  ;;  %v386_v49 = vadd.f32 %v354_v33, %v322_v40  ;;  %v287_v51 = vmul.f32 %v596_v0, %v248_v36 }
  0x2e   : > { %448 = vst.msk [vmem:[%s644_s30 + $0xb8] sm:$0xff] %vm424_vm0, %v415_v39  ;;  %v325_v50 = vadd.f32 %v614_v2, %v286_v43  ;;  %v288_v52 = vmul.f32 %v596_v0, %v249_v37  ;;  %v416_v53 = vmax.f32 %v384_v44, 0.0  ;;  %v387_v55 = vadd.f32 %v355_v41, %v323_v46 }
  0x2f   : > { %v417_v54 = vmax.f32 %v385_v45, 0.0  ;;  %v388_v56 = vadd.f32 %v356_v42, %v324_v47  ;;  %v418_v59 = vmax.f32 %v386_v49, 0.0  ;;  %v326_v61 = vadd.f32 %v614_v2, %v287_v51 }
  0x30   : > { %v389_v60 = vadd.f32 %v357_v48, %v325_v50  ;;  %v327_v62 = vadd.f32 %v614_v2, %v288_v52  ;;  %449 = vst.msk [vmem:[%s644_s30 + $0xc0] sm:$0xff] %vm424_vm0, %v416_v53  ;;  %v419_v0 = vmax.f32 %v387_v55, 0.0 }
  0x31   : > { %450 = vst.msk [vmem:[%s644_s30 + $0xc8] sm:$0xff] %vm424_vm0, %v417_v54  ;;  %v420_v63 = vmax.f32 %v388_v56, 0.0  ;;  %451 = vst.msk [vmem:[%s644_s30 + $0xd0] sm:$0xff] %vm424_vm0, %v418_v59  ;;  %v390_v3 = vadd.f32 %v358_v57, %v326_v61 }
  0x32   : > { %v421_v1 = vmax.f32 %v389_v60, 0.0  ;;  %v391_v4 = vadd.f32 %v359_v58, %v327_v62  ;;  %452 = vst.msk [vmem:[%s644_s30 + $0xd8] sm:$0xff] %vm424_vm0, %v419_v0 }
  0x33   : > { %453 = vst.msk [vmem:[%s644_s30 + $0xe0] sm:$0xff] %vm424_vm0, %v420_v63  ;;  %v422_v5 = vmax.f32 %v390_v3, 0.0 }
  0x34   : > { %454 = vst.msk [vmem:[%s644_s30 + $0xe8] sm:$0xff] %vm424_vm0, %v421_v1  ;;  %v423_v6 = vmax.f32 %v391_v4, 0.0 }
  0x35   : > { %455 = vst.msk [vmem:[%s644_s30 + $0xf0] sm:$0xff] %vm424_vm0, %v422_v5 }
  0x36   : > { %456 = vst.msk [vmem:[%s644_s30 + $0xf8] sm:$0xff] %vm424_vm0, %v423_v6 }
  0x37 PF: > { %s14_s15 = sadd.s32 1, %s556_s15  }
  0x38   : > { %p11_p4 = scmp.ge.s32.totalorder %s14_s15, 4  }
  0x3a   :  { %13 = sbr.rel (!%p11_p4) target bundleno = 1 (0x1), region = 69 }

// kernel: residual_block.4
= control target key start
LH: loop header
LB: loop body
LE: loop exit
PB: predicated region body
PF: predicated region fallthrough
CT: control target
= control target key end

     0   :  { %s4519_s18 = smov 0   ;;  %s5593_s0 = inlined_call_operand.vmem [shape: f32[2,16,16,16], index: 0, kind: input, shape index: {}]   ;;  %s5594_s1 = inlined_call_operand.vmem [shape: f32[1,16], index: 1, kind: input, shape index: {}]   ;;  %s5595_s2 = inlined_call_operand.vmem [shape: f32[1,16], index: 2, kind: input, shape index: {}]   ;;  %s5596_s3 = inlined_call_operand.vmem [shape: bf16[9,16,16], index: 3, kind: input, shape index: {}]   ;;  %s5597_s4 = inlined_call_operand.vmem [shape: f32[2,16,16,16], index: 4, kind: output, shape index: {0}]   ;;  %s5598_s5 = inlined_call_operand.vmem [shape: f32[2,2,16], index: 5, kind: output, shape index: {1}]  }
   0x1 LB: > { %s3572_s19 = sadd.s32 4294967295, %s4487_s18   ;;  %p3576_p0 = scmp.ge.s32.totalorder %s4487_s18, 1  ;;  %s4487_s18 = sphi %s4519_s18, %s16_s18  }
   0x2   : > { %p190_p1 = scmp.lt.s32.totalorder %s4487_s18, 3 }
   0x4   : > { %p191_p2 = pnand %p3576_p0, %p190_p1 }
   0x6   : > { %194 = sbr.rel (%p191_p2) target bundleno = 583 (0x247), region = 36 }
   0xd   : > { %v4466_v0 = vld [vmem:[%s5596_s3 + $0x20] sm:$0xff]   ;;  %p222_p3 = scmp.lt.s32.totalorder %s3572_s19, 1  ;;  %v4467_v1 = vld [vmem:[%s5596_s3 + $0x18] sm:$0xff]   ;;  %vm396_vm0 = vsmask.f32 7950  ;;  %vm415_vm1 = vcmask 125955  }
   0xe   : > { %4030 = vmatprep.subr.bf16.mxu0 %v4466_v0  ;;  %3894 = vmatprep.subr.bf16.mxu1 %v4467_v1  ;;  %v4538_v2 = vld [vmem:[%s5594_s1] ss:$0 sm:$0xff]  ;;  %v417_v4 = vld [vmem:[#allocation2 + $0x10] sm:$0x8]  ;;  %vm4554_vm2 = vmand %vm415_vm1, %vm396_vm0  ;;  %vm563_vm3 = vcmask 130052   ;;  %vm565_vm4 = vcmask 125952  }
   0xf   : > { %s5667_s19 = smov (!%p222_p3, %s3572_s19), 1  ;;  %4031 = vmatpush3.bf16.msra.mxu0 %v4466_v0  ;;  %v4544_v3 = vld [vmem:[%s5595_s2] ss:$0 sm:$0xff]  ;;  %3895 = vmatpush3.bf16.msra.mxu1 %v4467_v1  ;;  %v418_v10 = vsel %vm4554_vm2, 0, %v417_v4  ;;  %v4577_v16 = vld [vmem:[%s5596_s3 + $0x38] sm:$0xff]   ;;  %vm946_vm5 = vcmask 130048  }
  0x10   : > { %s3739_s26 = sshll.u32 %s5667_s19, 8  ;;  %v4561_v6 = vld [vmem:[%s5596_s3] sm:$0xff]   ;;  %419 = vst [vmem:[#allocation2 + $0x10] sm:$0x8] %v418_v10  ;;  %4064 = vmatprep.subr.bf16.mxu0 %v4577_v16  ;;  %v423_v30 = vld [vmem:[#allocation2 + $0x30] sm:$0x8] }
  0x11   : > { %s4551_s6 = scalar_lea.vmem %s5593_s0, %s3739_s26  ;;  %3928 = vmatprep.subr.bf16.mxu1 %v4561_v6  ;;  %v420_v17 = vld [vmem:[#allocation2 + $0x20] sm:$0x8]  ;;  %v424_v44 = vsel %vm4554_vm2, 0, %v423_v30  ;;  %v429_v52 = vld [vmem:[#allocation2 + $0x50] sm:$0x8]  ;;  %vm1595_vm6 = vcmask 1043456   ;;  %s5435_s28 = scalar_lea.vmem %s5597_s4, %s3739_s26 }
  0x12   : > { %v237_v7 = vld [vmem:[%s4551_s6] sm:$0xff]  ;;  %v238_v8 = vld [vmem:[%s4551_s6 + $0x8] sm:$0xff]  ;;  %v239_v9 = vld [vmem:[%s4551_s6 + $0x10] sm:$0xff]  ;;  %v421_v22 = vsel %vm4554_vm2, 0, %v420_v17  ;;  %425 = vst [vmem:[#allocation2 + $0x30] sm:$0x8] %v424_v44 }
  0x13   : > { %v276_v11 = vmul.f32 %v4538_v2, %v237_v7  ;;  %v277_v12 = vmul.f32 %v4538_v2, %v238_v8  ;;  %v240_v13 = vld [vmem:[%s4551_s6 + $0x18] sm:$0xff]  ;;  %v278_v14 = vmul.f32 %v4538_v2, %v239_v9  ;;  %v241_v18 = vld [vmem:[%s4551_s6 + $0x20] sm:$0xff]  ;;  %v242_v23 = vld [vmem:[%s4551_s6 + $0x28] sm:$0xff]  ;;  %422 = vst [vmem:[#allocation2 + $0x20] sm:$0x8] %v421_v22  ;;  %v430_v4 = vsel %vm4554_vm2, 0, %v429_v52 }
  0x14   : > { %v279_v15 = vmul.f32 %v4538_v2, %v240_v13  ;;  %v243_v24 = vld [vmem:[%s4551_s6 + $0x30] sm:$0xff]  ;;  %v244_v25 = vld [vmem:[%s4551_s6 + $0x38] sm:$0xff]  ;;  %v280_v27 = vmul.f32 %v4538_v2, %v241_v18  ;;  %v281_v28 = vmul.f32 %v4538_v2, %v242_v23  ;;  %v426_v31 = vld [vmem:[#allocation2 + $0x40] sm:$0x8]  ;;  %431 = vst [vmem:[#allocation2 + $0x50] sm:$0x8] %v430_v4 }
  0x15   : > { %v315_v19 = vadd.f32 %v4544_v3, %v276_v11  ;;  %v316_v20 = vadd.f32 %v4544_v3, %v277_v12  ;;  %v317_v21 = vadd.f32 %v4544_v3, %v278_v14  ;;  %v282_v29 = vmul.f32 %v4538_v2, %v243_v24  ;;  %v245_v40 = vld [vmem:[%s4551_s6 + $0x40] sm:$0xff]  ;;  %v246_v41 = vld [vmem:[%s4551_s6 + $0x48] sm:$0xff]  ;;  %v247_v46 = vld [vmem:[%s4551_s6 + $0x50] sm:$0xff]  ;;  %s3581_s26 = sshll.u32 %s5667_s19, 1 }
  0x16   : > { %v318_v26 = vadd.f32 %v4544_v3, %v279_v15  ;;  %v283_v35 = vmul.f32 %v4538_v2, %v244_v25  ;;  %v319_v37 = vadd.f32 %v4544_v3, %v280_v27  ;;  %v320_v38 = vadd.f32 %v4544_v3, %v281_v28  ;;  %v248_v47 = vld [vmem:[%s4551_s6 + $0x58] sm:$0xff]  ;;  %v432_v57 = vld [vmem:[#allocation2 + $0x60] sm:$0x8]  ;;  %v250_v7 = vld [vmem:[%s4551_s6 + $0x68] sm:$0xff] }
  0x17   : > { %v347_v32 = vmax.f32 %v315_v19, 0.0  ;;  %v348_v33 = vmax.f32 %v316_v20, 0.0  ;;  %v349_v34 = vmax.f32 %v317_v21, 0.0  ;;  %v321_v39 = vadd.f32 %v4544_v3, %v282_v29  ;;  %v249_v62 = vld [vmem:[%s4551_s6 + $0x60] sm:$0xff]  ;;  %v251_v8 = vld [vmem:[%s4551_s6 + $0x70] sm:$0xff]  ;;  %v252_v13 = vld [vmem:[%s4551_s6 + $0x78] sm:$0xff] }
  0x18   : > { %v350_v36 = vmax.f32 %v318_v26, 0.0  ;;  %v322_v43 = vadd.f32 %v4544_v3, %v283_v35  ;;  %v427_v45 = vsel %vm4554_vm2, 0, %v426_v31  ;;  %v351_v49 = vmax.f32 %v319_v37, 0.0  ;;  %v435_v14 = vld [vmem:[#allocation2 + $0x70] sm:$0x8]  ;;  %v253_v30 = vld [vmem:[%s4551_s6 + $0x80] sm:$0xff] }
  0x19   : > { %v379_v42 = vpack.c.bf16 %v348_v33, %v347_v32  ;;  %v352_v50 = vmax.f32 %v320_v38, 0.0  ;;  %v353_v51 = vmax.f32 %v321_v39, 0.0  ;;  %428 = vst [vmem:[#allocation2 + $0x40] sm:$0x8] %v427_v45  ;;  %v284_v55 = vmul.f32 %v4538_v2, %v245_v40  ;;  %v438_v20 = vld [vmem:[#allocation2 + $0x80] sm:$0x8] }
  0x1a   : > { %v380_v48 = vpack.c.bf16 %v350_v36, %v349_v34  ;;  %v354_v54 = vmax.f32 %v322_v43, 0.0  ;;  %v285_v56 = vmul.f32 %v4538_v2, %v246_v41  ;;  %v286_v60 = vmul.f32 %v4538_v2, %v247_v46  ;;  %v254_v31 = vld [vmem:[%s4551_s6 + $0x88] sm:$0xff]  ;;  %v255_v34 = vld [vmem:[%s4551_s6 + $0x90] sm:$0xff]  ;;  %v256_v35 = vld [vmem:[%s4551_s6 + $0x98] sm:$0xff] }
  0x1b   : > { %v531_v53 = vrot.slane %v379_v42, 4  ;;  %v381_v59 = vpack.c.bf16 %v352_v50, %v351_v49  ;;  %v287_v61 = vmul.f32 %v4538_v2, %v248_v47  ;;  %v323_v0 = vadd.f32 %v4544_v3, %v284_v55 }
  0x1c   : > { %v532_v58 = vrot.slane %v380_v48, 4  ;;  %v382_v63 = vpack.c.bf16 %v354_v54, %v353_v51  ;;  %v324_v1 = vadd.f32 %v4544_v3, %v285_v56  ;;  %v325_v10 = vadd.f32 %v4544_v3, %v286_v60  ;;  %v257_v48 = vld [vmem:[%s4551_s6 + $0xa0] sm:$0xff] }
  0x1d   : > { %564 = vst.msk [vmem:[#allocation2 + $0x10] sm:$0xf0] %vm563_vm3, %v531_v53  ;;  %v533_v9 = vrot.slane %v381_v59, 4  ;;  %v326_v11 = vadd.f32 %v4544_v3, %v287_v61  ;;  %v433_v12 = vsel %vm4554_vm2, 0, %v432_v57  ;;  %v355_v17 = vmax.f32 %v323_v0, 0.0  ;;  %v4672_v57 = vld [vmem:[%s5596_s3 + $0x10] sm:$0xff]  }
  0x1e   : > { %566 = vst.msk [vmem:[#allocation2 + $0x18] sm:$0xf] %vm565_vm4, %v531_v53  ;;  %568 = vst.msk [vmem:[#allocation2 + $0x28] sm:$0xf] %vm565_vm4, %v532_v58  ;;  %v534_v15 = vrot.slane %v382_v63, 4  ;;  %v356_v18 = vmax.f32 %v324_v1, 0.0  ;;  %v288_v19 = vmul.f32 %v4538_v2, %v249_v62  ;;  %v289_v23 = vmul.f32 %v4538_v2, %v250_v7 }
  0x1f   : > { %567 = vst.msk [vmem:[#allocation2 + $0x20] sm:$0xf0] %vm563_vm3, %v532_v58  ;;  %434 = vst [vmem:[#allocation2 + $0x60] sm:$0x8] %v433_v12  ;;  %v357_v21 = vmax.f32 %v325_v10, 0.0  ;;  %v358_v22 = vmax.f32 %v326_v11, 0.0  ;;  %v290_v24 = vmul.f32 %v4538_v2, %v251_v8  ;;  %v291_v27 = vmul.f32 %v4538_v2, %v252_v13 }
  0x20   : > { %569 = vst.msk [vmem:[#allocation2 + $0x30] sm:$0xf0] %vm563_vm3, %v533_v9  ;;  %571 = vst.msk [vmem:[#allocation2 + $0x40] sm:$0xf0] %vm563_vm3, %v534_v15  ;;  %v383_v25 = vpack.c.bf16 %v356_v18, %v355_v17  ;;  %v4634_v26 = vadd.f32 %v4544_v3, %v288_v19  ;;  %v436_v28 = vsel %vm4554_vm2, 0, %v435_v14  ;;  %v439_v29 = vsel %vm4554_vm2, 0, %v438_v20 }
  0x21   : > { %570 = vst.msk [vmem:[#allocation2 + $0x38] sm:$0xf] %vm565_vm4, %v533_v9  ;;  %572 = vst.msk [vmem:[#allocation2 + $0x48] sm:$0xf] %vm565_vm4, %v534_v15  ;;  %vm402_vm7 = vsmask.f32 4352  ;;  %v4646_v39 = vpack.c.bf16 %v358_v22, %v357_v21  ;;  %v4649_v40 = vadd.f32 %v4544_v3, %v289_v23  ;;  %v4652_v41 = vadd.f32 %v4544_v3, %v290_v24 }
  0x22   : > { %437 = vst [vmem:[#allocation2 + $0x70] sm:$0x8] %v436_v28  ;;  %v535_v32 = vrot.slane %v383_v25, 4  ;;  %v359_v33 = vmax.f32 %v4634_v26, 0.0  ;;  %440 = vst [vmem:[#allocation2 + $0x80] sm:$0x8] %v439_v29  ;;  %v4655_v42 = vadd.f32 %v4544_v3, %v291_v27  ;;  %v4660_v46 = vmul.f32 %v4538_v2, %v253_v30 }
  0x23   : > { %v4663_v47 = vmul.f32 %v4538_v2, %v254_v31  ;;  %v4675_v58 = vmul.f32 %v4538_v2, %v255_v34  ;;  %v4678_v59 = vmul.f32 %v4538_v2, %v256_v35  ;;  %v4686_v10 = vmul.f32 %v4538_v2, %v257_v48  ;;  %v258_v26 = vld [vmem:[%s4551_s6 + $0xa8] sm:$0xff] }
  0x24   : > { %v1546_v37 = vld [vmem:[#allocation2 + $0x10] sm:$0xf0]  ;;  %573 = vst.msk [vmem:[#allocation2 + $0x50] sm:$0xf0] %vm563_vm3, %v535_v32  ;;  %vm395_vm8 = vcmask 130051   ;;  %vm401_vm9 = vcmask 126976  }
  0x25   : > { %v618_v36 = vld [vmem:[#allocation2 + $0x18] sm:$0xf]  ;;  %v617_v38 = vld [vmem:[#allocation2 + $0x10] sm:$0xf8]  ;;  %v1599_v43 = vrot.slane %v1546_v37, 4  ;;  %vm4970_vm10 = vmand %vm395_vm8, %vm396_vm0  ;;  %vm465_vm12 = vcmask 126980  }
  0x26   : > { %v1600_v44 = vrot.slane %v618_v36, 4  ;;  %v620_v45 = vld [vmem:[#allocation2 + $0x28] sm:$0xf]  ;;  %574 = vst.msk [vmem:[#allocation2 + $0x58] sm:$0xf] %vm565_vm4, %v535_v32  ;;  %v669_v51 = vshrl.u32 %v617_v38, 16  ;;  %vm4987_vm11 = vmand %vm401_vm9, %vm402_vm7 }
  0x27   : > { %v1547_v49 = vld [vmem:[#allocation2 + $0x20] sm:$0xf0]  ;;  %v1603_v50 = vrot.slane %v620_v45, 4  ;;  %v672_v52 = vshll.u32 %v617_v38, 16  ;;  %v677_v53 = vshrl.u32 %v618_v36, 16  ;;  %v680_v63 = vshll.u32 %v618_v36, 16  ;;  %vm5040_vm13 = vmand %vm465_vm12, %vm402_vm7 }
  0x28   : > { %v4667_v54 = vsel %vm1595_vm6, %v1599_v43, %v1600_v44  ;;  %v1602_v55 = vrot.slane %v1547_v49, 4  ;;  %v619_v56 = vld [vmem:[#allocation2 + $0x20] sm:$0xf8]  ;;  %v671_v60 = vrot.slane %v669_v51, 3  ;;  %v622_v0 = vld [vmem:[#allocation2 + $0x38] sm:$0xf] }
  0x29   : > { %5626 = vst [vmem:[#allocation3_spill] sm:$0xff] %v4667_v54  ;;  %4032 = vmatprep.mubr.msk.bf16.mxu0 %vm946_vm5, %v4667_v54  ;;  %v674_v61 = vrot.slane %v672_v52, 4  ;;  %v679_v62 = vrot.slane %v677_v53, 3  ;;  %v686_v4 = vshrl.u32 %v619_v56, 16  ;;  %v689_v7 = vshll.u32 %v619_v56, 16  ;;  %v4708_v49 = vld [vmem:[%s5596_s3 + $0x30] sm:$0xff]  }
  0x2a   : > { %v4683_v1 = vsel %vm1595_vm6, %v1602_v55, %v1603_v50  ;;  %v1548_v8 = vld [vmem:[#allocation2 + $0x30] sm:$0xf0]  ;;  %v624_v9 = vld [vmem:[#allocation2 + $0x48] sm:$0xf]  ;;  %v682_v12 = vrot.slane %v680_v63, 4  ;;  %v694_v13 = vshrl.u32 %v620_v45, 16 }
  0x2b   : > { %5627 = vst [vmem:[#allocation4_spill] sm:$0xff] %v4683_v1  ;;  %4033 = vmatmul.mubr.msk.bf16.vlgmr.msra.gmra.mrb[0].mxu0 %vm946_vm5, %v4683_v1  ;;  %v675_v11 = vor.u32 %v674_v61, %v671_v60  ;;  %v697_v14 = vshll.u32 %v620_v45, 16  ;;  %v1549_v15 = vld [vmem:[#allocation2 + $0x40] sm:$0xf0]  ;;  %v688_v17 = vrot.slane %v686_v4, 3  ;;  %v691_v18 = vrot.slane %v689_v7, 4 }
  0x2c   : > { %4065 = vmatpush3.bf16.msra.mxu0 %v4577_v16  ;;  %v1605_v19 = vrot.slane %v1548_v8, 4  ;;  %v1606_v20 = vrot.slane %v622_v0, 4  ;;  %v621_v21 = vld [vmem:[#allocation2 + $0x30] sm:$0xf8]  ;;  %v683_v22 = vor.u32 %v682_v12, %v679_v62  ;;  %v696_v23 = vrot.slane %v694_v13, 3 }
  0x2d   : > { %v699_v24 = vrot.slane %v697_v14, 4  ;;  %v1608_v25 = vrot.slane %v1549_v15, 4  ;;  %v623_v27 = vld [vmem:[#allocation2 + $0x40] sm:$0xf8]  ;;  %4098 = vmatprep.subr.bf16.mxu0 %v4672_v57  ;;  %v692_v28 = vor.u32 %v691_v18, %v688_v17  ;;  %v1609_v30 = vrot.slane %v624_v9, 4 }
  0x2e   : > { %v4693_v29 = vsel %vm1595_vm6, %v1605_v19, %v1606_v20  ;;  %v703_v31 = vshrl.u32 %v621_v21, 16  ;;  %v4696_v32 = vsel %vm402_vm7, %v675_v11, %v683_v22  ;;  %v706_v34 = vshll.u32 %v621_v21, 16  ;;  %v626_v36 = vld [vmem:[#allocation2 + $0x58] sm:$0xf]  ;;  %v1550_v37 = vld [vmem:[#allocation2 + $0x50] sm:$0xf0] }
  0x2f   : > { %5628 = vst [vmem:[#allocation5_spill] sm:$0xff] %v4693_v29  ;;  %v700_v16 = vor.u32 %v699_v24, %v696_v23  ;;  %4036 = vmatprep.mubr.msk.bf16.mxu0 %vm946_vm5, %v4693_v29  ;;  %v711_v35 = vshrl.u32 %v622_v0, 16  ;;  %3896 = vmatprep.mubr.msk.bf16.mxu1 %vm946_vm5, %v4696_v32  ;;  %v4703_v38 = vsel %vm1595_vm6, %v1608_v25, %v1609_v30  ;;  %v714_v44 = vshll.u32 %v622_v0, 16  ;;  %v625_v48 = vld [vmem:[#allocation2 + $0x50] sm:$0xf8] }
  0x30   : > { %5629 = vst [vmem:[#allocation6_spill] sm:$0xff] %v4703_v38  ;;  %v705_v43 = vrot.slane %v703_v31, 3  ;;  %v720_v45 = vshrl.u32 %v623_v27, 16  ;;  %v708_v51 = vrot.slane %v706_v34, 4  ;;  %v723_v53 = vshll.u32 %v623_v27, 16 }
  0x31   : > { %v4711_v50 = vsel %vm402_vm7, %v692_v28, %v700_v16  ;;  %v713_v52 = vrot.slane %v711_v35, 3  ;;  %v716_v55 = vrot.slane %v714_v44, 4  ;;  %v728_v60 = vshrl.u32 %v624_v9, 16  ;;  %v441_v23 = vld [vmem:[#allocation2 + $0x90] sm:$0x8] }
  0x32   : > { %3897 = vmatmul.mubr.msk.bf16.vlgmr.msra.gmra.mrb[0].mxu1 %vm946_vm5, %v4711_v50  ;;  %v722_v56 = vrot.slane %v720_v45, 3  ;;  %v731_v61 = vshll.u32 %v624_v9, 16  ;;  %v709_v62 = vor.u32 %v708_v51, %v705_v43  ;;  %v725_v63 = vrot.slane %v723_v53, 4  ;;  %v512_v54 = vld [vmem:[#allocation2 + $0x108] sm:$0x10] }
  0x33   : > { %3929 = vmatpush3.bf16.msra.mxu1 %v4561_v6  ;;  %4037 = vmatmul.mubr.msk.bf16.gmra.mrb[4].mxu0 %vm946_vm5, %v4703_v38  ;;  %v1611_v0 = vrot.slane %v1550_v37, 4  ;;  %v1612_v4 = vrot.slane %v626_v36, 4  ;;  %v717_v7 = vor.u32 %v716_v55, %v713_v52  ;;  %v730_v8 = vrot.slane %v728_v60, 3 }
  0x34   : > { %v733_v11 = vrot.slane %v731_v61, 4  ;;  %v536_v12 = vrot.slane %v4646_v39, 4  ;;  %3962 = vmatprep.subr.bf16.mxu1 %v4708_v49  ;;  %v726_v13 = vor.u32 %v725_v63, %v722_v56  ;;  %v737_v9 = vshrl.u32 %v625_v48, 16 }
  0x35   : > { %v4721_v14 = vsel %vm1595_vm6, %v1611_v0, %v1612_v4  ;;  %v740_v6 = vshll.u32 %v625_v48, 16  ;;  %v4724_v15 = vsel %vm402_vm7, %v709_v62, %v717_v7  ;;  %v745_v39 = vshrl.u32 %v626_v36, 16  ;;  %v447_v4 = vld [vmem:[#allocation2 + $0xb0] sm:$0x8] }
  0x36   : > { %5630 = vst [vmem:[#allocation7_spill] sm:$0xff] %v4721_v14  ;;  %v734_v17 = vor.u32 %v733_v11, %v730_v8  ;;  %4040 = vmatprep.mubr.msk.bf16.mxu0 %vm946_vm5, %v4721_v14  ;;  %575 = vst.msk [vmem:[#allocation2 + $0x60] sm:$0xf0] %vm563_vm3, %v536_v12  ;;  %v748_v18 = vshll.u32 %v626_v36, 16  ;;  %3900 = vmatprep.mubr.msk.bf16.mxu1 %vm946_vm5, %v4724_v15  ;;  %v739_v19 = vrot.slane %v737_v9, 3  ;;  %v360_v21 = vmax.f32 %v4649_v40, 0.0 }
  0x37   : > { %576 = vst.msk [vmem:[#allocation2 + $0x68] sm:$0xf] %vm565_vm4, %v536_v12  ;;  %v742_v20 = vrot.slane %v740_v6, 4  ;;  %v361_v22 = vmax.f32 %v4652_v41, 0.0  ;;  %v747_v25 = vrot.slane %v745_v39, 3  ;;  %v362_v28 = vmax.f32 %v4655_v42, 0.0 }
  0x38   : > { %v4735_v24 = vsel %vm402_vm7, %v726_v13, %v734_v17  ;;  %v750_v27 = vrot.slane %v748_v18, 4  ;;  %v385_v31 = vpack.c.bf16 %v360_v21, %v359_v33  ;;  %v331_v16 = vadd.f32 %v4544_v3, %v4660_v46  ;;  %v444_v41 = vld [vmem:[#allocation2 + $0xa0] sm:$0x8]  ;;  %v259_v33 = vld [vmem:[%s4551_s6 + $0xb0] sm:$0xff]  ;;  %v260_v13 = vld [vmem:[%s4551_s6 + $0xb8] sm:$0xff] }
  0x39   : > { %v743_v30 = vor.u32 %v742_v20, %v739_v19  ;;  %v332_v40 = vadd.f32 %v4544_v3, %v4663_v47  ;;  %v386_v35 = vpack.c.bf16 %v362_v28, %v361_v22  ;;  %v442_v36 = vsel %vm4554_vm2, 0, %v441_v23  ;;  %v450_v39 = vld [vmem:[#allocation2 + $0xc0] sm:$0x8]  ;;  %v262_v23 = vld [vmem:[%s4551_s6 + $0xc8] sm:$0xff] }
  0x3a   : > { %3901 = vmatmul.mubr.msk.bf16.gmra.mrb[4].mxu1 %vm946_vm5, %v4735_v24  ;;  %v751_v34 = vor.u32 %v750_v27, %v747_v25  ;;  %v333_v42 = vadd.f32 %v4544_v3, %v4675_v58  ;;  %v537_v37 = vrot.slane %v385_v31, 4  ;;  %v363_v43 = vmax.f32 %v331_v16, 0.0  ;;  %443 = vst [vmem:[#allocation2 + $0x90] sm:$0x8] %v442_v36  ;;  %v261_v22 = vld [vmem:[%s4551_s6 + $0xc0] sm:$0xff]  ;;  %v263_v31 = vld [vmem:[%s4551_s6 + $0xd0] sm:$0xff] }
  0x3b   : > { %v364_v46 = vmax.f32 %v332_v40, 0.0  ;;  %v334_v47 = vadd.f32 %v4544_v3, %v4678_v59  ;;  %v538_v45 = vrot.slane %v386_v35, 4  ;;  %v445_v51 = vsel %vm4554_vm2, 0, %v444_v41 }
  0x3c   : > { %v4755_v44 = vsel %vm402_vm7, %v743_v30, %v751_v34  ;;  %v365_v48 = vmax.f32 %v333_v42, 0.0  ;;  %577 = vst.msk [vmem:[#allocation2 + $0x70] sm:$0xf0] %vm563_vm3, %v537_v37  ;;  %446 = vst [vmem:[#allocation2 + $0xa0] sm:$0x8] %v445_v51  ;;  %v297_v55 = vmul.f32 %v4538_v2, %v258_v26  ;;  %v335_v56 = vadd.f32 %v4544_v3, %v4686_v10 }
  0x3d   : > { %v4759_v53 = vld [vmem:[#allocation2 + $0x60] sm:$0xf0]  ;;  %3904 = vmatprep.mubr.msk.bf16.mxu1 %vm946_vm5, %v4755_v44  ;;  %578 = vst.msk [vmem:[#allocation2 + $0x78] sm:$0xf] %vm565_vm4, %v537_v37  ;;  %v387_v59 = vpack.c.bf16 %v364_v46, %v363_v43  ;;  %v298_v60 = vmul.f32 %v4538_v2, %v259_v33  ;;  %580 = vst.msk [vmem:[#allocation2 + $0x88] sm:$0xf] %vm565_vm4, %v538_v45  ;;  %v299_v30 = vmul.f32 %v4538_v2, %v260_v13 }
  0x3e   : > { %v628_v52 = vld [vmem:[#allocation2 + $0x68] sm:$0xf]  ;;  %v627_v58 = vld [vmem:[#allocation2 + $0x60] sm:$0xf8]  ;;  %v1614_v61 = vrot.slane %v4759_v53, 4  ;;  %v366_v12 = vmax.f32 %v334_v47, 0.0  ;;  %v336_v17 = vadd.f32 %v4544_v3, %v297_v55  ;;  %v4800_v37 = vmul.f32 %v4538_v2, %v261_v22 }
  0x3f   : > { %v1615_v62 = vrot.slane %v628_v52, 4  ;;  %v754_v63 = vshrl.u32 %v627_v58, 16  ;;  %v757_v0 = vshll.u32 %v627_v58, 16  ;;  %579 = vst.msk [vmem:[#allocation2 + $0x80] sm:$0xf0] %vm563_vm3, %v538_v45  ;;  %v762_v7 = vshrl.u32 %v628_v52, 16 }
  0x40   : > { %v765_v8 = vshll.u32 %v628_v52, 16  ;;  %v539_v11 = vrot.slane %v387_v59, 4  ;;  %v388_v20 = vpack.c.bf16 %v366_v12, %v365_v48  ;;  %v367_v21 = vmax.f32 %v335_v56, 0.0 }
  0x41   : > { %v4774_v10 = vsel %vm1595_vm6, %v1614_v61, %v1615_v62  ;;  %v756_v9 = vrot.slane %v754_v63, 3  ;;  %v759_v6 = vrot.slane %v757_v0, 4  ;;  %v764_v18 = vrot.slane %v762_v7, 3 }
  0x42   : > { %5631 = vst [vmem:[#allocation8_spill] sm:$0xff] %v4774_v10  ;;  %4041 = vmatmul.mubr.msk.bf16.gmra.mrb[8].mxu0 %vm946_vm5, %v4774_v10  ;;  %v767_v19 = vrot.slane %v765_v8, 4  ;;  %581 = vst.msk [vmem:[#allocation2 + $0x90] sm:$0xf0] %vm563_vm3, %v539_v11  ;;  %v368_v27 = vmax.f32 %v336_v17, 0.0  ;;  %v448_v28 = vsel %vm4554_vm2, 0, %v447_v4  ;;  %v4788_v41 = vadd.f32 %v4544_v3, %v298_v60 }
  0x43   : > { %582 = vst.msk [vmem:[#allocation2 + $0x98] sm:$0xf] %vm565_vm4, %v539_v11  ;;  %v760_v25 = vor.u32 %v759_v6, %v756_v9  ;;  %v540_v40 = vrot.slane %v388_v20, 4  ;;  %449 = vst [vmem:[#allocation2 + $0xb0] sm:$0x8] %v448_v28  ;;  %v451_v34 = vsel %vm4554_vm2, 0, %v450_v39  ;;  %v4797_v33 = vadd.f32 %v4544_v3, %v299_v30 }
  0x44   : > { %v768_v16 = vor.u32 %v767_v19, %v764_v18  ;;  %v630_v35 = vld [vmem:[#allocation2 + $0x78] sm:$0xf]  ;;  %v4792_v36 = vld [vmem:[#allocation2 + $0x70] sm:$0xf0]  ;;  %v4794_v26 = vpack.c.bf16 %v368_v27, %v367_v21  ;;  %452 = vst [vmem:[#allocation2 + $0xc0] sm:$0x8] %v451_v34  ;;  %v4803_v43 = vmul.f32 %v4538_v2, %v262_v23  ;;  %v4814_v52 = vmul.f32 %v4538_v2, %v263_v31 }
  0x45   : > { %v629_v42 = vld [vmem:[#allocation2 + $0x70] sm:$0xf8]  ;;  %v1617_v47 = vrot.slane %v4792_v36, 4  ;;  %v1618_v45 = vrot.slane %v630_v35, 4  ;;  %v632_v48 = vld [vmem:[#allocation2 + $0x88] sm:$0xf] }
  0x46   : > { %v4806_v46 = vsel %vm402_vm7, %v760_v25, %v768_v16  ;;  %v4809_v51 = vld [vmem:[#allocation2 + $0x80] sm:$0xf0]  ;;  %583 = vst.msk [vmem:[#allocation2 + $0xa0] sm:$0xf0] %vm563_vm3, %v540_v40  ;;  %v1621_v59 = vrot.slane %v632_v48, 4  ;;  %v771_v55 = vshrl.u32 %v629_v42, 16 }
  0x47   : > { %584 = vst.msk [vmem:[#allocation2 + $0xa8] sm:$0xf] %vm565_vm4, %v540_v40  ;;  %3905 = vmatmul.mubr.msk.bf16.gmra.mrb[8].mxu1 %vm946_vm5, %v4806_v46  ;;  %v1620_v58 = vrot.slane %v4809_v51, 4  ;;  %v774_v56 = vshll.u32 %v629_v42, 16  ;;  %v631_v60 = vld [vmem:[#allocation2 + $0x80] sm:$0xf8]  ;;  %v4820_v61 = vsel %vm1595_vm6, %v1617_v47, %v1618_v45 }
  0x48   : > { %5632 = vst [vmem:[#allocation9_spill] sm:$0xff] %v4820_v61  ;;  %v779_v62 = vshrl.u32 %v630_v35, 16  ;;  %v782_v63 = vshll.u32 %v630_v35, 16  ;;  %v788_v0 = vshrl.u32 %v631_v60, 16  ;;  %4044 = vmatprep.mubr.msk.bf16.mxu0 %vm946_vm5, %v4820_v61  ;;  %v773_v7 = vrot.slane %v771_v55, 3 }
  0x49   : > { %v4825_v4 = vsel %vm1595_vm6, %v1620_v58, %v1621_v59  ;;  %v776_v8 = vrot.slane %v774_v56, 4  ;;  %v791_v11 = vshll.u32 %v631_v60, 16  ;;  %v633_v12 = vld [vmem:[#allocation2 + $0x90] sm:$0xf8]  ;;  %v796_v17 = vshrl.u32 %v632_v48, 16 }
  0x4a   : > { %5633 = vst [vmem:[#allocation10_spill] sm:$0xff] %v4825_v4  ;;  %4045 = vmatmul.mubr.msk.bf16.gmra.mrb[12].mxu0 %vm946_vm5, %v4825_v4  ;;  %v781_v13 = vrot.slane %v779_v62, 3  ;;  %v784_v9 = vrot.slane %v782_v63, 4  ;;  %v790_v6 = vrot.slane %v788_v0, 3  ;;  %v4829_v39 = vld [vmem:[#allocation2 + $0x98] sm:$0xf] }
  0x4b   : > { %v777_v18 = vor.u32 %v776_v8, %v773_v7  ;;  %v793_v19 = vrot.slane %v791_v11, 4  ;;  %v799_v20 = vshll.u32 %v632_v48, 16  ;;  %4066 = vmatprep.mubr.msk.bf16.mxu0 %vm946_vm5, %v4683_v1  ;;  %v805_v21 = vshrl.u32 %v633_v12, 16  ;;  %v453_v0 = vld [vmem:[#allocation2 + $0xd0] sm:$0x8]  ;;  %v4848_v7 = vld [vmem:[%s5596_s3 + $0x28] sm:$0xff]  }
  0x4c   : > { %v785_v22 = vor.u32 %v784_v9, %v781_v13  ;;  %v798_v23 = vrot.slane %v796_v17, 3  ;;  %v808_v25 = vshll.u32 %v633_v12, 16  ;;  %v813_v27 = vshrl.u32 %v4829_v39, 16  ;;  %v264_v9 = vld [vmem:[%s4551_s6 + $0xd8] sm:$0xff] }
  0x4d   : > { %v794_v28 = vor.u32 %v793_v19, %v790_v6  ;;  %v801_v30 = vrot.slane %v799_v20, 4  ;;  %v807_v31 = vrot.slane %v805_v21, 3  ;;  %v816_v16 = vshll.u32 %v4829_v39, 16  ;;  %v635_v40 = vld [vmem:[#allocation2 + $0xa0] sm:$0xf8] }
  0x4e   : > { %v4836_v34 = vsel %vm402_vm7, %v777_v18, %v785_v22  ;;  %v810_v35 = vrot.slane %v808_v25, 4  ;;  %v815_v42 = vrot.slane %v813_v27, 3  ;;  %v4838_v47 = vld [vmem:[#allocation2 + $0xa8] sm:$0xf]  ;;  %v822_v45 = vshrl.u32 %v635_v40, 16  ;;  %v265_v25 = vld [vmem:[%s4551_s6 + $0xe0] sm:$0xff] }
  0x4f   : > { %3908 = vmatprep.mubr.msk.bf16.mxu1 %vm946_vm5, %v4836_v34  ;;  %v802_v48 = vor.u32 %v801_v30, %v798_v23  ;;  %v818_v58 = vrot.slane %v816_v16, 4  ;;  %v825_v59 = vshll.u32 %v635_v40, 16  ;;  %v830_v55 = vshrl.u32 %v4838_v47, 16  ;;  %v456_v19 = vld [vmem:[#allocation2 + $0xe0] sm:$0x8]  ;;  %v266_v27 = vld [vmem:[%s4551_s6 + $0xe8] sm:$0xff] }
  0x50   : > { %v811_v56 = vor.u32 %v810_v35, %v807_v31  ;;  %v824_v60 = vrot.slane %v822_v45, 3  ;;  %v833_v62 = vshll.u32 %v4838_v47, 16  ;;  %v541_v63 = vrot.slane %v4794_v26, 4  ;;  %v459_v31 = vld [vmem:[#allocation2 + $0xf0] sm:$0x8]  ;;  %v268_v45 = vld [vmem:[%s4551_s6 + $0xf8] sm:$0xff] }
  0x51   : > { %v4851_v8 = vsel %vm402_vm7, %v794_v28, %v802_v48  ;;  %v819_v11 = vor.u32 %v818_v58, %v815_v42  ;;  %v827_v12 = vrot.slane %v825_v59, 4  ;;  %v832_v13 = vrot.slane %v830_v55, 3  ;;  %v267_v16 = vld [vmem:[%s4551_s6 + $0xf0] sm:$0xff]  ;;  %s235_s6 = scalar_lea.vmem %s5598_s5, %s3581_s26 }
  0x52   : > { %3909 = vmatmul.mubr.msk.bf16.gmra.mrb[12].mxu1 %vm946_vm5, %v4851_v8  ;;  %4067 = vmatmul.mubr.msk.bf16.vlgmr.msra.gmra.mrb[0].mxu0 %vm946_vm5, %v4693_v29  ;;  %v835_v26 = vrot.slane %v833_v62, 4  ;;  %585 = vst.msk [vmem:[#allocation2 + $0xb0] sm:$0xf0] %vm563_vm3, %v541_v63  ;;  %v369_v6 = vmax.f32 %v4788_v41, 0.0  ;;  %v370_v17 = vmax.f32 %v4797_v33, 0.0  ;;  %v339_v18 = vadd.f32 %v4544_v3, %v4800_v37 }
  0x53   : > { %586 = vst.msk [vmem:[#allocation2 + $0xb8] sm:$0xf] %vm565_vm4, %v541_v63  ;;  %v4865_v20 = vsel %vm402_vm7, %v811_v56, %v819_v11  ;;  %v828_v21 = vor.u32 %v827_v12, %v824_v60  ;;  %4099 = vmatpush3.bf16.msra.mxu0 %v4672_v57  ;;  %4070 = vmatprep.mubr.msk.bf16.mxu0 %vm946_vm5, %v4703_v38  ;;  %v454_v33 = vsel %vm4554_vm2, 0, %v453_v0  ;;  %v457_v30 = vsel %vm4554_vm2, 0, %v456_v19 }
  0x54   : > { %v340_v41 = vadd.f32 %v4544_v3, %v4803_v43  ;;  %3912 = vmatprep.mubr.msk.bf16.mxu1 %vm946_vm5, %v4865_v20  ;;  %v836_v37 = vor.u32 %v835_v26, %v832_v13  ;;  %v390_v22 = vpack.c.bf16 %v370_v17, %v369_v6  ;;  %v371_v23 = vmax.f32 %v339_v18, 0.0  ;;  %455 = vst [vmem:[#allocation2 + $0xd0] sm:$0x8] %v454_v33  ;;  %v4912_v18 = vld [vmem:[#allocation2 + $0x90] sm:$0xf0] }
  0x55   : > { %v303_v57 = vmul.f32 %v4538_v2, %v264_v9  ;;  %4132 = vmatprep.subr.bf16.mxu0 %v4848_v7  ;;  %v341_v43 = vadd.f32 %v4544_v3, %v4814_v52  ;;  %458 = vst [vmem:[#allocation2 + $0xe0] sm:$0x8] %v457_v30  ;;  %v304_v59 = vmul.f32 %v4538_v2, %v265_v25  ;;  %v460_v56 = vsel %vm4554_vm2, 0, %v459_v31  ;;  %v462_v33 = vld [vmem:[#allocation2 + $0x100] sm:$0x8] }
  0x56   : > { %v372_v28 = vmax.f32 %v340_v41, 0.0  ;;  %v4886_v40 = vsel %vm402_vm7, %v828_v21, %v836_v37  ;;  %v542_v35 = vrot.slane %v390_v22, 4  ;;  %v305_v55 = vmul.f32 %v4538_v2, %v266_v27  ;;  %461 = vst [vmem:[#allocation2 + $0xf0] sm:$0x8] %v460_v56 }
  0x57   : > { %v342_v42 = vadd.f32 %v4544_v3, %v303_v57  ;;  %v373_v58 = vmax.f32 %v341_v43, 0.0  ;;  %v306_v60 = vmul.f32 %v4538_v2, %v267_v16  ;;  %v343_v11 = vadd.f32 %v4544_v3, %v304_v59 }
  0x58   : > { %v391_v48 = vpack.c.bf16 %v372_v28, %v371_v23  ;;  %587 = vst.msk [vmem:[#allocation2 + $0xc0] sm:$0xf0] %vm563_vm3, %v542_v35  ;;  %v344_v12 = vadd.f32 %v4544_v3, %v305_v55  ;;  %v307_v13 = vmul.f32 %v4538_v2, %v268_v45  ;;  %v1623_v16 = vrot.slane %v4912_v18, 4 }
  0x59   : > { %588 = vst.msk [vmem:[#allocation2 + $0xc8] sm:$0xf] %vm565_vm4, %v542_v35  ;;  %v374_v52 = vmax.f32 %v342_v42, 0.0  ;;  %v637_v62 = vld [vmem:[#allocation2 + $0xb0] sm:$0xf8]  ;;  %v375_v19 = vmax.f32 %v343_v11, 0.0  ;;  %v345_v41 = vadd.f32 %v4544_v3, %v306_v60 }
  0x5a   : > { %v4897_v63 = vld [vmem:[#allocation2 + $0xb8] sm:$0xf]  ;;  %v543_v0 = vrot.slane %v391_v48, 4  ;;  %3913 = vmatmul.mubr.msk.bf16.gmra.mrb[16].mxu1 %vm946_vm5, %v4886_v40  ;;  %4071 = vmatmul.mubr.msk.bf16.gmra.mrb[4].mxu0 %vm946_vm5, %v4721_v14  ;;  %v839_v9 = vshrl.u32 %v637_v62, 16  ;;  %v842_v26 = vshll.u32 %v637_v62, 16  ;;  %v376_v21 = vmax.f32 %v344_v12, 0.0 }
  0x5b   : > { %v847_v6 = vshrl.u32 %v4897_v63, 16  ;;  %v850_v17 = vshll.u32 %v4897_v63, 16  ;;  %4074 = vmatprep.mubr.msk.bf16.mxu0 %vm946_vm5, %v4774_v10  ;;  %v392_v2 = vpack.c.bf16 %v374_v52, %v373_v58  ;;  %v346_v28 = vadd.f32 %v4544_v3, %v307_v13  ;;  %v4919_v42 = vld [vmem:[#allocation2 + $0xa0] sm:$0xf0]  ;;  %v4936_v11 = vld [vmem:[#allocation2 + $0xb0] sm:$0xf0] }
  0x5c   : > { %589 = vst.msk [vmem:[#allocation2 + $0xd0] sm:$0xf0] %vm563_vm3, %v543_v0  ;;  %v841_v37 = vrot.slane %v839_v9, 3  ;;  %v844_v22 = vrot.slane %v842_v26, 4  ;;  %v393_v27 = vpack.c.bf16 %v376_v21, %v375_v19  ;;  %v377_v43 = vmax.f32 %v345_v41, 0.0 }
  0x5d   : > { %590 = vst.msk [vmem:[#allocation2 + $0xd8] sm:$0xf] %vm565_vm4, %v543_v0  ;;  %v849_v23 = vrot.slane %v847_v6, 3  ;;  %v852_v57 = vrot.slane %v850_v17, 4  ;;  %v544_v25 = vrot.slane %v392_v2, 4  ;;  %v463_v35 = vsel %vm4554_vm2, 0, %v462_v33 }
  0x5e   : > { %v845_v30 = vor.u32 %v844_v22, %v841_v37  ;;  %v545_v58 = vrot.slane %v393_v27, 4  ;;  %v378_v3 = vmax.f32 %v346_v28, 0.0  ;;  %464 = vst [vmem:[#allocation2 + $0x100] sm:$0x8] %v463_v35  ;;  %v1624_v60 = vrot.slane %v4829_v39, 4 }
  0x5f   : > { %v853_v31 = vor.u32 %v852_v57, %v849_v23  ;;  %v639_v45 = vld [vmem:[#allocation2 + $0xc0] sm:$0xf8]  ;;  %591 = vst.msk [vmem:[#allocation2 + $0xe0] sm:$0xf0] %vm563_vm3, %v544_v25  ;;  %v1626_v0 = vrot.slane %v4919_v42, 4  ;;  %v1627_v6 = vrot.slane %v4838_v47, 4 }
  0x60   : > { %v4921_v48 = vld [vmem:[#allocation2 + $0xc8] sm:$0xf]  ;;  %592 = vst.msk [vmem:[#allocation2 + $0xe8] sm:$0xf] %vm565_vm4, %v544_v25  ;;  %v856_v55 = vshrl.u32 %v639_v45, 16  ;;  %v859_v52 = vshll.u32 %v639_v45, 16  ;;  %v394_v62 = vpack.c.bf16 %v378_v3, %v377_v43 }
  0x61   : > { %v4926_v59 = vsel %vm402_vm7, %v845_v30, %v853_v31  ;;  %v864_v5 = vshrl.u32 %v4921_v48, 16  ;;  %v867_v56 = vshll.u32 %v4921_v48, 16  ;;  %593 = vst.msk [vmem:[#allocation2 + $0xf0] sm:$0xf0] %vm563_vm3, %v545_v58  ;;  %v1629_v22 = vrot.slane %v4936_v11, 4 }
  0x62   : > { %3916 = vmatprep.mubr.msk.bf16.mxu1 %vm946_vm5, %v4926_v59  ;;  %594 = vst.msk [vmem:[#allocation2 + $0xf8] sm:$0xf] %vm565_vm4, %v545_v58  ;;  %v858_v12 = vrot.slane %v856_v55, 3  ;;  %v861_v13 = vrot.slane %v859_v52, 4  ;;  %4075 = vmatmul.mubr.msk.bf16.gmra.mrb[8].mxu0 %vm946_vm5, %v4820_v61  ;;  %v546_v21 = vrot.slane %v394_v62, 4  ;;  %v1630_v47 = vrot.slane %v4897_v63, 4 }
  0x63   : > { %v866_v9 = vrot.slane %v864_v5, 3  ;;  %v641_v26 = vld [vmem:[#allocation2 + $0xd0] sm:$0xf8]  ;;  %v869_v17 = vrot.slane %v867_v56, 4  ;;  %4078 = vmatprep.mubr.msk.bf16.mxu0 %vm946_vm5, %v4825_v4  ;;  %v4954_v31 = vsel %vm1595_vm6, %v1623_v16, %v1624_v60  ;;  %v4966_v16 = vsel %vm1595_vm6, %v1626_v0, %v1627_v6  ;;  %v404_v6 = vld [vmem:[#allocation2 + $0x8] sm:$0x1f] }
  0x64   : > { %v4941_v39 = vld [vmem:[#allocation2 + $0xd8] sm:$0xf]  ;;  %v873_v2 = vshrl.u32 %v641_v26, 16  ;;  %v876_v19 = vshll.u32 %v641_v26, 16  ;;  %v862_v41 = vor.u32 %v861_v13, %v858_v12  ;;  %595 = vst.msk [vmem:[#allocation2 + $0x100] sm:$0xf0] %vm563_vm3, %v546_v21 }
  0x65   : > { %v881_v33 = vshrl.u32 %v4941_v39, 16  ;;  %v884_v37 = vshll.u32 %v4941_v39, 16  ;;  %v870_v23 = vor.u32 %v869_v17, %v866_v9  ;;  %596 = vst.msk [vmem:[#allocation2 + $0x108] sm:$0xf] %vm565_vm4, %v546_v21  ;;  %5634 = vst [vmem:[#allocation11_spill] sm:$0xff] %v4954_v31  ;;  %vm3483_vm15 = vcmask 122880  }
  0x66   : > { %v875_v57 = vrot.slane %v873_v2, 3  ;;  %v878_v25 = vrot.slane %v876_v19, 4  ;;  %v643_v43 = vld [vmem:[#allocation2 + $0xe0] sm:$0xf8]  ;;  %5635 = vst [vmem:[#allocation12_spill] sm:$0xff] %v4966_v16 }
  0x67   : > { %v883_v27 = vrot.slane %v881_v33, 3  ;;  %v886_v28 = vrot.slane %v884_v37, 4  ;;  %v4951_v30 = vld [vmem:[#allocation2 + $0xe8] sm:$0xf]  ;;  %v4957_v35 = vsel %vm402_vm7, %v862_v41, %v870_v23  ;;  %v890_v58 = vshrl.u32 %v643_v43, 16 }
  0x68   : > { %v879_v45 = vor.u32 %v878_v25, %v875_v57  ;;  %v893_v3 = vshll.u32 %v643_v43, 16  ;;  %3917 = vmatmul.mubr.msk.bf16.gmra.mrb[20].mxu1 %vm946_vm5, %v4957_v35  ;;  %v898_v63 = vshrl.u32 %v4951_v30, 16  ;;  %v901_v52 = vshll.u32 %v4951_v30, 16  ;;  %v645_v5 = vld [vmem:[#allocation2 + $0xf0] sm:$0xf8] }
  0x69   : > { %v887_v55 = vor.u32 %v886_v28, %v883_v27  ;;  %v4963_v56 = vld [vmem:[#allocation2 + $0xf8] sm:$0xf]  ;;  %v892_v60 = vrot.slane %v890_v58, 3  ;;  %v907_v12 = vshrl.u32 %v645_v5, 16  ;;  %v910_v13 = vshll.u32 %v645_v5, 16 }
  0x6a   : > { %v895_v62 = vrot.slane %v893_v3, 4  ;;  %v398_v26 = vld [vmem:[#allocation2] sm:$0xf8]  ;;  %v900_v2 = vrot.slane %v898_v63, 3  ;;  %v903_v19 = vrot.slane %v901_v52, 4  ;;  %4079 = vmatmul.mubr.msk.bf16.gmra.mrb[12].mxu0 %vm946_vm5, %v4954_v31  ;;  %v915_v0 = vshrl.u32 %v4963_v56, 16 }
  0x6b   : > { %v4975_v17 = vsel %vm402_vm7, %v879_v45, %v887_v55  ;;  %v909_v41 = vrot.slane %v907_v12, 3  ;;  %v912_v33 = vrot.slane %v910_v13, 4  ;;  %v918_v37 = vshll.u32 %v4963_v56, 16  ;;  %4082 = vmatprep.mubr.msk.bf16.mxu0 %vm946_vm5, %v4966_v16  ;;  %v4991_v57 = vld [vmem:[#allocation2 + $0xc0] sm:$0xf0] }
  0x6c   : > { %3920 = vmatprep.mubr.msk.bf16.mxu1 %vm946_vm5, %v4975_v17  ;;  %v896_v21 = vor.u32 %v895_v62, %v892_v60  ;;  %v904_v25 = vor.u32 %v903_v19, %v900_v2  ;;  %v917_v27 = vrot.slane %v915_v0, 3  ;;  %v647_v28 = vld [vmem:[#allocation2 + $0x100] sm:$0xf8]  ;;  %v4993_v43 = vld [vmem:[#allocation2 + $0x108] sm:$0xf]  ;;  %v4996_v45 = vsel %vm1595_vm6, %v1629_v22, %v1630_v47 }
  0x6d   : > { %5640 = vst [vmem:[#allocation13_spill] sm:$0xff] %v4996_v45  ;;  %v399_v58 = vsel %vm4970_vm10, 0, %v398_v26  ;;  %v913_v3 = vor.u32 %v912_v33, %v909_v41  ;;  %v920_v55 = vrot.slane %v918_v37, 4  ;;  %v924_v63 = vshrl.u32 %v647_v28, 16  ;;  %v5008_v2 = vld [vmem:[#allocation2 + $0xd0] sm:$0xf0] }
  0x6e   : > { %v927_v52 = vshll.u32 %v647_v28, 16  ;;  %400 = vst [vmem:[#allocation2] sm:$0xf8] %v399_v58  ;;  %v5001_v5 = vsel %vm402_vm7, %v896_v21, %v904_v25  ;;  %v932_v60 = vshrl.u32 %v4993_v43, 16  ;;  %v935_v62 = vshll.u32 %v4993_v43, 16 }
  0x6f   : > { %v405_v12 = vsel %vm4987_vm11, 0, %v404_v6  ;;  %v921_v22 = vor.u32 %v920_v55, %v917_v27  ;;  %v926_v47 = vrot.slane %v924_v63, 3  ;;  %v1632_v26 = vrot.slane %v4991_v57, 4  ;;  %v5016_v33 = vld [vmem:[#allocation2 + $0xe0] sm:$0xf0] }
  0x70   : > { %v929_v13 = vrot.slane %v927_v52, 4  ;;  %406 = vst [vmem:[#allocation2 + $0x8] sm:$0x1f] %v405_v12  ;;  %3921 = vmatmul.mubr.msk.bf16.gmra.mrb[24].mxu1 %vm946_vm5, %v5001_v5  ;;  %v934_v19 = vrot.slane %v932_v60, 3  ;;  %v937_v0 = vrot.slane %v935_v62, 4  ;;  %v1633_v21 = vrot.slane %v4921_v48, 4 }
  0x71   : > { %v5014_v41 = vsel %vm402_vm7, %v913_v3, %v921_v22  ;;  %v408_v37 = vld [vmem:[#allocation2 + $0x110] sm:$0xf8]  ;;  %v411_v25 = vld [vmem:[#allocation2 + $0x118] sm:$0x1f]  ;;  %v1635_v48 = vrot.slane %v5008_v2, 4  ;;  %v1636_v58 = vrot.slane %v4941_v39, 4 }
  0x72   : > { %v930_v6 = vor.u32 %v929_v13, %v926_v47  ;;  %3924 = vmatprep.mubr.msk.bf16.mxu1 %vm946_vm5, %v5014_v41  ;;  %v938_v27 = vor.u32 %v937_v0, %v934_v19  ;;  %4083 = vmatmul.mubr.msk.bf16.gmra.mrb[16].mxu0 %vm946_vm5, %v4996_v45  ;;  %v5023_v28 = vsel %vm1595_vm6, %v1632_v26, %v1633_v21  ;;  %v1638_v55 = vrot.slane %v5016_v33, 4  ;;  %v5049_v23 = vld [vmem:[#allocation2 + $0xf0] sm:$0xf0]  ;;  %v467_v47 = vld [vmem:[#allocation2 + $0x18] sm:$0x10] }
  0x73   : > { %5641 = vst [vmem:[#allocation14_spill] sm:$0xff] %v5023_v28  ;;  %4086 = vmatprep.mubr.msk.bf16.mxu0 %vm946_vm5, %v5023_v28  ;;  %v1639_v63 = vrot.slane %v4951_v30, 4  ;;  %v409_v52 = vsel %vm4970_vm10, 0, %v408_v37  ;;  %v412_v60 = vsel %vm4987_vm11, 0, %v411_v25  ;;  %v5047_v9 = vsel %vm1595_vm6, %v1635_v48, %v1636_v58  ;;  %v470_v25 = vld [vmem:[#allocation2 + $0x28] sm:$0x10] }
  0x74   : > { %v5036_v62 = vsel %vm402_vm7, %v930_v6, %v938_v27  ;;  %410 = vst [vmem:[#allocation2 + $0x110] sm:$0xf8] %v409_v52  ;;  %413 = vst [vmem:[#allocation2 + $0x118] sm:$0x1f] %v412_v60  ;;  %v473_v27 = vld [vmem:[#allocation2 + $0x38] sm:$0x10] }
  0x75   : > { %v615_v3 = vld [vmem:[#allocation2] sm:$0xf8]  ;;  %5644 = vst [vmem:[#allocation15_spill] sm:$0xff] %v5047_v9  ;;  %v5058_v6 = vsel %vm1595_vm6, %v1638_v55, %v1639_v63  ;;  %v468_v60 = vsel %vm5040_vm13, 0, %v467_v47  ;;  %v471_v47 = vsel %vm5040_vm13, 0, %v470_v25 }
  0x76   : > { %v652_v12 = vshrl.u32 %v615_v3, 16  ;;  %v655_v22 = vshll.u32 %v615_v3, 16  ;;  %v5053_v21 = vld [vmem:[#allocation2] sm:$0xf0]  ;;  %5645 = vst [vmem:[#allocation16_spill] sm:$0xff] %v5058_v6 }
  0x77   : > { %v5044_v30 = vld [vmem:[#allocation2 + $0x8] sm:$0xf]  ;;  %v5060_v52 = vld [vmem:[#allocation2 + $0x100] sm:$0xf0]  ;;  %v2325_v55 = vshrl.u32 %v5053_v21, 16 }
  0x78   : > { %v654_v13 = vrot.slane %v652_v12, 3  ;;  %v657_v26 = vrot.slane %v655_v22, 4  ;;  %v660_v19 = vshrl.u32 %v5044_v30, 16  ;;  %v663_v0 = vshll.u32 %v5044_v30, 16  ;;  %3925 = vmatmul.mubr.msk.bf16.gmra.mrb[28].mxu1 %vm946_vm5, %v5036_v62  ;;  %v2305_v37 = vld [vmem:[#allocation2 + $0x8] sm:$0x1f] }
  0x79   : > { %v1641_v12 = vrot.slane %v5049_v23, 4  ;;  %v1642_v22 = vrot.slane %v4963_v56, 4  ;;  %469 = vst [vmem:[#allocation2 + $0x18] sm:$0x10] %v468_v60  ;;  %472 = vst [vmem:[#allocation2 + $0x28] sm:$0x10] %v471_v47 }
  0x7a   : > { %v658_v48 = vor.u32 %v657_v26, %v654_v13  ;;  %v662_v58 = vrot.slane %v660_v19, 3  ;;  %v665_v3 = vrot.slane %v663_v0, 4  ;;  %4087 = vmatmul.mubr.msk.bf16.gmra.mrb[20].mxu0 %vm946_vm5, %v5047_v9  ;;  %v2328_v13 = vshll.u32 %v5053_v21, 16  ;;  %v476_v60 = vld [vmem:[#allocation2 + $0x48] sm:$0x10] }
  0x7b   : > { %4090 = vmatprep.mubr.msk.bf16.mxu0 %vm946_vm5, %v5058_v6  ;;  %v2333_v26 = vshrl.u32 %v2305_v37, 16  ;;  %v1893_v19 = vrot.slane %v5060_v52, 4  ;;  %v1894_v0 = vrot.slane %v4993_v43, 4  ;;  %v2336_v9 = vshll.u32 %v2305_v37, 16  ;;  %v482_v25 = vld [vmem:[#allocation2 + $0x68] sm:$0x10] }
  0x7c   : > { %v666_v63 = vor.u32 %v665_v3, %v662_v58  ;;  %v474_v56 = vsel %vm5040_vm13, 0, %v473_v27  ;;  %v479_v3 = vld [vmem:[#allocation2 + $0x58] sm:$0x10]  ;;  %v5081_v6 = vsel %vm1595_vm6, %v1641_v12, %v1642_v22  ;;  %v5086_v43 = vld [vmem:[%s5596_s3 + $0x8] sm:$0xff]   ;;  %v2327_v37 = vrot.slane %v2325_v55, 4 }
  0x7d   : > { %475 = vst [vmem:[#allocation2 + $0x38] sm:$0x10] %v474_v56  ;;  %5646 = vst [vmem:[#allocation17_spill] sm:$0xff] %v5081_v6  ;;  %v2330_v47 = vrot.slane %v2328_v13, 5  ;;  %v2335_v28 = vrot.slane %v2333_v26, 4  ;;  %v477_v27 = vsel %vm5040_vm13, 0, %v476_v60 }
  0x7e   : > { %v667_v58 = vsel %vm402_vm7, %v658_v48, %v666_v63  ;;  %v5093_v48 = vsel %vm1595_vm6, %v1893_v19, %v1894_v0  ;;  %v5095_v12 = vld [vmem:[#allocation2 + $0x118] sm:$0xf]  ;;  %v5097_v22 = vld [vmem:[#allocation2 + $0x110] sm:$0xf0]  ;;  %v2338_v63 = vrot.slane %v2336_v9, 5  ;;  %v480_v55 = vsel %vm5040_vm13, 0, %v479_v3 }
  0x7f   : > { %3930 = vmatprep.mubr.msk.bf16.mxu1 %vm946_vm5, %v667_v58  ;;  %5647 = vst [vmem:[#allocation18_spill] sm:$0xff] %v5093_v48  ;;  %5648 = vst [vmem:[#allocation19_spill] sm:$0xff] %v5097_v22  ;;  %v4475_v26 = vld [vmem:[#allocation2 + $0x10] sm:$0xf0]  ;;  %v4476_v9 = vld [vmem:[#allocation2 + $0x20] sm:$0xf0] }
  0x80   : > { %3931 = vmatmul.mubr.msk.bf16.vlgmr.msra.gmra.mrb[0].mxu1 %vm946_vm5, %v4696_v32  ;;  %478 = vst [vmem:[#allocation2 + $0x48] sm:$0x10] %v477_v27  ;;  %v2306_v13 = vld [vmem:[#allocation2 + $0x18] sm:$0x1f]  ;;  %481 = vst [vmem:[#allocation2 + $0x58] sm:$0x10] %v480_v55  ;;  %v2331_v55 = vor.u32 %v2330_v47, %v2327_v37 }
  0x81   : > { %3963 = vmatpush3.bf16.msra.mxu1 %v4708_v49  ;;  %3934 = vmatprep.mubr.msk.bf16.mxu1 %vm946_vm5, %v4711_v50  ;;  %v483_v32 = vsel %vm5040_vm13, 0, %v482_v25  ;;  %v2342_v19 = vshrl.u32 %v4475_v26, 16  ;;  %v2345_v0 = vshll.u32 %v4475_v26, 16  ;;  %v2359_v56 = vshrl.u32 %v4476_v9, 16  ;;  %v2307_v27 = vld [vmem:[#allocation2 + $0x28] sm:$0x1f] }
  0x82   : > { %4091 = vmatmul.mubr.msk.bf16.gmra.mrb[24].mxu0 %vm946_vm5, %v5081_v6  ;;  %v2362_v60 = vshll.u32 %v4476_v9, 16  ;;  %484 = vst [vmem:[#allocation2 + $0x68] sm:$0x10] %v483_v32  ;;  %3996 = vmatprep.subr.bf16.mxu1 %v5086_v43  ;;  %v2100_v49 = vrot.slane %v5097_v22, 4  ;;  %v2101_v58 = vrot.slane %v5095_v12, 4  ;;  %v2350_v3 = vshrl.u32 %v2306_v13, 16 }
  0x83   : > { %4094 = vmatprep.mubr.msk.bf16.mxu0 %vm946_vm5, %v5093_v48  ;;  %v2353_v25 = vshll.u32 %v2306_v13, 16  ;;  %v2339_v26 = vor.u32 %v2338_v63, %v2335_v28  ;;  %v2367_v45 = vshrl.u32 %v2307_v27, 16  ;;  %v2370_v6 = vshll.u32 %v2307_v27, 16  ;;  %v485_v16 = vld [vmem:[#allocation2 + $0x78] sm:$0x10] }
  0x84   : > { %vm2323_vm14 = vsmask.f32 3328  ;;  %v2344_v9 = vrot.slane %v2342_v19, 4  ;;  %v2347_v32 = vrot.slane %v2345_v0, 5  ;;  %v2361_v31 = vrot.slane %v2359_v56, 4 }
  0x85   : > { %v2102_v4 = vsel %vm1595_vm6, %v2100_v49, %v2101_v58  ;;  %v2352_v61 = vrot.slane %v2350_v3, 4  ;;  %v2355_v48 = vrot.slane %v2353_v25, 5  ;;  %v486_v22 = vsel %vm5040_vm13, 0, %v485_v16  ;;  %v2308_v13 = vld [vmem:[#allocation2 + $0x38] sm:$0x1f] }
  0x86   : > { %v2340_v37 = vsel %vm2323_vm14, %v2331_v55, %v2339_v26  ;;  %v2364_v28 = vrot.slane %v2362_v60, 5  ;;  %v2369_v47 = vrot.slane %v2367_v45, 4  ;;  %v2372_v63 = vrot.slane %v2370_v6, 5  ;;  %487 = vst [vmem:[#allocation2 + $0x78] sm:$0x10] %v486_v22 }
  0x87   : > { %v4477_v19 = vld [vmem:[#allocation2 + $0x30] sm:$0xf0]  ;;  %v2309_v56 = vld [vmem:[#allocation2 + $0x48] sm:$0x1f]  ;;  %v4478_v16 = vld [vmem:[#allocation2 + $0x40] sm:$0xf0]  ;;  %v2348_v27 = vor.u32 %v2347_v32, %v2344_v9  ;;  %v2356_v45 = vor.u32 %v2355_v48, %v2352_v61 }
  0x88   : > { %3935 = vmatmul.mubr.msk.bf16.gmra.mrb[4].mxu1 %vm946_vm5, %v4724_v15  ;;  %v2376_v0 = vshrl.u32 %v4477_v19, 16  ;;  %v2379_v49 = vshll.u32 %v4477_v19, 16  ;;  %v2393_v58 = vshrl.u32 %v4478_v16, 16  ;;  %v2396_v3 = vshll.u32 %v4478_v16, 16  ;;  %v488_v25 = vld [vmem:[#allocation2 + $0x88] sm:$0x10] }
  0x89   : > { %3938 = vmatprep.mubr.msk.bf16.mxu1 %vm946_vm5, %v4735_v24  ;;  %v2384_v6 = vshrl.u32 %v2308_v13, 16  ;;  %v2387_v60 = vshll.u32 %v2308_v13, 16  ;;  %v491_v22 = vld [vmem:[#allocation2 + $0x98] sm:$0x10]  ;;  %v2365_v55 = vor.u32 %v2364_v28, %v2361_v31  ;;  %v2373_v26 = vor.u32 %v2372_v63, %v2369_v47  ;;  %v494_v32 = vld [vmem:[#allocation2 + $0xa8] sm:$0x10] }
  0x8a   : > { %4095 = vmatmul.mubr.msk.bf16.gmra.mrb[28].mxu0 %vm946_vm5, %v2102_v4  ;;  %v2401_v10 = vshrl.u32 %v2309_v56, 16  ;;  %v2404_v14 = vshll.u32 %v2309_v56, 16  ;;  %v2378_v38 = vrot.slane %v2376_v0, 4  ;;  %v489_v4 = vsel %vm5040_vm13, 0, %v488_v25  ;;  %v497_v28 = vld [vmem:[#allocation2 + $0xb8] sm:$0x10] }
  0x8b   : > { %4100 = vmatprep.mubr.msk.bf16.mxu0 %vm946_vm5, %v2340_v37  ;;  %v2381_v19 = vrot.slane %v2379_v49, 5  ;;  %v2395_v29 = vrot.slane %v2393_v58, 4  ;;  %v2398_v1 = vrot.slane %v2396_v3, 5  ;;  %490 = vst [vmem:[#allocation2 + $0x88] sm:$0x10] %v489_v4  ;;  %v492_v9 = vsel %vm5040_vm13, 0, %v491_v22 }
  0x8c   : > { %v5128_v61 = vsel %vm2323_vm14, %v2348_v27, %v2356_v45  ;;  %v2386_v48 = vrot.slane %v2384_v6, 4  ;;  %v2389_v31 = vrot.slane %v2387_v60, 5  ;;  %v2310_v37 = vld [vmem:[#allocation2 + $0x58] sm:$0x1f]  ;;  %493 = vst [vmem:[#allocation2 + $0x98] sm:$0x10] %v492_v9  ;;  %v5133_v47 = vsel %vm2323_vm14, %v2365_v55, %v2373_v26 }
  0x8d   : > { %v2403_v63 = vrot.slane %v2401_v10, 4  ;;  %v2406_v13 = vrot.slane %v2404_v14, 5  ;;  %v500_v0 = vld [vmem:[#allocation2 + $0xc8] sm:$0x10]  ;;  %v5138_v56 = vld [vmem:[%s5596_s3 + $0x40] sm:$0xff]   ;;  %v495_v25 = vsel %vm5040_vm13, 0, %v494_v32  ;;  %v2382_v14 = vor.u32 %v2381_v19, %v2378_v38 }
  0x8e   : > { %v4479_v49 = vld [vmem:[#allocation2 + $0x50] sm:$0xf0]  ;;  %v2311_v3 = vld [vmem:[#allocation2 + $0x68] sm:$0x1f]  ;;  %v2399_v10 = vor.u32 %v2398_v1, %v2395_v29  ;;  %v2418_v27 = vshrl.u32 %v2310_v37, 16  ;;  %v2421_v45 = vshll.u32 %v2310_v37, 16  ;;  %v2390_v6 = vor.u32 %v2389_v31, %v2386_v48 }
  0x8f   : > { %v2410_v16 = vshrl.u32 %v4479_v49, 16  ;;  %v2413_v58 = vshll.u32 %v4479_v49, 16  ;;  %496 = vst [vmem:[#allocation2 + $0xa8] sm:$0x10] %v495_v25  ;;  %v2427_v60 = vshrl.u32 %v4759_v53, 16  ;;  %v2430_v22 = vshll.u32 %v4759_v53, 16 }
  0x90   : > { %3939 = vmatmul.mubr.msk.bf16.gmra.mrb[8].mxu1 %vm946_vm5, %v4755_v44  ;;  %v498_v55 = vsel %vm5040_vm13, 0, %v497_v28  ;;  %v2407_v26 = vor.u32 %v2406_v13, %v2403_v63  ;;  %v2435_v4 = vshrl.u32 %v2311_v3, 16  ;;  %v2438_v38 = vshll.u32 %v2311_v3, 16  ;;  %v503_v32 = vld [vmem:[#allocation2 + $0xd8] sm:$0x10] }
  0x91   : > { %3942 = vmatprep.mubr.msk.bf16.mxu1 %vm946_vm5, %v4806_v46  ;;  %499 = vst [vmem:[#allocation2 + $0xb8] sm:$0x10] %v498_v55  ;;  %v501_v1 = vsel %vm5040_vm13, 0, %v500_v0  ;;  %v2412_v29 = vrot.slane %v2410_v16, 4  ;;  %v2420_v19 = vrot.slane %v2418_v27, 4  ;;  %v2423_v9 = vrot.slane %v2421_v45, 5 }
  0x92   : > { %4101 = vmatmul.mubr.msk.bf16.vlgmr.msra.gmra.mrb[0].mxu0 %vm946_vm5, %v5128_v61  ;;  %502 = vst [vmem:[#allocation2 + $0xc8] sm:$0x10] %v501_v1  ;;  %v5157_v53 = vsel %vm2323_vm14, %v2382_v14, %v2390_v6  ;;  %v2429_v48 = vrot.slane %v2427_v60, 4  ;;  %v506_v31 = vld [vmem:[#allocation2 + $0xe8] sm:$0x10]  ;;  %v5162_v37 = vsel %vm2323_vm14, %v2399_v10, %v2407_v26  ;;  %v2432_v28 = vrot.slane %v2430_v22, 5 }
  0x93   : > { %4133 = vmatpush3.bf16.msra.mxu0 %v4848_v7  ;;  %4104 = vmatprep.mubr.msk.bf16.mxu0 %vm946_vm5, %v5133_v47  ;;  %v2415_v7 = vrot.slane %v2413_v58, 5  ;;  %v2437_v63 = vrot.slane %v2435_v4, 4  ;;  %v2440_v13 = vrot.slane %v2438_v38, 5  ;;  %v2312_v0 = vld [vmem:[#allocation2 + $0x78] sm:$0x1f]  ;;  %v504_v58 = vsel %vm5040_vm13, 0, %v503_v32 }
  0x94   : > { %4166 = vmatprep.subr.bf16.mxu0 %v5138_v56  ;;  %v2313_v16 = vld [vmem:[#allocation2 + $0x88] sm:$0x1f]  ;;  %v2424_v3 = vor.u32 %v2423_v9, %v2420_v19  ;;  %v2444_v25 = vshrl.u32 %v4792_v36, 16  ;;  %v2447_v14 = vshll.u32 %v4792_v36, 16  ;;  %v2461_v10 = vshrl.u32 %v4809_v51, 16 }
  0x95   : > { %v2416_v49 = vor.u32 %v2415_v7, %v2412_v29  ;;  %505 = vst [vmem:[#allocation2 + $0xd8] sm:$0x10] %v504_v58  ;;  %v2452_v27 = vshrl.u32 %v2312_v0, 16  ;;  %v2455_v45 = vshll.u32 %v2312_v0, 16  ;;  %v2464_v6 = vshll.u32 %v4809_v51, 16 }
  0x96   : > { %v507_v60 = vsel %vm5040_vm13, 0, %v506_v31  ;;  %v2433_v22 = vor.u32 %v2432_v28, %v2429_v48  ;;  %v2441_v55 = vor.u32 %v2440_v13, %v2437_v63  ;;  %v2469_v26 = vshrl.u32 %v2313_v16, 16  ;;  %v509_v38 = vld [vmem:[#allocation2 + $0xf8] sm:$0x10]  ;;  %v2315_v13 = vld [vmem:[#allocation2 + $0xa8] sm:$0x1f] }
  0x97   : > { %v2472_v4 = vshll.u32 %v2313_v16, 16  ;;  %508 = vst [vmem:[#allocation2 + $0xe8] sm:$0x10] %v507_v60  ;;  %v5179_v36 = vsel %vm2323_vm14, %v2416_v49, %v2424_v3  ;;  %v2446_v1 = vrot.slane %v2444_v25, 4  ;;  %v2449_v29 = vrot.slane %v2447_v14, 5 }
  0x98   : > { %3943 = vmatmul.mubr.msk.bf16.gmra.mrb[12].mxu1 %vm946_vm5, %v4836_v34  ;;  %v2454_v7 = vrot.slane %v2452_v27, 4  ;;  %v2457_v19 = vrot.slane %v2455_v45, 5  ;;  %v2463_v9 = vrot.slane %v2461_v10, 4  ;;  %v2466_v32 = vrot.slane %v2464_v6, 5  ;;  %v2314_v28 = vld [vmem:[#allocation2 + $0x98] sm:$0x1f] }
  0x99   : > { %3946 = vmatprep.mubr.msk.bf16.mxu1 %vm946_vm5, %v4851_v8  ;;  %v5184_v51 = vsel %vm2323_vm14, %v2433_v22, %v2441_v55  ;;  %v2471_v48 = vrot.slane %v2469_v26, 4  ;;  %v2474_v31 = vrot.slane %v2472_v4, 5  ;;  %v510_v63 = vsel %vm5040_vm13, 0, %v509_v38 }
  0x9a   : > { %4105 = vmatmul.mubr.msk.bf16.gmra.mrb[4].mxu0 %vm946_vm5, %v5157_v53  ;;  %511 = vst [vmem:[#allocation2 + $0xf8] sm:$0x10] %v510_v63  ;;  %v2478_v0 = vshrl.u32 %v4912_v18, 16  ;;  %v2481_v49 = vshll.u32 %v4912_v18, 16  ;;  %v2495_v16 = vshrl.u32 %v4919_v42, 16  ;;  %v2498_v58 = vshll.u32 %v4919_v42, 16 }
  0x9b   : > { %4108 = vmatprep.mubr.msk.bf16.mxu0 %vm946_vm5, %v5162_v37  ;;  %v2450_v3 = vor.u32 %v2449_v29, %v2446_v1  ;;  %v2458_v25 = vor.u32 %v2457_v19, %v2454_v7  ;;  %v2486_v14 = vshrl.u32 %v2314_v28, 16  ;;  %v2489_v10 = vshll.u32 %v2314_v28, 16  ;;  %v2316_v19 = vld [vmem:[#allocation2 + $0xb8] sm:$0x1f] }
  0x9c   : > { %v2467_v27 = vor.u32 %v2466_v32, %v2463_v9  ;;  %v2475_v45 = vor.u32 %v2474_v31, %v2471_v48  ;;  %v2503_v6 = vshrl.u32 %v2315_v13, 16  ;;  %v2506_v60 = vshll.u32 %v2315_v13, 16 }
  0x9d   : > { %v2480_v22 = vrot.slane %v2478_v0, 4  ;;  %v2483_v55 = vrot.slane %v2481_v49, 5  ;;  %v2497_v26 = vrot.slane %v2495_v16, 4  ;;  %v2500_v4 = vrot.slane %v2498_v58, 5 }
  0x9e   : > { %v5199_v18 = vsel %vm2323_vm14, %v2450_v3, %v2458_v25  ;;  %v2488_v38 = vrot.slane %v2486_v14, 4  ;;  %v2491_v42 = vrot.slane %v2489_v10, 5  ;;  %v1596_v63 = vrot.slane %v5053_v21, 4  ;;  %v2317_v21 = vld [vmem:[#allocation2 + $0xc8] sm:$0x1f] }
  0x9f   : > { %v5205_v1 = vsel %vm2323_vm14, %v2467_v27, %v2475_v45  ;;  %v2505_v29 = vrot.slane %v2503_v6, 4  ;;  %v2508_v7 = vrot.slane %v2506_v60, 5  ;;  %v1597_v9 = vrot.slane %v5044_v30, 4 }
  0xa0   : > { %3947 = vmatmul.mubr.msk.bf16.gmra.mrb[16].mxu1 %vm946_vm5, %v4865_v20  ;;  %v2512_v32 = vshrl.u32 %v4936_v11, 16  ;;  %v2515_v48 = vshll.u32 %v4936_v11, 16  ;;  %v2529_v31 = vshrl.u32 %v4991_v57, 16  ;;  %v2532_v28 = vshll.u32 %v4991_v57, 16 }
  0xa1   : > { %3950 = vmatprep.mubr.msk.bf16.mxu1 %vm946_vm5, %v4886_v40  ;;  %v5217_v13 = vsel %vm1595_vm6, %v1596_v63, %v1597_v9  ;;  %v513_v30 = vsel %vm5040_vm13, 0, %v512_v54  ;;  %v2484_v0 = vor.u32 %v2483_v55, %v2480_v22  ;;  %v2492_v49 = vor.u32 %v2491_v42, %v2488_v38 }
  0xa2   : > { %4109 = vmatmul.mubr.msk.bf16.gmra.mrb[8].mxu0 %vm946_vm5, %v5179_v36  ;;  %v2520_v11 = vshrl.u32 %v2316_v19, 16  ;;  %v2523_v16 = vshll.u32 %v2316_v19, 16  ;;  %514 = vst [vmem:[#allocation2 + $0x108] sm:$0x10] %v513_v30  ;;  %v2501_v58 = vor.u32 %v2500_v4, %v2497_v26  ;;  %v2509_v3 = vor.u32 %v2508_v7, %v2505_v29  ;;  %v2318_v26 = vld [vmem:[#allocation2 + $0xd8] sm:$0x1f] }
  0xa3   : > { %4112 = vmatprep.mubr.msk.bf16.mxu0 %vm946_vm5, %v5184_v51  ;;  %v2537_v25 = vshrl.u32 %v2317_v21, 16  ;;  %v2540_v14 = vshll.u32 %v2317_v21, 16  ;;  %v2514_v10 = vrot.slane %v2512_v32, 4  ;;  %v2517_v57 = vrot.slane %v2515_v48, 5  ;;  %v2319_v4 = vld [vmem:[#allocation2 + $0xe8] sm:$0x1f] }
  0xa4   : > { %v2531_v27 = vrot.slane %v2529_v31, 4  ;;  %v2534_v45 = vrot.slane %v2532_v28, 5  ;;  %v5224_v6 = vsel %vm2323_vm14, %v2484_v0, %v2492_v49  ;;  %v2522_v54 = vrot.slane %v2520_v11, 4 }
  0xa5   : > { %v2525_v39 = vrot.slane %v2523_v16, 5  ;;  %v5229_v60 = vsel %vm2323_vm14, %v2501_v58, %v2509_v3  ;;  %v2539_v22 = vrot.slane %v2537_v25, 4  ;;  %v2542_v55 = vrot.slane %v2540_v14, 5 }
  0xa6   : > { %v2518_v38 = vor.u32 %v2517_v57, %v2514_v10  ;;  %v2535_v42 = vor.u32 %v2534_v45, %v2531_v27  ;;  %v2546_v63 = vshrl.u32 %v5008_v2, 16  ;;  %v2549_v29 = vshll.u32 %v5008_v2, 16 }
  0xa7   : > { %v2526_v7 = vor.u32 %v2525_v39, %v2522_v54  ;;  %v2554_v19 = vshrl.u32 %v2318_v26, 16  ;;  %v2557_v9 = vshll.u32 %v2318_v26, 16  ;;  %v2563_v32 = vshrl.u32 %v5016_v33, 16 }
  0xa8   : > { %3951 = vmatmul.mubr.msk.bf16.gmra.mrb[20].mxu1 %vm946_vm5, %v4926_v59  ;;  %v2543_v48 = vor.u32 %v2542_v55, %v2539_v22  ;;  %v2566_v21 = vshll.u32 %v5016_v33, 16  ;;  %v2571_v31 = vshrl.u32 %v2319_v4, 16  ;;  %v2574_v28 = vshll.u32 %v2319_v4, 16  ;;  %v2320_v33 = vld [vmem:[#allocation2 + $0xf8] sm:$0x1f] }
  0xa9   : > { %3954 = vmatprep.mubr.msk.bf16.mxu1 %vm946_vm5, %v4957_v35  ;;  %v2548_v30 = vrot.slane %v2546_v63, 4  ;;  %v2551_v0 = vrot.slane %v2549_v29, 5  ;;  %v5242_v49 = vsel %vm2323_vm14, %v2518_v38, %v2526_v7  ;;  %v2556_v11 = vrot.slane %v2554_v19, 4 }
  0xaa   : > { %4113 = vmatmul.mubr.msk.bf16.gmra.mrb[12].mxu0 %vm946_vm5, %v5199_v18  ;;  %v2559_v2 = vrot.slane %v2557_v9, 5  ;;  %v2565_v16 = vrot.slane %v2563_v32, 4  ;;  %v5247_v58 = vsel %vm2323_vm14, %v2535_v42, %v2543_v48  ;;  %v2568_v3 = vrot.slane %v2566_v21, 5  ;;  %v5649_v21 = vld [vmem:[#allocation3_spill] sm:$0xff] }
  0xab   : > { %4116 = vmatprep.mubr.msk.bf16.mxu0 %vm946_vm5, %v5205_v1  ;;  %v2573_v25 = vrot.slane %v2571_v31, 4  ;;  %v2576_v14 = vrot.slane %v2574_v28, 5  ;;  %v2552_v10 = vor.u32 %v2551_v0, %v2548_v30  ;;  %v2580_v57 = vshrl.u32 %v5049_v23, 16  ;;  %v5651_v30 = vld [vmem:[#allocation5_spill] sm:$0xff]  ;;  %v5652_v0 = vld [vmem:[#allocation6_spill] sm:$0xff] }
  0xac   : > { %v2560_v27 = vor.u32 %v2559_v2, %v2556_v11  ;;  %v2583_v45 = vshll.u32 %v5049_v23, 16  ;;  %v2588_v54 = vshrl.u32 %v2320_v33, 16  ;;  %v2591_v39 = vshll.u32 %v2320_v33, 16  ;;  %v4480_v23 = vld [vmem:[%s5596_s3 + $0x20] sm:$0xff]   ;;  %v5654_v2 = vld [vmem:[#allocation8_spill] sm:$0xff] }
  0xad   : > { %v2569_v22 = vor.u32 %v2568_v3, %v2565_v16  ;;  %v2577_v55 = vor.u32 %v2576_v14, %v2573_v25  ;;  %v2582_v26 = vrot.slane %v2580_v57, 4  ;;  %v5653_v11 = vld [vmem:[#allocation7_spill] sm:$0xff]  ;;  %v5655_v16 = vld [vmem:[#allocation9_spill] sm:$0xff]  ;;  %v5656_v3 = vld [vmem:[#allocation10_spill] sm:$0xff] }
  0xae   : > { %v5258_v4 = vsel %vm2323_vm14, %v2552_v10, %v2560_v27  ;;  %v2590_v38 = vrot.slane %v2588_v54, 4  ;;  %v2593_v42 = vrot.slane %v2591_v39, 5  ;;  %v5658_v25 = vld [vmem:[#allocation12_spill] sm:$0xff] }
  0xaf   : > { %v5263_v63 = vsel %vm2323_vm14, %v2569_v22, %v2577_v55  ;;  %v5665_v22 = vld [vmem:[#allocation18_spill] sm:$0xff] }
  0xb0   : > { %3955 = vmatmul.mubr.msk.bf16.gmra.mrb[24].mxu1 %vm946_vm5, %v4975_v17  ;;  %v2594_v29 = vor.u32 %v2593_v42, %v2590_v38 }
  0xb1   : > { %3958 = vmatprep.mubr.msk.bf16.mxu1 %vm946_vm5, %v5001_v5 }
  0xb2   : > { %4117 = vmatmul.mubr.msk.bf16.gmra.mrb[16].mxu0 %vm946_vm5, %v5224_v6 }
  0xb3   : > { %4120 = vmatprep.mubr.msk.bf16.mxu0 %vm946_vm5, %v5229_v60 }
  0xb8   : > { %3959 = vmatmul.mubr.msk.bf16.gmra.mrb[28].mxu1 %vm946_vm5, %v5014_v41 }
  0xb9   : > { %3964 = vmatprep.mubr.msk.bf16.mxu1 %vm946_vm5, %v4711_v50  ;;  %v2585_v50 = vrot.slane %v2583_v45, 5 }
  0xba   : > { %4121 = vmatmul.mubr.msk.bf16.gmra.mrb[20].mxu0 %vm946_vm5, %v5242_v49 }
  0xbb   : > { %4124 = vmatprep.mubr.msk.bf16.mxu0 %vm946_vm5, %v5247_v58 }
  0xc0   : > { %3965 = vmatmul.mubr.msk.bf16.vlgmr.msra.gmra.mrb[0].mxu1 %vm946_vm5, %v4724_v15  ;;  %v2586_v15 = vor.u32 %v2585_v50, %v2582_v26 }
  0xc1   : > { %3997 = vmatpush3.bf16.msra.mxu1 %v5086_v43  ;;  %3968 = vmatprep.mubr.msk.bf16.mxu1 %vm946_vm5, %v4735_v24  ;;  %v649_v24 = vld [vmem:[#allocation2 + $0x110] sm:$0xf8] }
  0xc2   : > { %4125 = vmatmul.mubr.msk.bf16.gmra.mrb[24].mxu0 %vm946_vm5, %v5258_v4  ;;  %4200 = vmatprep.subr.bf16.mxu1 %v4480_v23  ;;  %v5276_v7 = vsel %vm2323_vm14, %v2586_v15, %v2594_v29 }
  0xc3   : > { %4128 = vmatprep.mubr.msk.bf16.mxu0 %vm946_vm5, %v5263_v63 }
  0xc8   : > { %3969 = vmatmul.mubr.msk.bf16.gmra.mrb[4].mxu1 %vm946_vm5, %v4755_v44  ;;  %v1327_v44 = vshrl.u32 %v649_v24, 16 }
  0xc9   : > { %3972 = vmatprep.mubr.msk.bf16.mxu1 %vm946_vm5, %v4806_v46  ;;  %v1330_v46 = vshll.u32 %v649_v24, 16 }
  0xca   : > { %4129 = vmatmul.mubr.msk.bf16.gmra.mrb[28].mxu0 %vm946_vm5, %v5276_v7 }
  0xcb   : > { %4134 = vmatprep.mubr.msk.bf16.mxu0 %vm946_vm5, %v5128_v61 }
  0xd0   : > { %3973 = vmatmul.mubr.msk.bf16.gmra.mrb[8].mxu1 %vm946_vm5, %v4836_v34  ;;  %v1335_v34 = vshrl.u32 %v5095_v12, 16 }
  0xd1   : > { %3976 = vmatprep.mubr.msk.bf16.mxu1 %vm946_vm5, %v4851_v8  ;;  %v1338_v8 = vshll.u32 %v5095_v12, 16  ;;  %v2321_v12 = vld [vmem:[#allocation2 + $0x108] sm:$0x1f] }
  0xd2   : > { %4135 = vmatmul.mubr.msk.bf16.vlgmr.msra.gmra.mrb[0].mxu0 %vm946_vm5, %v5133_v47  ;;  %v2852_v61 = vshrl.u32 %v2321_v12, 16 }
  0xd3   : > { %4167 = vmatpush3.bf16.msra.mxu0 %v5138_v56  ;;  %4138 = vmatprep.mubr.msk.bf16.mxu0 %vm946_vm5, %v5157_v53  ;;  %v2855_v56 = vshll.u32 %v2321_v12, 16 }
  0xd4   : > { %v2854_v32 = vrot.slane %v2852_v61, 4 }
  0xd5   : > { %v2857_v48 = vrot.slane %v2855_v56, 5 }
  0xd7   : > { %v2858_v31 = vor.u32 %v2857_v48, %v2854_v32 }
  0xd8   : > { %3977 = vmatmul.mubr.msk.bf16.gmra.mrb[12].mxu1 %vm946_vm5, %v4865_v20  ;;  %v1329_v20 = vrot.slane %v1327_v44, 3 }
  0xd9   : > { %3980 = vmatprep.mubr.msk.bf16.mxu1 %vm946_vm5, %v4886_v40  ;;  %v1332_v40 = vrot.slane %v1330_v46, 4 }
  0xda   : > { %4139 = vmatmul.mubr.msk.bf16.gmra.mrb[4].mxu0 %vm946_vm5, %v5162_v37 }
  0xdb   : > { %4142 = vmatprep.mubr.msk.bf16.mxu0 %vm946_vm5, %v5179_v36 }
  0xe0   : > { %3981 = vmatmul.mubr.msk.bf16.gmra.mrb[16].mxu1 %vm946_vm5, %v4926_v59  ;;  %v1337_v59 = vrot.slane %v1335_v34, 3 }
  0xe1   : > { %3984 = vmatprep.mubr.msk.bf16.mxu1 %vm946_vm5, %v4957_v35  ;;  %v1340_v35 = vrot.slane %v1338_v8, 4 }
  0xe2   : > { %4143 = vmatmul.mubr.msk.bf16.gmra.mrb[8].mxu0 %vm946_vm5, %v5184_v51 }
  0xe3   : > { %4146 = vmatprep.mubr.msk.bf16.mxu0 %vm946_vm5, %v5199_v18 }
  0xe8   : > { %3985 = vmatmul.mubr.msk.bf16.gmra.mrb[20].mxu1 %vm946_vm5, %v4975_v17  ;;  %v1333_v17 = vor.u32 %v1332_v40, %v1329_v20 }
  0xe9   : > { %3988 = vmatprep.mubr.msk.bf16.mxu1 %vm946_vm5, %v5001_v5  ;;  %v1341_v5 = vor.u32 %v1340_v35, %v1337_v59 }
  0xea   : > { %4147 = vmatmul.mubr.msk.bf16.gmra.mrb[12].mxu0 %vm946_vm5, %v5205_v1 }
  0xeb   : > { %4150 = vmatprep.mubr.msk.bf16.mxu0 %vm946_vm5, %v5224_v6  ;;  %v1342_v43 = vsel %vm402_vm7, %v1333_v17, %v1341_v5 }
  0xf0   : > { %3989 = vmatmul.mubr.msk.bf16.gmra.mrb[24].mxu1 %vm946_vm5, %v5014_v41  ;;  %v2844_v41 = vshrl.u32 %v5060_v52, 16 }
  0xf1   : > { %3992 = vmatprep.mubr.msk.bf16.mxu1 %vm946_vm5, %v5036_v62  ;;  %v2847_v62 = vshll.u32 %v5060_v52, 16 }
  0xf2   : > { %4151 = vmatmul.mubr.msk.bf16.gmra.mrb[16].mxu0 %vm946_vm5, %v5229_v60  ;;  %v2846_v19 = vrot.slane %v2844_v41, 4 }
  0xf3   : > { %4154 = vmatprep.mubr.msk.bf16.mxu0 %vm946_vm5, %v5242_v49  ;;  %v2849_v9 = vrot.slane %v2847_v62, 5 }
  0xf5   : > { %v2850_v52 = vor.u32 %v2849_v9, %v2846_v19 }
  0xf7   : > { %v2859_v28 = vsel %vm2323_vm14, %v2850_v52, %v2858_v31 }
  0xf8   : > { %3993 = vmatmul.mubr.msk.bf16.gmra.mrb[28].mxu1 %vm946_vm5, %v1342_v43 }
  0xf9   : > { %3998 = vmatprep.mubr.msk.bf16.mxu1 %vm946_vm5, %v5217_v13  ;;  %v5650_v13 = vld [vmem:[#allocation4_spill] sm:$0xff] }
  0xfa   : > { %4155 = vmatmul.mubr.msk.bf16.gmra.mrb[20].mxu0 %vm946_vm5, %v5247_v58 }
  0xfb   : > { %4158 = vmatprep.mubr.msk.bf16.mxu0 %vm946_vm5, %v5258_v4 }
 0x100   : > { %3999 = vmatmul.mubr.msk.bf16.vlgmr.msra.gmra.mrb[0].mxu1 %vm946_vm5, %v5649_v21 }
 0x101   : > { %4201 = vmatpush3.bf16.msra.mxu1 %v4480_v23  ;;  %4002 = vmatprep.mubr.msk.bf16.mxu1 %vm946_vm5, %v5650_v13 }
 0x102   : > { %4159 = vmatmul.mubr.msk.bf16.gmra.mrb[24].mxu0 %vm946_vm5, %v5263_v63 }
 0x103   : > { %4162 = vmatprep.mubr.msk.bf16.mxu0 %vm946_vm5, %v5276_v7 }
 0x108   : > { %4003 = vmatmul.mubr.msk.bf16.gmra.mrb[4].mxu1 %vm946_vm5, %v5651_v30 }
 0x109   : > { %4006 = vmatprep.mubr.msk.bf16.mxu1 %vm946_vm5, %v5652_v0 }
 0x10a   : > { %4163 = vmatmul.mubr.msk.bf16.gmra.mrb[28].mxu0 %vm946_vm5, %v2859_v28 }
 0x10b   : > { %4168 = vmatprep.mubr.msk.bf16.mxu0 %vm946_vm5, %v5133_v47  ;;  %v5657_v47 = vld [vmem:[#allocation11_spill] sm:$0xff] }
 0x110   : > { %4007 = vmatmul.mubr.msk.bf16.gmra.mrb[8].mxu1 %vm946_vm5, %v5653_v11 }
 0x111   : > { %4010 = vmatprep.mubr.msk.bf16.mxu1 %vm946_vm5, %v5654_v2 }
 0x112   : > { %4169 = vmatmul.mubr.msk.bf16.vlgmr.msra.gmra.mrb[0].mxu0 %vm946_vm5, %v5157_v53  ;;  %v5659_v53 = vld [vmem:[#allocation13_spill] sm:$0xff] }
 0x113   : > { %4172 = vmatprep.mubr.msk.bf16.mxu0 %vm946_vm5, %v5162_v37  ;;  %v5660_v37 = vld [vmem:[#allocation14_spill] sm:$0xff] }
 0x118   : > { %4011 = vmatmul.mubr.msk.bf16.gmra.mrb[12].mxu1 %vm946_vm5, %v5655_v16 }
 0x119   : > { %4014 = vmatprep.mubr.msk.bf16.mxu1 %vm946_vm5, %v5656_v3 }
 0x11a   : > { %4173 = vmatmul.mubr.msk.bf16.gmra.mrb[4].mxu0 %vm946_vm5, %v5179_v36  ;;  %v5661_v36 = vld [vmem:[#allocation15_spill] sm:$0xff] }
 0x11b   : > { %4176 = vmatprep.mubr.msk.bf16.mxu0 %vm946_vm5, %v5184_v51  ;;  %v5662_v51 = vld [vmem:[#allocation16_spill] sm:$0xff] }
 0x120   : > { %4015 = vmatmul.mubr.msk.bf16.gmra.mrb[16].mxu1 %vm946_vm5, %v5657_v47 }
 0x121   : > { %4018 = vmatprep.mubr.msk.bf16.mxu1 %vm946_vm5, %v5658_v25 }
 0x122   : > { %4177 = vmatmul.mubr.msk.bf16.gmra.mrb[8].mxu0 %vm946_vm5, %v5199_v18  ;;  %v5663_v18 = vld [vmem:[#allocation17_spill] sm:$0xff] }
 0x123   : > { %4180 = vmatprep.mubr.msk.bf16.mxu0 %vm946_vm5, %v5205_v1  ;;  %v2322_v1 = vld [vmem:[#allocation2 + $0x118] sm:$0x1f] }
 0x124   : > { %v3071_v14 = vshrl.u32 %v2322_v1, 16  ;;  %v3074_v33 = vshll.u32 %v2322_v1, 16 }
 0x126   : > { %v3073_v57 = vrot.slane %v3071_v14, 4  ;;  %v3076_v27 = vrot.slane %v3074_v33, 5 }
 0x128   : > { %4019 = vmatmul.mubr.msk.bf16.gmra.mrb[20].mxu1 %vm946_vm5, %v5659_v53  ;;  %v3077_v54 = vor.u32 %v3076_v27, %v3073_v57 }
 0x129   : > { %4022 = vmatprep.mubr.msk.bf16.mxu1 %vm946_vm5, %v5660_v37 }
 0x12a   : > { %4181 = vmatmul.mubr.msk.bf16.gmra.mrb[12].mxu0 %vm946_vm5, %v5224_v6  ;;  %v5664_v6 = vld [vmem:[#allocation19_spill] sm:$0xff] }
 0x12b   : > { %4184 = vmatprep.mubr.msk.bf16.mxu0 %vm946_vm5, %v5229_v60  ;;  %v3063_v60 = vshrl.u32 %v5664_v6, 16 }
 0x130   : > { %4023 = vmatmul.mubr.msk.bf16.gmra.mrb[24].mxu1 %vm946_vm5, %v5661_v36 }
 0x131   : > { %4026 = vmatprep.mubr.msk.bf16.mxu1 %vm946_vm5, %v5662_v51 }
 0x132   : > { %4185 = vmatmul.mubr.msk.bf16.gmra.mrb[16].mxu0 %vm946_vm5, %v5242_v49  ;;  %v3066_v49 = vshll.u32 %v5664_v6, 16 }
 0x133   : > { %4188 = vmatprep.mubr.msk.bf16.mxu0 %vm946_vm5, %v5247_v58  ;;  %v3065_v58 = vrot.slane %v3063_v60, 4 }
 0x134   : > { %v3068_v10 = vrot.slane %v3066_v49, 5 }
 0x136   : > { %v3069_v45 = vor.u32 %v3068_v10, %v3065_v58 }
 0x138   : > { %4027 = vmatmul.mubr.msk.bf16.gmra.mrb[28].mxu1 %vm946_vm5, %v5663_v18  ;;  %v3078_v39 = vsel %vm2323_vm14, %v3069_v45, %v3077_v54 }
 0x139   : > { %4048 = vmatprep.mubr.msk.bf16.mxu1 %vm946_vm5, %v5657_v47 }
 0x13a   : > { %4189 = vmatmul.mubr.msk.bf16.gmra.mrb[20].mxu0 %vm946_vm5, %v5258_v4 }
 0x13b   : > { %4192 = vmatprep.mubr.msk.bf16.mxu0 %vm946_vm5, %v5263_v63 }
 0x140   : > { %4049 = vmatmul.mubr.msk.bf16.vlgmr.msra.gmra.mrb[16].mxu1 %vm946_vm5, %v5658_v25 }
 0x141   : > { %4052 = vmatprep.mubr.msk.bf16.mxu1 %vm946_vm5, %v5659_v53 }
 0x142   : > { %4193 = vmatmul.mubr.msk.bf16.gmra.mrb[24].mxu0 %vm946_vm5, %v5276_v7 }
 0x143   : > { %4196 = vmatprep.mubr.msk.bf16.mxu0 %vm946_vm5, %v2859_v28 }
 0x148   : > { %4053 = vmatmul.mubr.msk.bf16.gmra.mrb[20].mxu1 %vm946_vm5, %v5660_v37 }
 0x149   : > { %4056 = vmatprep.mubr.msk.bf16.mxu1 %vm946_vm5, %v5661_v36 }
 0x14a   : > { %4197 = vmatmul.mubr.msk.bf16.gmra.mrb[28].mxu0 %vm946_vm5, %v3078_v39 }
 0x150   : > { %4057 = vmatmul.mubr.msk.bf16.gmra.mrb[24].mxu1 %vm946_vm5, %v5662_v51 }
 0x151   : > { %4060 = vmatprep.mubr.msk.bf16.mxu1 %vm946_vm5, %v5663_v18 }
 0x158   : > { %4061 = vmatmul.mubr.msk.bf16.gmra.mrb[28].mxu1 %vm946_vm5, %v5665_v22 }
 0x1d3   : > { %v4000_v55 = vpop.f32.mrb[0].mxu1 }
 0x1d4   : > { %v1732_v26 = vpop.f32.mrb[1].mxu1 }
 0x1d5   : > { %v4001_v4 = vpop.f32.mrb[2].mxu1 }
 0x1d6   : > { %v1735_v50 = vpop.f32.mrb[3].mxu1 }
 0x1db   : > { %v4004_v38 = vpop.f32.mrb[4].mxu1 }
 0x1dc   : > { %v1748_v42 = vpop.f32.mrb[5].mxu1 }
 0x1dd   : > { %v4005_v63 = vpop.f32.mrb[6].mxu1 }
 0x1de   : > { %v1751_v23 = vpop.f32.mrb[7].mxu1 }
 0x1e3   : > { %v5424_v15 = vpop.f32.mrb[8].mxu1 }
 0x1e4   : > { %v5426_v29 = vpop.f32.mrb[9].mxu1 }
 0x1e5   : > { %v5428_v7 = vpop.f32.mrb[10].mxu1  ;;  %v4170_v24 = vpop.f32.mrb[0].mxu0 }
 0x1e6   : > { %v5437_v44 = vpop.f32.mrb[11].mxu1  ;;  %v4202_v46 = vadd.f32 %v4170_v24, %v4000_v55  ;;  %v3122_v34 = vpop.f32.mrb[1].mxu0 }
 0x1e7   : > { %v4203_v8 = vadd.f32 %v3122_v34, %v1732_v26  ;;  %v4171_v20 = vpop.f32.mrb[2].mxu0 }
 0x1e8   : > { %3283 = vst.msk [vmem:[%s5435_s28 + $0x10] sm:$0xff] %vm946_vm5, %v4202_v46  ;;  %v4204_v40 = vadd.f32 %v4171_v20, %v4001_v4  ;;  %v3125_v59 = vpop.f32.mrb[3].mxu0  ;;  %v3384_v43 = vmul.f32 %v4202_v46, %v4202_v46  ;;  %v3316_v32 = vsel %vm946_vm5, %v4202_v46, 0.0 }
 0x1e9   : > { %3281 = vst.msk [vmem:[%s5435_s28] sm:$0xff] %vm946_vm5, %v4203_v8  ;;  %v3382_v35 = vmul.f32 %v4203_v8, %v4203_v8  ;;  %v4205_v17 = vadd.f32 %v3125_v59, %v1735_v50  ;;  %v3313_v12 = vsel %vm946_vm5, %v4203_v8, 0.0 }
 0x1ea   : > { %3284 = vst.msk [vmem:[%s5435_s28 + $0x18] sm:$0xff] %vm946_vm5, %v4204_v40  ;;  %v3385_v56 = vmul.f32 %v4204_v40, %v4204_v40  ;;  %v3417_v11 = vsel %vm946_vm5, %v3384_v43, 0.0  ;;  %v3318_v2 = vsel %vm946_vm5, %v4204_v40, 0.0 }
 0x1eb   : > { %v5445_v5 = vpop.f32.mrb[12].mxu1  ;;  %3282 = vst.msk [vmem:[%s5435_s28 + $0x8] sm:$0xff] %vm946_vm5, %v4205_v17  ;;  %v3314_v41 = vsel %vm946_vm5, %v4205_v17, 0.0  ;;  %v3383_v62 = vmul.f32 %v4205_v17, %v4205_v17  ;;  %v3414_v48 = vsel %vm946_vm5, %v3382_v35, 0.0 }
 0x1ec   : > { %v5451_v61 = vpop.f32.mrb[13].mxu1  ;;  %v3315_v19 = vadd.f32 %v3314_v41, %v3313_v12  ;;  %v3419_v47 = vsel %vm946_vm5, %v3385_v56, 0.0 }
 0x1ed   : > { %v5453_v9 = vpop.f32.mrb[14].mxu1  ;;  %v3415_v21 = vsel %vm946_vm5, %v3383_v62, 0.0  ;;  %v4174_v13 = vpop.f32.mrb[4].mxu0 }
 0x1ee   : > { %v5458_v52 = vpop.f32.mrb[15].mxu1  ;;  %v3317_v31 = vadd.f32 %v3316_v32, %v3315_v19  ;;  %v3416_v28 = vadd.f32 %v3415_v21, %v3414_v48  ;;  %v4206_v30 = vadd.f32 %v4174_v13, %v4004_v38  ;;  %v3138_v0 = vpop.f32.mrb[5].mxu0 }
 0x1ef   : > { %v4207_v16 = vadd.f32 %v3138_v0, %v1748_v42  ;;  %v4175_v3 = vpop.f32.mrb[6].mxu0 }
 0x1f0   : > { %v3418_v25 = vadd.f32 %v3417_v11, %v3416_v28  ;;  %3287 = vst.msk [vmem:[%s5435_s28 + $0x30] sm:$0xff] %vm946_vm5, %v4206_v30  ;;  %v3319_v53 = vadd.f32 %v3318_v2, %v3317_v31  ;;  %v3141_v37 = vpop.f32.mrb[7].mxu0  ;;  %v4208_v18 = vadd.f32 %v4175_v3, %v4005_v63  ;;  %v3388_v33 = vmul.f32 %v4206_v30, %v4206_v30 }
 0x1f1   : > { %3285 = vst.msk [vmem:[%s5435_s28 + $0x20] sm:$0xff] %vm946_vm5, %v4207_v16  ;;  %v3320_v36 = vsel %vm946_vm5, %v4207_v16, 0.0  ;;  %v3386_v51 = vmul.f32 %v4207_v16, %v4207_v16  ;;  %v4209_v1 = vadd.f32 %v3141_v37, %v1751_v23  ;;  %v3324_v27 = vsel %vm946_vm5, %v4206_v30, 0.0 }
 0x1f2   : > { %v3321_v6 = vadd.f32 %v3320_v36, %v3319_v53  ;;  %v3420_v60 = vadd.f32 %v3419_v47, %v3418_v25  ;;  %3288 = vst.msk [vmem:[%s5435_s28 + $0x38] sm:$0xff] %vm946_vm5, %v4208_v18  ;;  %v3389_v54 = vmul.f32 %v4208_v18, %v4208_v18  ;;  %v3326_v4 = vsel %vm946_vm5, %v4208_v18, 0.0 }
 0x1f3   : > { %v3421_v49 = vsel %vm946_vm5, %v3386_v51, 0.0  ;;  %3286 = vst.msk [vmem:[%s5435_s28 + $0x28] sm:$0xff] %vm946_vm5, %v4209_v1  ;;  %v3322_v14 = vsel %vm946_vm5, %v4209_v1, 0.0  ;;  %v3387_v57 = vmul.f32 %v4209_v1, %v4209_v1  ;;  %v3425_v63 = vsel %vm946_vm5, %v3388_v33, 0.0 }
 0x1f4   : > { %v3422_v58 = vadd.f32 %v3421_v49, %v3420_v60  ;;  %v3323_v10 = vadd.f32 %v3322_v14, %v3321_v6 }
 0x1f5   : > { %v4178_v45 = vpop.f32.mrb[8].mxu0  ;;  %v3423_v22 = vsel %vm946_vm5, %v3387_v57, 0.0 }
 0x1f6   : > { %v3325_v39 = vadd.f32 %v3324_v27, %v3323_v10  ;;  %v4210_v55 = vadd.f32 %v4178_v45, %v5424_v15  ;;  %v3154_v26 = vpop.f32.mrb[9].mxu0  ;;  %v3424_v50 = vadd.f32 %v3423_v22, %v3422_v58 }
 0x1f7   : > { %v4211_v38 = vadd.f32 %v3154_v26, %v5426_v29  ;;  %v4179_v42 = vpop.f32.mrb[10].mxu0  ;;  %v3427_v29 = vsel %vm946_vm5, %v3389_v54, 0.0 }
 0x1f8   : > { %3291 = vst.msk [vmem:[%s5435_s28 + $0x50] sm:$0xff] %vm946_vm5, %v4210_v55  ;;  %v3327_v23 = vadd.f32 %v3326_v4, %v3325_v39  ;;  %v4212_v24 = vadd.f32 %v4179_v42, %v5428_v7  ;;  %v3157_v46 = vpop.f32.mrb[11].mxu0  ;;  %v3426_v34 = vadd.f32 %v3425_v63, %v3424_v50  ;;  %v3392_v43 = vmul.f32 %v4210_v55, %v4210_v55 }
 0x1f9   : > { %3289 = vst.msk [vmem:[%s5435_s28 + $0x40] sm:$0xff] %vm946_vm5, %v4211_v38  ;;  %v3328_v15 = vsel %vm946_vm5, %v4211_v38, 0.0  ;;  %v3390_v8 = vmul.f32 %v4211_v38, %v4211_v38  ;;  %v4213_v20 = vadd.f32 %v3157_v46, %v5437_v44  ;;  %v3332_v41 = vsel %vm946_vm5, %v4210_v55, 0.0 }
 0x1fa   : > { %v3329_v40 = vadd.f32 %v3328_v15, %v3327_v23  ;;  %3292 = vst.msk [vmem:[%s5435_s28 + $0x58] sm:$0xff] %vm946_vm5, %v4212_v24  ;;  %v3428_v59 = vadd.f32 %v3427_v29, %v3426_v34  ;;  %v3393_v19 = vmul.f32 %v4212_v24, %v4212_v24  ;;  %v3334_v13 = vsel %vm946_vm5, %v4212_v24, 0.0 }
 0x1fb   : > { %v3429_v35 = vsel %vm946_vm5, %v3390_v8, 0.0  ;;  %3290 = vst.msk [vmem:[%s5435_s28 + $0x48] sm:$0xff] %vm946_vm5, %v4213_v20  ;;  %v3330_v7 = vsel %vm946_vm5, %v4213_v20, 0.0  ;;  %v3391_v17 = vmul.f32 %v4213_v20, %v4213_v20  ;;  %v3433_v0 = vsel %vm946_vm5, %v3392_v43, 0.0 }
 0x1fc   : > { %v3331_v12 = vadd.f32 %v3330_v7, %v3329_v40  ;;  %v3430_v62 = vadd.f32 %v3429_v35, %v3428_v59 }
 0x1fd   : > { %v3431_v44 = vsel %vm946_vm5, %v3391_v17, 0.0  ;;  %v4182_v56 = vpop.f32.mrb[12].mxu0 }
 0x1fe   : > { %v3333_v32 = vadd.f32 %v3332_v41, %v3331_v12  ;;  %v4214_v48 = vadd.f32 %v4182_v56, %v5445_v5  ;;  %v3170_v21 = vpop.f32.mrb[13].mxu0  ;;  %v3432_v31 = vadd.f32 %v3431_v44, %v3430_v62 }
 0x1ff   : > { %v4215_v28 = vadd.f32 %v3170_v21, %v5451_v61  ;;  %v4183_v30 = vpop.f32.mrb[14].mxu0  ;;  %v3435_v61 = vsel %vm946_vm5, %v3393_v19, 0.0 }
 0x200   : > { %3295 = vst.msk [vmem:[%s5435_s28 + $0x70] sm:$0xff] %vm946_vm5, %v4214_v48  ;;  %v3335_v11 = vadd.f32 %v3334_v13, %v3333_v32  ;;  %v4216_v2 = vadd.f32 %v4183_v30, %v5453_v9  ;;  %v3173_v16 = vpop.f32.mrb[15].mxu0  ;;  %v3434_v3 = vadd.f32 %v3433_v0, %v3432_v31  ;;  %v3396_v18 = vmul.f32 %v4214_v48, %v4214_v48 }
 0x201   : > { %3293 = vst.msk [vmem:[%s5435_s28 + $0x60] sm:$0xff] %vm946_vm5, %v4215_v28  ;;  %v3336_v5 = vsel %vm946_vm5, %v4215_v28, 0.0  ;;  %v3394_v47 = vmul.f32 %v4215_v28, %v4215_v28  ;;  %v4217_v25 = vadd.f32 %v3173_v16, %v5458_v52  ;;  %v3340_v6 = vsel %vm946_vm5, %v4214_v48, 0.0 }
 0x202   : > { %v3337_v53 = vadd.f32 %v3336_v5, %v3335_v11  ;;  %3296 = vst.msk [vmem:[%s5435_s28 + $0x78] sm:$0xff] %vm946_vm5, %v4216_v2  ;;  %v3436_v37 = vadd.f32 %v3435_v61, %v3434_v3  ;;  %v3397_v14 = vmul.f32 %v4216_v2, %v4216_v2  ;;  %v3342_v10 = vsel %vm946_vm5, %v4216_v2, 0.0 }
 0x203   : > { %v3437_v36 = vsel %vm946_vm5, %v3394_v47, 0.0  ;;  %3294 = vst.msk [vmem:[%s5435_s28 + $0x68] sm:$0xff] %vm946_vm5, %v4217_v25  ;;  %v3338_v9 = vsel %vm946_vm5, %v4217_v25, 0.0  ;;  %v3395_v51 = vmul.f32 %v4217_v25, %v4217_v25  ;;  %v3441_v45 = vsel %vm946_vm5, %v3396_v18, 0.0 }
 0x204   : > { %v3339_v1 = vadd.f32 %v3338_v9, %v3337_v53  ;;  %v3438_v60 = vadd.f32 %v3437_v36, %v3436_v37  ;;  %v3443_v55 = vsel %vm946_vm5, %v3397_v14, 0.0 }
 0x205   : > { %v3439_v52 = vsel %vm946_vm5, %v3395_v51, 0.0  ;;  %v4186_v49 = vpop.f32.mrb[16].mxu0 }
 0x206   : > { %v3341_v33 = vadd.f32 %v3340_v6, %v3339_v1  ;;  %v3186_v58 = vpop.f32.mrb[17].mxu0  ;;  %v3440_v57 = vadd.f32 %v3439_v52, %v3438_v60 }
 0x207   : > { %v4187_v27 = vpop.f32.mrb[18].mxu0 }
 0x208   : > { %v3189_v54 = vpop.f32.mrb[19].mxu0  ;;  %v3343_v39 = vadd.f32 %v3342_v10, %v3341_v33  ;;  %v3442_v22 = vadd.f32 %v3441_v45, %v3440_v57 }
 0x20a   : > { %v3444_v26 = vadd.f32 %v3443_v55, %v3442_v22 }
 0x20d   : > { %v4190_v4 = vpop.f32.mrb[20].mxu0 }
 0x20e   : > { %v3202_v50 = vpop.f32.mrb[21].mxu0 }
 0x20f   : > { %v4191_v38 = vpop.f32.mrb[22].mxu0 }
 0x210   : > { %v3205_v42 = vpop.f32.mrb[23].mxu0 }
 0x213   : > { %v4050_v63 = vpop.f32.mrb[16].mxu1 }
 0x214   : > { %v4218_v23 = vadd.f32 %v4186_v49, %v4050_v63  ;;  %v2003_v24 = vpop.f32.mrb[17].mxu1 }
 0x215   : > { %v4219_v46 = vadd.f32 %v3186_v58, %v2003_v24  ;;  %v4051_v34 = vpop.f32.mrb[18].mxu1  ;;  %v4194_v15 = vpop.f32.mrb[24].mxu0 }
 0x216   : > { %3299 = vst.msk [vmem:[%s5435_s28 + $0x90] sm:$0xff] %vm946_vm5, %v4218_v23  ;;  %v4220_v8 = vadd.f32 %v4187_v27, %v4051_v34  ;;  %v2006_v20 = vpop.f32.mrb[19].mxu1  ;;  %v3218_v29 = vpop.f32.mrb[25].mxu0  ;;  %v3400_v12 = vmul.f32 %v4218_v23, %v4218_v23  ;;  %v3348_v48 = vsel %vm946_vm5, %v4218_v23, 0.0 }
 0x217   : > { %3297 = vst.msk [vmem:[%s5435_s28 + $0x80] sm:$0xff] %vm946_vm5, %v4219_v46  ;;  %v3344_v40 = vsel %vm946_vm5, %v4219_v46, 0.0  ;;  %v3398_v59 = vmul.f32 %v4219_v46, %v4219_v46  ;;  %v4221_v35 = vadd.f32 %v3189_v54, %v2006_v20  ;;  %v4195_v7 = vpop.f32.mrb[26].mxu0 }
 0x218   : > { %v3345_v17 = vadd.f32 %v3344_v40, %v3343_v39  ;;  %3300 = vst.msk [vmem:[%s5435_s28 + $0x98] sm:$0xff] %vm946_vm5, %v4220_v8  ;;  %v5526_v43 = vpop.f32.mrb[27].mxu0  ;;  %v3401_v19 = vmul.f32 %v4220_v8, %v4220_v8  ;;  %v3449_v11 = vsel %vm946_vm5, %v3400_v12, 0.0  ;;  %v3350_v2 = vsel %vm946_vm5, %v4220_v8, 0.0 }
 0x219   : > { %v3445_v41 = vsel %vm946_vm5, %v3398_v59, 0.0  ;;  %3298 = vst.msk [vmem:[%s5435_s28 + $0x88] sm:$0xff] %vm946_vm5, %v4221_v35  ;;  %v3346_v62 = vsel %vm946_vm5, %v4221_v35, 0.0  ;;  %v3399_v44 = vmul.f32 %v4221_v35, %v4221_v35 }
 0x21a   : > { %v3446_v56 = vadd.f32 %v3445_v41, %v3444_v26  ;;  %v3347_v32 = vadd.f32 %v3346_v62, %v3345_v17  ;;  %v3451_v47 = vsel %vm946_vm5, %v3401_v19, 0.0 }
 0x21b   : > { %v3447_v21 = vsel %vm946_vm5, %v3399_v44, 0.0  ;;  %v4054_v13 = vpop.f32.mrb[20].mxu1 }
 0x21c   : > { %v3349_v31 = vadd.f32 %v3348_v48, %v3347_v32  ;;  %v3448_v28 = vadd.f32 %v3447_v21, %v3446_v56  ;;  %v4222_v30 = vadd.f32 %v4190_v4, %v4054_v13  ;;  %v2019_v0 = vpop.f32.mrb[21].mxu1 }
 0x21d   : > { %v4223_v16 = vadd.f32 %v3202_v50, %v2019_v0  ;;  %v4055_v3 = vpop.f32.mrb[22].mxu1  ;;  %v4198_v5 = vpop.f32.mrb[28].mxu0 }
 0x21e   : > { %v3450_v25 = vadd.f32 %v3449_v11, %v3448_v28  ;;  %3303 = vst.msk [vmem:[%s5435_s28 + $0xb0] sm:$0xff] %vm946_vm5, %v4222_v30  ;;  %v3351_v61 = vadd.f32 %v3350_v2, %v3349_v31  ;;  %v2022_v53 = vpop.f32.mrb[23].mxu1  ;;  %v3234_v37 = vpop.f32.mrb[29].mxu0  ;;  %v4224_v51 = vadd.f32 %v4191_v38, %v4055_v3  ;;  %v3404_v33 = vmul.f32 %v4222_v30, %v4222_v30 }
 0x21f   : > { %3301 = vst.msk [vmem:[%s5435_s28 + $0xa0] sm:$0xff] %vm946_vm5, %v4223_v16  ;;  %v3352_v36 = vsel %vm946_vm5, %v4223_v16, 0.0  ;;  %v3402_v9 = vmul.f32 %v4223_v16, %v4223_v16  ;;  %v4225_v18 = vadd.f32 %v3205_v42, %v2022_v53  ;;  %v4199_v1 = vpop.f32.mrb[30].mxu0  ;;  %v3356_v27 = vsel %vm946_vm5, %v4222_v30, 0.0 }
 0x220   : > { %v3353_v6 = vadd.f32 %v3352_v36, %v3351_v61  ;;  %v3452_v60 = vadd.f32 %v3451_v47, %v3450_v25  ;;  %v3237_v52 = vpop.f32.mrb[31].mxu0  ;;  %3304 = vst.msk [vmem:[%s5435_s28 + $0xb8] sm:$0xff] %vm946_vm5, %v4224_v51  ;;  %v3405_v54 = vmul.f32 %v4224_v51, %v4224_v51  ;;  %v3358_v4 = vsel %vm946_vm5, %v4224_v51, 0.0 }
 0x221   : > { %v3453_v49 = vsel %vm946_vm5, %v3402_v9, 0.0  ;;  %3302 = vst.msk [vmem:[%s5435_s28 + $0xa8] sm:$0xff] %vm946_vm5, %v4225_v18  ;;  %v3354_v14 = vsel %vm946_vm5, %v4225_v18, 0.0  ;;  %v3403_v57 = vmul.f32 %v4225_v18, %v4225_v18  ;;  %v3457_v63 = vsel %vm946_vm5, %v3404_v33, 0.0 }
 0x222   : > { %v3454_v58 = vadd.f32 %v3453_v49, %v3452_v60  ;;  %v3355_v10 = vadd.f32 %v3354_v14, %v3353_v6  ;;  %v3459_v40 = vsel %vm946_vm5, %v3405_v54, 0.0 }
 0x223   : > { %v4058_v45 = vpop.f32.mrb[24].mxu1  ;;  %v3455_v22 = vsel %vm946_vm5, %v3403_v57, 0.0 }
 0x224   : > { %v3357_v39 = vadd.f32 %v3356_v27, %v3355_v10  ;;  %v4226_v55 = vadd.f32 %v4194_v15, %v4058_v45  ;;  %v2035_v26 = vpop.f32.mrb[25].mxu1  ;;  %v3456_v50 = vadd.f32 %v3455_v22, %v3454_v58 }
 0x225   : > { %v4227_v38 = vadd.f32 %v3218_v29, %v2035_v26  ;;  %v4059_v42 = vpop.f32.mrb[26].mxu1 }
 0x226   : > { %3307 = vst.msk [vmem:[%s5435_s28 + $0xd0] sm:$0xff] %vm946_vm5, %v4226_v55  ;;  %v3359_v23 = vadd.f32 %v3358_v4, %v3357_v39  ;;  %v4228_v24 = vadd.f32 %v4195_v7, %v4059_v42  ;;  %v2038_v46 = vpop.f32.mrb[27].mxu1  ;;  %v3458_v34 = vadd.f32 %v3457_v63, %v3456_v50  ;;  %v3408_v12 = vmul.f32 %v4226_v55, %v4226_v55 }
 0x227   : > { %3305 = vst.msk [vmem:[%s5435_s28 + $0xc0] sm:$0xff] %vm946_vm5, %v4227_v38  ;;  %v3360_v15 = vsel %vm946_vm5, %v4227_v38, 0.0  ;;  %v3406_v8 = vmul.f32 %v4227_v38, %v4227_v38  ;;  %v4229_v20 = vadd.f32 %v5526_v43, %v2038_v46  ;;  %v3364_v62 = vsel %vm946_vm5, %v4226_v55, 0.0 }
 0x228   : > { %v3361_v29 = vadd.f32 %v3360_v15, %v3359_v23  ;;  %3308 = vst.msk [vmem:[%s5435_s28 + $0xd8] sm:$0xff] %vm946_vm5, %v4228_v24  ;;  %v3460_v59 = vadd.f32 %v3459_v40, %v3458_v34  ;;  %v3409_v19 = vmul.f32 %v4228_v24, %v4228_v24  ;;  %v3366_v13 = vsel %vm946_vm5, %v4228_v24, 0.0 }
 0x229   : > { %v3461_v35 = vsel %vm946_vm5, %v3406_v8, 0.0  ;;  %3306 = vst.msk [vmem:[%s5435_s28 + $0xc8] sm:$0xff] %vm946_vm5, %v4229_v20  ;;  %v3362_v7 = vsel %vm946_vm5, %v4229_v20, 0.0  ;;  %v3407_v17 = vmul.f32 %v4229_v20, %v4229_v20  ;;  %v3465_v0 = vsel %vm946_vm5, %v3408_v12, 0.0 }
 0x22a   : > { %v3363_v41 = vadd.f32 %v3362_v7, %v3361_v29  ;;  %v3462_v44 = vadd.f32 %v3461_v35, %v3460_v59  ;;  %v3467_v61 = vsel %vm946_vm5, %v3409_v19, 0.0 }
 0x22b   : > { %v3463_v43 = vsel %vm946_vm5, %v3407_v17, 0.0  ;;  %v4062_v56 = vpop.f32.mrb[28].mxu1 }
 0x22c   : > { %v3365_v32 = vadd.f32 %v3364_v62, %v3363_v41  ;;  %v4230_v48 = vadd.f32 %v4198_v5, %v4062_v56  ;;  %v2051_v21 = vpop.f32.mrb[29].mxu1  ;;  %v3464_v31 = vadd.f32 %v3463_v43, %v3462_v44 }
 0x22d   : > { %v4231_v28 = vadd.f32 %v3234_v37, %v2051_v21  ;;  %v4063_v30 = vpop.f32.mrb[30].mxu1 }
 0x22e   : > { %3311 = vst.msk [vmem:[%s5435_s28 + $0xf0] sm:$0xff] %vm946_vm5, %v4230_v48  ;;  %v3367_v11 = vadd.f32 %v3366_v13, %v3365_v32  ;;  %v4232_v2 = vadd.f32 %v4199_v1, %v4063_v30  ;;  %v2054_v16 = vpop.f32.mrb[31].mxu1  ;;  %v3466_v3 = vadd.f32 %v3465_v0, %v3464_v31  ;;  %v3412_v18 = vmul.f32 %v4230_v48, %v4230_v48 }
 0x22f   : > { %3309 = vst.msk [vmem:[%s5435_s28 + $0xe0] sm:$0xff] %vm946_vm5, %v4231_v28  ;;  %v3368_v5 = vsel %vm946_vm5, %v4231_v28, 0.0  ;;  %v3410_v47 = vmul.f32 %v4231_v28, %v4231_v28  ;;  %v4233_v25 = vadd.f32 %v3237_v52, %v2054_v16  ;;  %v3372_v6 = vsel %vm946_vm5, %v4230_v48, 0.0 }
 0x230   : > { %v3369_v53 = vadd.f32 %v3368_v5, %v3367_v11  ;;  %3312 = vst.msk [vmem:[%s5435_s28 + $0xf8] sm:$0xff] %vm946_vm5, %v4232_v2  ;;  %v3468_v37 = vadd.f32 %v3467_v61, %v3466_v3  ;;  %v3413_v49 = vmul.f32 %v4232_v2, %v4232_v2  ;;  %v3374_v33 = vsel %vm946_vm5, %v4232_v2, 0.0 }
 0x231   : > { %v3469_v36 = vsel %vm946_vm5, %v3410_v47, 0.0  ;;  %3310 = vst.msk [vmem:[%s5435_s28 + $0xe8] sm:$0xff] %vm946_vm5, %v4233_v25  ;;  %v3370_v9 = vsel %vm946_vm5, %v4233_v25, 0.0  ;;  %v3411_v51 = vmul.f32 %v4233_v25, %v4233_v25  ;;  %v3473_v10 = vsel %vm946_vm5, %v3412_v18, 0.0 }
 0x232   : > { %v3371_v1 = vadd.f32 %v3370_v9, %v3369_v53  ;;  %v3470_v60 = vadd.f32 %v3469_v36, %v3468_v37  ;;  %v3475_v45 = vsel %vm946_vm5, %v3413_v49, 0.0 }
 0x233   : > { %v3471_v52 = vsel %vm946_vm5, %v3411_v51, 0.0 }
 0x234   : > { %v3373_v14 = vadd.f32 %v3372_v6, %v3371_v1  ;;  %v3472_v58 = vadd.f32 %v3471_v52, %v3470_v60 }
 0x236   : > { %v3375_v57 = vadd.f32 %v3374_v33, %v3373_v14  ;;  %v3474_v27 = vadd.f32 %v3473_v10, %v3472_v58 }
 0x238   : > { %v3376_v54 = vrot.slane %v3375_v57, 4  ;;  %v3476_v39 = vadd.f32 %v3475_v45, %v3474_v27 }
 0x23a   : > { %v3377_v22 = vadd.f32 %v3376_v54, %v3375_v57  ;;  %v3477_v55 = vrot.slane %v3476_v39, 4 }
 0x23c   : > { %v3378_v26 = vrot.slane %v3377_v22, 2  ;;  %v3478_v4 = vadd.f32 %v3477_v55, %v3476_v39 }
 0x23e   : > { %v3379_v50 = vadd.f32 %v3378_v26, %v3377_v22  ;;  %v3479_v38 = vrot.slane %v3478_v4, 2 }
 0x240   : > { %v3380_v42 = vrot.slane %v3379_v50, 1  ;;  %v3480_v63 = vadd.f32 %v3479_v38, %v3478_v4 }
 0x242   : > { %v3381_v23 = vadd.f32 %v3380_v42, %v3379_v50  ;;  %v3481_v24 = vrot.slane %v3480_v63, 1 }
 0x244   : > { %3484 = vst.msk [vmem:[%s235_s6] sm:$0x1] %vm3483_vm15, %v3381_v23  ;;  %v3482_v46 = vadd.f32 %v3481_v24, %v3480_v63 }
 0x246   : > { %3485 = vst.msk [vmem:[%s235_s6 + $0x1] sm:$0x1] %vm3483_vm15, %v3482_v46 }
 0x247 PF: > { %s16_s18 = sadd.s32 1, %s4487_s18  }
 0x248   : > { %p13_p4 = scmp.ge.s32.totalorder %s16_s18, 4  }
 0x24a   :  { %15 = sbr.rel (!%p13_p4) target bundleno = 1 (0x1), region = 80 }

// kernel: residual_block.3
= control target key start
LH: loop header
LB: loop body
LE: loop exit
PB: predicated region body
PF: predicated region fallthrough
CT: control target
= control target key end

     0   :  { %s4402_s18 = smov 0   ;;  %s5405_s0 = inlined_call_operand.vmem [shape: f32[2,16,16,16], index: 0, kind: input, shape index: {}]   ;;  %s5406_s1 = inlined_call_operand.vmem [shape: f32[1,16], index: 1, kind: input, shape index: {}]   ;;  %s5407_s2 = inlined_call_operand.vmem [shape: f32[1,16], index: 2, kind: input, shape index: {}]   ;;  %s5408_s3 = inlined_call_operand.vmem [shape: bf16[9,16,16], index: 3, kind: input, shape index: {}]   ;;  %s5409_s4 = inlined_call_operand.vmem [shape: f32[2,16,16,16], index: 4, kind: output, shape index: {0}]   ;;  %s5410_s5 = inlined_call_operand.vmem [shape: f32[2,2,16], index: 5, kind: output, shape index: {1}]  }
   0x1 LB: > { %s3462_s1 = sadd.s32 4294967295, %s4370_s18   ;;  %p3466_p0 = scmp.ge.s32.totalorder %s4370_s18, 1  ;;  %s4370_s18 = sphi %s4402_s18, %s16_s18  }
   0x2   : > { %p190_p1 = scmp.lt.s32.totalorder %s4370_s18, 3 }
   0x4   : > { %p191_p2 = pnand %p3466_p0, %p190_p1 }
   0x6   : > { %194 = sbr.rel (%p191_p2) target bundleno = 578 (0x242), region = 36 }
   0xd   : > { %v4354_v0 = vld [vmem:[%s5408_s3 + $0x20] sm:$0xff]   ;;  %p222_p3 = scmp.lt.s32.totalorder %s3462_s1, 1  ;;  %v4355_v1 = vld [vmem:[%s5408_s3 + $0x18] sm:$0xff]   ;;  %vm286_vm0 = vsmask.f32 7950  ;;  %vm305_vm1 = vcmask 125955  }
   0xe   : > { %3918 = vmatprep.subr.bf16.mxu0 %v4354_v0  ;;  %3782 = vmatprep.subr.bf16.mxu1 %v4355_v1  ;;  %v307_v2 = vld [vmem:[#allocation2 + $0x10] sm:$0x8]  ;;  %v4421_v3 = vld [vmem:[%s5408_s3] sm:$0xff]   ;;  %vm4425_vm2 = vmand %vm305_vm1, %vm286_vm0  ;;  %vm453_vm3 = vcmask 130052   ;;  %vm455_vm4 = vcmask 125952   ;;  %vm836_vm5 = vcmask 130048  }
   0xf   : > { %s5478_s1 = smov (!%p222_p3, %s3462_s1), 1  ;;  %3919 = vmatpush3.bf16.msra.mxu0 %v4354_v0  ;;  %3783 = vmatpush3.bf16.msra.mxu1 %v4355_v1  ;;  %v308_v5 = vsel %vm4425_vm2, 0, %v307_v2  ;;  %v4442_v6 = vld [vmem:[%s5408_s3 + $0x38] sm:$0xff]   ;;  %v310_v12 = vld [vmem:[#allocation2 + $0x20] sm:$0x8]  ;;  %vm1485_vm6 = vcmask 1043456  }
  0x10   : > { %s3627_s24 = sshll.u32 %s5478_s1, 8  ;;  %3816 = vmatprep.subr.bf16.mxu1 %v4421_v3  ;;  %309 = vst [vmem:[#allocation2 + $0x10] sm:$0x8] %v308_v5  ;;  %3952 = vmatprep.subr.bf16.mxu0 %v4442_v6  ;;  %v311_v15 = vsel %vm4425_vm2, 0, %v310_v12  ;;  %v313_v22 = vld [vmem:[#allocation2 + $0x30] sm:$0x8] }
  0x11   : > { %s4434_s27 = scalar_lea.vmem %s5405_s0, %s3627_s24  ;;  %312 = vst [vmem:[#allocation2 + $0x20] sm:$0x8] %v311_v15  ;;  %v316_v23 = vld [vmem:[#allocation2 + $0x40] sm:$0x8]  ;;  %v314_v26 = vsel %vm4425_vm2, 0, %v313_v22  ;;  %vm285_vm8 = vcmask 130051   ;;  %s5252_s19 = scalar_lea.vmem %s5409_s4, %s3627_s24 }
  0x12   : > { %v237_v7 = vld [vmem:[%s4434_s27] sm:$0xff]  ;;  %v238_v8 = vld [vmem:[%s4434_s27 + $0x8] sm:$0xff]  ;;  %v239_v9 = vld [vmem:[%s4434_s27 + $0x10] sm:$0xff]  ;;  %v317_v27 = vsel %vm4425_vm2, 0, %v316_v23  ;;  %315 = vst [vmem:[#allocation2 + $0x30] sm:$0x8] %v314_v26 }
  0x13   : > { %v269_v10 = vpack.c.bf16 %v238_v8, %v237_v7  ;;  %v240_v11 = vld [vmem:[%s4434_s27 + $0x18] sm:$0xff]  ;;  %v241_v13 = vld [vmem:[%s4434_s27 + $0x20] sm:$0xff]  ;;  %v242_v16 = vld [vmem:[%s4434_s27 + $0x28] sm:$0xff]  ;;  %318 = vst [vmem:[#allocation2 + $0x40] sm:$0x8] %v317_v27  ;;  %vm291_vm9 = vcmask 126976  }
  0x14   : > { %v270_v14 = vpack.c.bf16 %v240_v11, %v239_v9  ;;  %v243_v17 = vld [vmem:[%s4434_s27 + $0x30] sm:$0xff]  ;;  %v244_v18 = vld [vmem:[%s4434_s27 + $0x38] sm:$0xff]  ;;  %v271_v20 = vpack.c.bf16 %v242_v16, %v241_v13  ;;  %v245_v24 = vld [vmem:[%s4434_s27 + $0x40] sm:$0xff]  ;;  %vm292_vm7 = vsmask.f32 4352  ;;  %vm355_vm10 = vcmask 126980  }
  0x15   : > { %v421_v19 = vrot.slane %v269_v10, 4  ;;  %v272_v21 = vpack.c.bf16 %v244_v18, %v243_v17  ;;  %v246_v28 = vld [vmem:[%s4434_s27 + $0x48] sm:$0xff]  ;;  %v247_v29 = vld [vmem:[%s4434_s27 + $0x50] sm:$0xff]  ;;  %v248_v30 = vld [vmem:[%s4434_s27 + $0x58] sm:$0xff]  ;;  %vm2213_vm14 = vsmask.f32 3328 }
  0x16   : > { %v422_v25 = vrot.slane %v270_v14, 4  ;;  %v423_v31 = vrot.slane %v271_v20, 4  ;;  %v273_v33 = vpack.c.bf16 %v246_v28, %v245_v24  ;;  %v274_v34 = vpack.c.bf16 %v248_v30, %v247_v29  ;;  %v319_v35 = vld [vmem:[#allocation2 + $0x50] sm:$0x8]  ;;  %v322_v36 = vld [vmem:[#allocation2 + $0x60] sm:$0x8]  ;;  %vm4664_vm11 = vmand %vm285_vm8, %vm286_vm0 }
  0x17   : > { %454 = vst.msk [vmem:[#allocation2 + $0x10] sm:$0xf0] %vm453_vm3, %v421_v19  ;;  %v424_v32 = vrot.slane %v272_v21, 4  ;;  %v320_v37 = vsel %vm4425_vm2, 0, %v319_v35  ;;  %v323_v38 = vsel %vm4425_vm2, 0, %v322_v36  ;;  %v249_v39 = vld [vmem:[%s4434_s27 + $0x60] sm:$0xff]  ;;  %vm4685_vm12 = vmand %vm291_vm9, %vm292_vm7 }
  0x18   : > { %456 = vst.msk [vmem:[#allocation2 + $0x18] sm:$0xf] %vm455_vm4, %v421_v19  ;;  %458 = vst.msk [vmem:[#allocation2 + $0x28] sm:$0xf] %vm455_vm4, %v422_v25  ;;  %v250_v40 = vld [vmem:[%s4434_s27 + $0x68] sm:$0xff]  ;;  %v251_v41 = vld [vmem:[%s4434_s27 + $0x70] sm:$0xff] }
  0x19   : > { %457 = vst.msk [vmem:[#allocation2 + $0x20] sm:$0xf0] %vm453_vm3, %v422_v25  ;;  %459 = vst.msk [vmem:[#allocation2 + $0x30] sm:$0xf0] %vm453_vm3, %v423_v31  ;;  %v425_v42 = vrot.slane %v273_v33, 4  ;;  %v426_v43 = vrot.slane %v274_v34, 4  ;;  %v275_v44 = vpack.c.bf16 %v250_v40, %v249_v39 }
  0x1a   : > { %460 = vst.msk [vmem:[#allocation2 + $0x38] sm:$0xf] %vm455_vm4, %v423_v31  ;;  %462 = vst.msk [vmem:[#allocation2 + $0x48] sm:$0xf] %vm455_vm4, %v424_v32  ;;  %v252_v45 = vld [vmem:[%s4434_s27 + $0x78] sm:$0xff]  ;;  %v253_v47 = vld [vmem:[%s4434_s27 + $0x80] sm:$0xff] }
  0x1b   : > { %461 = vst.msk [vmem:[#allocation2 + $0x40] sm:$0xf0] %vm453_vm3, %v424_v32  ;;  %321 = vst [vmem:[#allocation2 + $0x50] sm:$0x8] %v320_v37  ;;  %v325_v46 = vld [vmem:[#allocation2 + $0x70] sm:$0x8]  ;;  %v276_v48 = vpack.c.bf16 %v252_v45, %v251_v41 }
  0x1c   : > { %324 = vst [vmem:[#allocation2 + $0x60] sm:$0x8] %v323_v38  ;;  %v326_v49 = vsel %vm4425_vm2, 0, %v325_v46  ;;  %v328_v50 = vld [vmem:[#allocation2 + $0x80] sm:$0x8]  ;;  %v254_v51 = vld [vmem:[%s4434_s27 + $0x88] sm:$0xff]  ;;  %vm4694_vm13 = vmand %vm355_vm10, %vm292_vm7 }
  0x1d   : > { %v331_v52 = vld [vmem:[#allocation2 + $0x90] sm:$0x8]  ;;  %463 = vst.msk [vmem:[#allocation2 + $0x50] sm:$0xf0] %vm453_vm3, %v425_v42  ;;  %465 = vst.msk [vmem:[#allocation2 + $0x60] sm:$0xf0] %vm453_vm3, %v426_v43  ;;  %v277_v55 = vpack.c.bf16 %v254_v51, %v253_v47 }
  0x1e   : > { %464 = vst.msk [vmem:[#allocation2 + $0x58] sm:$0xf] %vm455_vm4, %v425_v42  ;;  %466 = vst.msk [vmem:[#allocation2 + $0x68] sm:$0xf] %vm455_vm4, %v426_v43  ;;  %v427_v53 = vrot.slane %v275_v44, 4  ;;  %v329_v54 = vsel %vm4425_vm2, 0, %v328_v50 }
  0x1f   : > { %327 = vst [vmem:[#allocation2 + $0x70] sm:$0x8] %v326_v49  ;;  %v332_v56 = vsel %vm4425_vm2, 0, %v331_v52  ;;  %v428_v57 = vrot.slane %v276_v48, 4  ;;  %330 = vst [vmem:[#allocation2 + $0x80] sm:$0x8] %v329_v54 }
  0x20   : > { %333 = vst [vmem:[#allocation2 + $0x90] sm:$0x8] %v332_v56  ;;  %467 = vst.msk [vmem:[#allocation2 + $0x70] sm:$0xf0] %vm453_vm3, %v427_v53  ;;  %v429_v58 = vrot.slane %v277_v55, 4  ;;  %v4494_v59 = vld [vmem:[%s4434_s27 + $0x90] sm:$0xff] }
  0x21   : > { %468 = vst.msk [vmem:[#allocation2 + $0x78] sm:$0xf] %vm455_vm4, %v427_v53  ;;  %v4497_v60 = vld [vmem:[%s4434_s27 + $0x98] sm:$0xff]  ;;  %v4499_v62 = vld [vmem:[#allocation2 + $0x10] sm:$0xf0]  ;;  %v4507_v5 = vld [vmem:[%s4434_s27 + $0xa0] sm:$0xff] }
  0x22   : > { %v508_v61 = vld [vmem:[#allocation2 + $0x18] sm:$0xf]  ;;  %v507_v63 = vld [vmem:[#allocation2 + $0x10] sm:$0xf8]  ;;  %469 = vst.msk [vmem:[#allocation2 + $0x80] sm:$0xf0] %vm453_vm3, %v428_v57  ;;  %v278_v17 = vpack.c.bf16 %v4497_v60, %v4494_v59 }
  0x23   : > { %470 = vst.msk [vmem:[#allocation2 + $0x88] sm:$0xf] %vm455_vm4, %v428_v57  ;;  %v1489_v0 = vrot.slane %v4499_v62, 4  ;;  %v1490_v1 = vrot.slane %v508_v61, 4  ;;  %v510_v2 = vld [vmem:[#allocation2 + $0x28] sm:$0xf] }
  0x24   : > { %471 = vst.msk [vmem:[#allocation2 + $0x90] sm:$0xf0] %vm453_vm3, %v429_v58  ;;  %v4510_v7 = vld [vmem:[%s4434_s27 + $0xa8] sm:$0xff]  ;;  %v4512_v8 = vld [vmem:[#allocation2 + $0x20] sm:$0xf0]  ;;  %v1493_v9 = vrot.slane %v510_v2, 4 }
  0x25   : > { %472 = vst.msk [vmem:[#allocation2 + $0x98] sm:$0xf] %vm455_vm4, %v429_v58  ;;  %v559_v10 = vshrl.u32 %v507_v63, 16  ;;  %v562_v11 = vshll.u32 %v507_v63, 16  ;;  %v567_v12 = vshrl.u32 %v508_v61, 16  ;;  %v4515_v13 = vsel %vm1485_vm6, %v1489_v0, %v1490_v1  ;;  %v4521_v16 = vld [vmem:[%s5408_s3 + $0x10] sm:$0xff]  }
  0x26   : > { %v1492_v14 = vrot.slane %v4512_v8, 4  ;;  %v509_v15 = vld [vmem:[#allocation2 + $0x20] sm:$0xf8]  ;;  %3920 = vmatprep.mubr.msk.bf16.mxu0 %vm836_vm5, %v4515_v13  ;;  %v570_v21 = vshll.u32 %v508_v61, 16  ;;  %v512_v22 = vld [vmem:[#allocation2 + $0x38] sm:$0xf]  ;;  %v279_v28 = vpack.c.bf16 %v4510_v7, %v4507_v5 }
  0x27   : > { %v561_v18 = vrot.slane %v559_v10, 3  ;;  %v564_v19 = vrot.slane %v562_v11, 4  ;;  %v569_v20 = vrot.slane %v567_v12, 3  ;;  %v576_v24 = vshrl.u32 %v509_v15, 16  ;;  %v4530_v26 = vld [vmem:[#allocation2 + $0x30] sm:$0xf0] }
  0x28   : > { %v4528_v23 = vsel %vm1485_vm6, %v1492_v14, %v1493_v9  ;;  %v579_v25 = vshll.u32 %v509_v15, 16  ;;  %v514_v27 = vld [vmem:[#allocation2 + $0x48] sm:$0xf]  ;;  %v572_v30 = vrot.slane %v570_v21, 4  ;;  %v584_v31 = vshrl.u32 %v510_v2, 16  ;;  %s3471_s20 = sshll.u32 %s5478_s1, 1 }
  0x29   : > { %5437 = vst [vmem:[#allocation3_spill] sm:$0xff] %v4528_v23  ;;  %3921 = vmatmul.mubr.msk.bf16.vlgmr.msra.gmra.mrb[0].mxu0 %vm836_vm5, %v4528_v23  ;;  %v565_v29 = vor.u32 %v564_v19, %v561_v18  ;;  %v587_v32 = vshll.u32 %v510_v2, 16  ;;  %v4536_v33 = vld [vmem:[#allocation2 + $0x40] sm:$0xf0]  ;;  %v578_v34 = vrot.slane %v576_v24, 3  ;;  %v1495_v36 = vrot.slane %v4530_v26, 4  ;;  %s235_s23 = scalar_lea.vmem %s5410_s5, %s3471_s20 }
  0x2a   : > { %v581_v35 = vrot.slane %v579_v25, 4  ;;  %3953 = vmatpush3.bf16.msra.mxu0 %v4442_v6  ;;  %v1496_v37 = vrot.slane %v512_v22, 4  ;;  %v511_v38 = vld [vmem:[#allocation2 + $0x30] sm:$0xf8]  ;;  %v573_v39 = vor.u32 %v572_v30, %v569_v20  ;;  %v586_v40 = vrot.slane %v584_v31, 3 }
  0x2b   : > { %v589_v41 = vrot.slane %v587_v32, 4  ;;  %v1498_v42 = vrot.slane %v4536_v33, 4  ;;  %v513_v43 = vld [vmem:[#allocation2 + $0x40] sm:$0xf8]  ;;  %3986 = vmatprep.subr.bf16.mxu0 %v4521_v16  ;;  %v1499_v46 = vrot.slane %v514_v27, 4  ;;  %v593_v47 = vshrl.u32 %v511_v38, 16 }
  0x2c   : > { %v582_v44 = vor.u32 %v581_v35, %v578_v34  ;;  %v4543_v45 = vsel %vm1485_vm6, %v1495_v36, %v1496_v37  ;;  %v4546_v6 = vsel %vm292_vm7, %v565_v29, %v573_v39  ;;  %v596_v49 = vshll.u32 %v511_v38, 16  ;;  %v516_v51 = vld [vmem:[#allocation2 + $0x58] sm:$0xf]  ;;  %v4550_v52 = vld [vmem:[#allocation2 + $0x50] sm:$0xf0] }
  0x2d   : > { %5438 = vst [vmem:[#allocation4_spill] sm:$0xff] %v4543_v45  ;;  %v590_v48 = vor.u32 %v589_v41, %v586_v40  ;;  %3924 = vmatprep.mubr.msk.bf16.mxu0 %vm836_vm5, %v4543_v45  ;;  %v601_v50 = vshrl.u32 %v512_v22, 16  ;;  %3784 = vmatprep.mubr.msk.bf16.mxu1 %vm836_vm5, %v4546_v6  ;;  %v4555_v53 = vsel %vm1485_vm6, %v1498_v42, %v1499_v46  ;;  %v595_v54 = vrot.slane %v593_v47, 3  ;;  %v518_v57 = vld [vmem:[#allocation2 + $0x68] sm:$0xf] }
  0x2e   : > { %5439 = vst [vmem:[#allocation5_spill] sm:$0xff] %v4555_v53  ;;  %v604_v55 = vshll.u32 %v512_v22, 16  ;;  %v610_v56 = vshrl.u32 %v513_v43, 16  ;;  %v598_v61 = vrot.slane %v596_v49, 4  ;;  %v613_v0 = vshll.u32 %v513_v43, 16 }
  0x2f   : > { %v4558_v58 = vsel %vm292_vm7, %v582_v44, %v590_v48  ;;  %v603_v63 = vrot.slane %v601_v50, 3  ;;  %v4560_v1 = vld [vmem:[#allocation2 + $0x60] sm:$0xf0]  ;;  %v618_v10 = vshrl.u32 %v514_v27, 16  ;;  %v621_v11 = vshll.u32 %v514_v27, 16 }
  0x30   : > { %3785 = vmatmul.mubr.msk.bf16.vlgmr.msra.gmra.mrb[0].mxu1 %vm836_vm5, %v4558_v58  ;;  %v606_v2 = vrot.slane %v604_v55, 4  ;;  %v612_v9 = vrot.slane %v610_v56, 3  ;;  %v515_v12 = vld [vmem:[#allocation2 + $0x50] sm:$0xf8]  ;;  %v599_v14 = vor.u32 %v598_v61, %v595_v54  ;;  %v615_v15 = vrot.slane %v613_v0, 4 }
  0x31   : > { %3817 = vmatpush3.bf16.msra.mxu1 %v4421_v3  ;;  %3925 = vmatmul.mubr.msk.bf16.gmra.mrb[4].mxu0 %vm836_vm5, %v4555_v53  ;;  %v1501_v18 = vrot.slane %v4550_v52, 4  ;;  %v1502_v19 = vrot.slane %v516_v51, 4  ;;  %v620_v21 = vrot.slane %v618_v10, 3  ;;  %v623_v22 = vrot.slane %v621_v11, 4  ;;  %v517_v25 = vld [vmem:[#allocation2 + $0x60] sm:$0xf8] }
  0x32   : > { %v607_v20 = vor.u32 %v606_v2, %v603_v63  ;;  %v1504_v24 = vrot.slane %v4560_v1, 4  ;;  %v616_v29 = vor.u32 %v615_v15, %v612_v9  ;;  %v1505_v30 = vrot.slane %v518_v57, 4  ;;  %v520_v36 = vld [vmem:[#allocation2 + $0x78] sm:$0xf]  ;;  %v4577_v37 = vld [vmem:[#allocation2 + $0x70] sm:$0xf0] }
  0x33   : > { %v4570_v27 = vsel %vm1485_vm6, %v1501_v18, %v1502_v19  ;;  %v627_v3 = vshrl.u32 %v515_v12, 16  ;;  %v624_v32 = vor.u32 %v623_v22, %v620_v21  ;;  %v630_v34 = vshll.u32 %v515_v12, 16  ;;  %v4584_v42 = vld [vmem:[#allocation2 + $0x88] sm:$0xf]  ;;  %v4589_v48 = vld [vmem:[#allocation2 + $0x80] sm:$0xf0] }
  0x34   : > { %5440 = vst [vmem:[#allocation6_spill] sm:$0xff] %v4570_v27  ;;  %v4573_v31 = vsel %vm292_vm7, %v599_v14, %v607_v20  ;;  %3928 = vmatprep.mubr.msk.bf16.mxu0 %vm836_vm5, %v4570_v27  ;;  %v635_v35 = vshrl.u32 %v516_v51, 16  ;;  %v4582_v38 = vsel %vm1485_vm6, %v1504_v24, %v1505_v30  ;;  %v638_v40 = vshll.u32 %v516_v51, 16  ;;  %v519_v56 = vld [vmem:[#allocation2 + $0x70] sm:$0xf8] }
  0x35   : > { %3788 = vmatprep.mubr.msk.bf16.mxu1 %vm836_vm5, %v4573_v31  ;;  %5441 = vst [vmem:[#allocation7_spill] sm:$0xff] %v4582_v38  ;;  %v629_v39 = vrot.slane %v627_v3, 3  ;;  %v644_v41 = vshrl.u32 %v517_v25, 16  ;;  %v4587_v43 = vsel %vm292_vm7, %v616_v29, %v624_v32  ;;  %v632_v44 = vrot.slane %v630_v34, 4  ;;  %v521_v12 = vld [vmem:[#allocation2 + $0x80] sm:$0xf8] }
  0x36   : > { %v637_v46 = vrot.slane %v635_v35, 3  ;;  %v647_v47 = vshll.u32 %v517_v25, 16  ;;  %v640_v49 = vrot.slane %v638_v40, 4  ;;  %v652_v54 = vshrl.u32 %v518_v57, 16  ;;  %v523_v25 = vld [vmem:[#allocation2 + $0x90] sm:$0xf8] }
  0x37   : > { %v646_v50 = vrot.slane %v644_v41, 3  ;;  %v655_v55 = vshll.u32 %v518_v57, 16  ;;  %v633_v51 = vor.u32 %v632_v44, %v629_v39  ;;  %v1507_v63 = vrot.slane %v4577_v37, 4  ;;  %v4600_v57 = vld [vmem:[%s5408_s3 + $0x30] sm:$0xff]   ;;  %v4617_v34 = vld [vmem:[#allocation2 + $0x98] sm:$0xf] }
  0x38   : > { %3789 = vmatmul.mubr.msk.bf16.gmra.mrb[4].mxu1 %vm836_vm5, %v4587_v43  ;;  %v649_v61 = vrot.slane %v647_v47, 4  ;;  %v1508_v0 = vrot.slane %v520_v36, 4  ;;  %v641_v2 = vor.u32 %v640_v49, %v637_v46  ;;  %v654_v9 = vrot.slane %v652_v54, 3  ;;  %3850 = vmatprep.subr.bf16.mxu1 %v4600_v57  ;;  %v334_v44 = vld [vmem:[#allocation2 + $0xa0] sm:$0x8] }
  0x39   : > { %3929 = vmatmul.mubr.msk.bf16.gmra.mrb[8].mxu0 %vm836_vm5, %v4582_v38  ;;  %v657_v10 = vrot.slane %v655_v55, 4  ;;  %v1510_v11 = vrot.slane %v4589_v48, 4  ;;  %v1511_v18 = vrot.slane %v4584_v42, 4  ;;  %v661_v19 = vshrl.u32 %v519_v56, 16  ;;  %v352_v59 = vld [vmem:[#allocation2 + $0x100] sm:$0x8] }
  0x3a   : > { %v650_v14 = vor.u32 %v649_v61, %v646_v50  ;;  %v4603_v15 = vsel %vm1485_vm6, %v1507_v63, %v1508_v0  ;;  %v4607_v20 = vsel %vm292_vm7, %v633_v51, %v641_v2  ;;  %v664_v22 = vshll.u32 %v519_v56, 16  ;;  %v337_v50 = vld [vmem:[#allocation2 + $0xb0] sm:$0x8]  ;;  %v260_v63 = vld [vmem:[%s4434_s27 + $0xb8] sm:$0xff]  ;;  %v340_v0 = vld [vmem:[#allocation2 + $0xc0] sm:$0x8] }
  0x3b   : > { %5442 = vst [vmem:[#allocation8_spill] sm:$0xff] %v4603_v15  ;;  %v658_v21 = vor.u32 %v657_v10, %v654_v9  ;;  %3932 = vmatprep.mubr.msk.bf16.mxu0 %vm836_vm5, %v4603_v15  ;;  %v669_v24 = vshrl.u32 %v520_v36, 16  ;;  %3792 = vmatprep.mubr.msk.bf16.mxu1 %vm836_vm5, %v4607_v20  ;;  %v4615_v29 = vsel %vm1485_vm6, %v1510_v11, %v1511_v18  ;;  %v663_v30 = vrot.slane %v661_v19, 3  ;;  %v259_v61 = vld [vmem:[%s4434_s27 + $0xb0] sm:$0xff] }
  0x3c   : > { %5443 = vst [vmem:[#allocation9_spill] sm:$0xff] %v4615_v29  ;;  %v672_v3 = vshll.u32 %v520_v36, 16  ;;  %v678_v32 = vshrl.u32 %v521_v12, 16  ;;  %v666_v39 = vrot.slane %v664_v22, 4  ;;  %v681_v41 = vshll.u32 %v521_v12, 16  ;;  %v261_v12 = vld [vmem:[%s4434_s27 + $0xc0] sm:$0xff] }
  0x3d   : > { %v4620_v35 = vsel %vm292_vm7, %v650_v14, %v658_v21  ;;  %v671_v40 = vrot.slane %v669_v24, 3  ;;  %v686_v49 = vshrl.u32 %v4584_v42, 16  ;;  %v689_v36 = vshll.u32 %v4584_v42, 16  ;;  %v262_v42 = vld [vmem:[%s4434_s27 + $0xc8] sm:$0xff]  ;;  %v343_v14 = vld [vmem:[#allocation2 + $0xd0] sm:$0x8] }
  0x3e   : > { %v674_v46 = vrot.slane %v672_v3, 4  ;;  %v680_v47 = vrot.slane %v678_v32, 3  ;;  %v667_v54 = vor.u32 %v666_v39, %v663_v30  ;;  %v683_v55 = vrot.slane %v681_v41, 4  ;;  %v263_v18 = vld [vmem:[%s4434_s27 + $0xd0] sm:$0xff]  ;;  %v346_v30 = vld [vmem:[#allocation2 + $0xe0] sm:$0x8] }
  0x3f   : > { %v695_v56 = vshrl.u32 %v523_v25, 16  ;;  %v698_v51 = vshll.u32 %v523_v25, 16  ;;  %v688_v9 = vrot.slane %v686_v49, 3  ;;  %v691_v10 = vrot.slane %v689_v36, 4  ;;  %v264_v25 = vld [vmem:[%s4434_s27 + $0xd8] sm:$0xff]  ;;  %v265_v41 = vld [vmem:[%s4434_s27 + $0xe0] sm:$0xff] }
  0x40   : > { %3793 = vmatmul.mubr.msk.bf16.gmra.mrb[8].mxu1 %vm836_vm5, %v4620_v35  ;;  %v675_v2 = vor.u32 %v674_v46, %v671_v40  ;;  %v703_v11 = vshrl.u32 %v4617_v34, 16  ;;  %v684_v19 = vor.u32 %v683_v55, %v680_v47  ;;  %v706_v24 = vshll.u32 %v4617_v34, 16  ;;  %v266_v46 = vld [vmem:[%s4434_s27 + $0xe8] sm:$0xff]  ;;  %v349_v55 = vld [vmem:[#allocation2 + $0xf0] sm:$0x8] }
  0x41   : > { %3933 = vmatmul.mubr.msk.bf16.gmra.mrb[12].mxu0 %vm836_vm5, %v4615_v29  ;;  %v697_v21 = vrot.slane %v695_v56, 3  ;;  %v700_v22 = vrot.slane %v698_v51, 4  ;;  %v692_v32 = vor.u32 %v691_v10, %v688_v9  ;;  %v335_v40 = vsel %vm4425_vm2, 0, %v334_v44  ;;  %v267_v56 = vld [vmem:[%s4434_s27 + $0xf0] sm:$0xff]  ;;  %v268_v51 = vld [vmem:[%s4434_s27 + $0xf8] sm:$0xff] }
  0x42   : > { %v4637_v3 = vsel %vm292_vm7, %v667_v54, %v675_v2  ;;  %3954 = vmatprep.mubr.msk.bf16.mxu0 %vm836_vm5, %v4528_v23  ;;  %v705_v39 = vrot.slane %v703_v11, 3  ;;  %v708_v49 = vrot.slane %v706_v24, 4  ;;  %336 = vst [vmem:[#allocation2 + $0xa0] sm:$0x8] %v335_v40  ;;  %v430_v36 = vrot.slane %v278_v17, 4 }
  0x43   : > { %3796 = vmatprep.mubr.msk.bf16.mxu1 %vm836_vm5, %v4637_v3  ;;  %v701_v47 = vor.u32 %v700_v22, %v697_v21  ;;  %v338_v54 = vsel %vm4425_vm2, 0, %v337_v50  ;;  %v4655_v44 = vsel %vm292_vm7, %v684_v19, %v692_v32  ;;  %v431_v2 = vrot.slane %v279_v28, 4  ;;  %v288_v17 = vld [vmem:[#allocation2] sm:$0xf8]  ;;  %v357_v19 = vld [vmem:[#allocation2 + $0x18] sm:$0x10] }
  0x44   : > { %339 = vst [vmem:[#allocation2 + $0xb0] sm:$0x8] %v338_v54  ;;  %v280_v9 = vpack.c.bf16 %v260_v63, %v259_v61  ;;  %v341_v10 = vsel %vm4425_vm2, 0, %v340_v0  ;;  %v709_v50 = vor.u32 %v708_v49, %v705_v39  ;;  %473 = vst.msk [vmem:[#allocation2 + $0xa0] sm:$0xf0] %vm453_vm3, %v430_v36  ;;  %v281_v5 = vpack.c.bf16 %v262_v42, %v261_v12  ;;  %v4675_v0 = vld [vmem:[%s5408_s3 + $0x28] sm:$0xff]  }
  0x45   : > { %474 = vst.msk [vmem:[#allocation2 + $0xa8] sm:$0xf] %vm455_vm4, %v430_v36  ;;  %342 = vst [vmem:[#allocation2 + $0xc0] sm:$0x8] %v341_v10  ;;  %v344_v7 = vsel %vm4425_vm2, 0, %v343_v14  ;;  %v282_v28 = vpack.c.bf16 %v264_v25, %v263_v18  ;;  %v347_v12 = vsel %vm4425_vm2, 0, %v346_v30  ;;  %v283_v25 = vpack.c.bf16 %v266_v46, %v265_v41 }
  0x46   : > { %v294_v61 = vld [vmem:[#allocation2 + $0x8] sm:$0x1f]  ;;  %v298_v63 = vld [vmem:[#allocation2 + $0x110] sm:$0xf8]  ;;  %475 = vst.msk [vmem:[#allocation2 + $0xb0] sm:$0xf0] %vm453_vm3, %v431_v2  ;;  %v4690_v21 = vsel %vm292_vm7, %v701_v47, %v709_v50  ;;  %v284_v47 = vpack.c.bf16 %v268_v51, %v267_v56 }
  0x47   : > { %476 = vst.msk [vmem:[#allocation2 + $0xb8] sm:$0xf] %vm455_vm4, %v431_v2  ;;  %v432_v11 = vrot.slane %v280_v9, 4  ;;  %345 = vst [vmem:[#allocation2 + $0xd0] sm:$0x8] %v344_v7  ;;  %v433_v22 = vrot.slane %v281_v5, 4 }
  0x48   : > { %v4681_v42 = vld [vmem:[#allocation2 + $0x90] sm:$0xf0]  ;;  %v301_v18 = vld [vmem:[#allocation2 + $0x118] sm:$0x1f]  ;;  %348 = vst [vmem:[#allocation2 + $0xe0] sm:$0x8] %v347_v12  ;;  %3797 = vmatmul.mubr.msk.bf16.gmra.mrb[12].mxu1 %vm836_vm5, %v4655_v44 }
  0x49   : > { %v434_v24 = vrot.slane %v282_v28, 4  ;;  %v360_v32 = vld [vmem:[#allocation2 + $0x28] sm:$0x10]  ;;  %v363_v39 = vld [vmem:[#allocation2 + $0x38] sm:$0x10]  ;;  %v350_v40 = vsel %vm4425_vm2, 0, %v349_v55  ;;  %3955 = vmatmul.mubr.msk.bf16.vlgmr.msra.gmra.mrb[0].mxu0 %vm836_vm5, %v4543_v45  ;;  %3800 = vmatprep.mubr.msk.bf16.mxu1 %vm836_vm5, %v4690_v21 }
  0x4a   : > { %477 = vst.msk [vmem:[#allocation2 + $0xc0] sm:$0xf0] %vm453_vm3, %v432_v11  ;;  %v353_v41 = vsel %vm4425_vm2, 0, %v352_v59  ;;  %479 = vst.msk [vmem:[#allocation2 + $0xd0] sm:$0xf0] %vm453_vm3, %v433_v22  ;;  %v435_v46 = vrot.slane %v283_v25, 4  ;;  %3987 = vmatpush3.bf16.msra.mxu0 %v4521_v16  ;;  %3958 = vmatprep.mubr.msk.bf16.mxu0 %vm836_vm5, %v4555_v53 }
  0x4b   : > { %478 = vst.msk [vmem:[#allocation2 + $0xc8] sm:$0xf] %vm455_vm4, %v432_v11  ;;  %480 = vst.msk [vmem:[#allocation2 + $0xd8] sm:$0xf] %vm455_vm4, %v433_v22  ;;  %v289_v4 = vsel %vm4664_vm11, 0, %v288_v17  ;;  %v295_v49 = vsel %vm4685_vm12, 0, %v294_v61  ;;  %4020 = vmatprep.subr.bf16.mxu0 %v4675_v0 }
  0x4c   : > { %481 = vst.msk [vmem:[#allocation2 + $0xe0] sm:$0xf0] %vm453_vm3, %v434_v24  ;;  %351 = vst [vmem:[#allocation2 + $0xf0] sm:$0x8] %v350_v40  ;;  %v299_v36 = vsel %vm4664_vm11, 0, %v298_v63  ;;  %v436_v54 = vrot.slane %v284_v47, 4 }
  0x4d   : > { %482 = vst.msk [vmem:[#allocation2 + $0xe8] sm:$0xf] %vm455_vm4, %v434_v24  ;;  %354 = vst [vmem:[#allocation2 + $0x100] sm:$0x8] %v353_v41  ;;  %v302_v55 = vsel %vm4685_vm12, 0, %v301_v18  ;;  %v358_v56 = vsel %vm4694_vm13, 0, %v357_v19 }
  0x4e   : > { %290 = vst [vmem:[#allocation2] sm:$0xf8] %v289_v4  ;;  %296 = vst [vmem:[#allocation2 + $0x8] sm:$0x1f] %v295_v49  ;;  %v361_v51 = vsel %vm4694_vm13, 0, %v360_v32  ;;  %v1513_v2 = vrot.slane %v4681_v42, 4 }
  0x4f   : > { %300 = vst [vmem:[#allocation2 + $0x110] sm:$0xf8] %v299_v36  ;;  %v1514_v16 = vrot.slane %v4617_v34, 4  ;;  %483 = vst.msk [vmem:[#allocation2 + $0xf0] sm:$0xf0] %vm453_vm3, %v435_v46  ;;  %v364_v9 = vsel %vm4694_vm13, 0, %v363_v39 }
  0x50   : > { %484 = vst.msk [vmem:[#allocation2 + $0xf8] sm:$0xf] %vm455_vm4, %v435_v46  ;;  %303 = vst [vmem:[#allocation2 + $0x118] sm:$0x1f] %v302_v55  ;;  %v525_v10 = vld [vmem:[#allocation2 + $0xa0] sm:$0xf8] }
  0x51   : > { %359 = vst [vmem:[#allocation2 + $0x18] sm:$0x10] %v358_v56  ;;  %362 = vst [vmem:[#allocation2 + $0x28] sm:$0x10] %v361_v51  ;;  %v4736_v59 = vld [vmem:[#allocation2 + $0xa8] sm:$0xf]  ;;  %3959 = vmatmul.mubr.msk.bf16.gmra.mrb[4].mxu0 %vm836_vm5, %v4570_v27 }
  0x52   : > { %485 = vst.msk [vmem:[#allocation2 + $0x100] sm:$0xf0] %vm453_vm3, %v436_v54  ;;  %v4740_v60 = vld [vmem:[#allocation2 + $0xa0] sm:$0xf0]  ;;  %365 = vst [vmem:[#allocation2 + $0x38] sm:$0x10] %v364_v9  ;;  %3962 = vmatprep.mubr.msk.bf16.mxu0 %vm836_vm5, %v4582_v38 }
  0x53   : > { %486 = vst.msk [vmem:[#allocation2 + $0x108] sm:$0xf] %vm455_vm4, %v436_v54  ;;  %v712_v17 = vshrl.u32 %v525_v10, 16  ;;  %v715_v50 = vshll.u32 %v525_v10, 16  ;;  %v720_v5 = vshrl.u32 %v4736_v59, 16  ;;  %v723_v7 = vshll.u32 %v4736_v59, 16 }
  0x54   : > { %v527_v28 = vld [vmem:[#allocation2 + $0xb0] sm:$0xf8]  ;;  %v4744_v61 = vld [vmem:[#allocation2 + $0xb8] sm:$0xf]  ;;  %v529_v25 = vld [vmem:[#allocation2 + $0xc0] sm:$0xf8] }
  0x55   : > { %v729_v63 = vshrl.u32 %v527_v28, 16  ;;  %v732_v11 = vshll.u32 %v527_v28, 16  ;;  %v714_v18 = vrot.slane %v712_v17, 3  ;;  %v717_v19 = vrot.slane %v715_v50, 4  ;;  %v4750_v41 = vld [vmem:[#allocation2 + $0xc8] sm:$0xf] }
  0x56   : > { %v722_v22 = vrot.slane %v720_v5, 3  ;;  %v725_v24 = vrot.slane %v723_v7, 4  ;;  %v737_v40 = vshrl.u32 %v4744_v61, 16  ;;  %v740_v47 = vshll.u32 %v4744_v61, 16  ;;  %v531_v54 = vld [vmem:[#allocation2 + $0xd0] sm:$0xf8] }
  0x57   : > { %v731_v32 = vrot.slane %v729_v63, 3  ;;  %v734_v39 = vrot.slane %v732_v11, 4  ;;  %v718_v46 = vor.u32 %v717_v19, %v714_v18  ;;  %v746_v49 = vshrl.u32 %v529_v25, 16  ;;  %v4757_v10 = vld [vmem:[#allocation2 + $0xd8] sm:$0xf] }
  0x58   : > { %v726_v4 = vor.u32 %v725_v24, %v722_v22  ;;  %v749_v36 = vshll.u32 %v529_v25, 16  ;;  %v739_v56 = vrot.slane %v737_v40, 3  ;;  %v742_v51 = vrot.slane %v740_v47, 4  ;;  %v533_v28 = vld [vmem:[#allocation2 + $0xe0] sm:$0xf8] }
  0x59   : > { %v735_v55 = vor.u32 %v734_v39, %v731_v32  ;;  %v754_v9 = vshrl.u32 %v4750_v41, 16  ;;  %v748_v50 = vrot.slane %v746_v49, 3  ;;  %v757_v7 = vshll.u32 %v4750_v41, 16  ;;  %v4767_v39 = vld [vmem:[#allocation2 + $0xe8] sm:$0xf]  ;;  %3963 = vmatmul.mubr.msk.bf16.gmra.mrb[8].mxu0 %vm836_vm5, %v4603_v15 }
  0x5a   : > { %v4760_v17 = vsel %vm292_vm7, %v718_v46, %v726_v4  ;;  %v751_v5 = vrot.slane %v749_v36, 4  ;;  %v743_v63 = vor.u32 %v742_v51, %v739_v56  ;;  %v763_v18 = vshrl.u32 %v531_v54, 16  ;;  %v535_v49 = vld [vmem:[#allocation2 + $0xf0] sm:$0xf8]  ;;  %3966 = vmatprep.mubr.msk.bf16.mxu0 %vm836_vm5, %v4615_v29 }
  0x5b   : > { %3801 = vmatmul.mubr.msk.bf16.gmra.mrb[16].mxu1 %vm836_vm5, %v4760_v17  ;;  %v756_v11 = vrot.slane %v754_v9, 3  ;;  %v766_v19 = vshll.u32 %v531_v54, 16  ;;  %v759_v24 = vrot.slane %v757_v7, 4  ;;  %v771_v25 = vshrl.u32 %v4757_v10, 16  ;;  %v4774_v9 = vld [vmem:[#allocation2 + $0xf8] sm:$0xf] }
  0x5c   : > { %v752_v22 = vor.u32 %v751_v5, %v748_v50  ;;  %v774_v32 = vshll.u32 %v4757_v10, 16  ;;  %v4770_v40 = vsel %vm292_vm7, %v735_v55, %v743_v63  ;;  %v765_v47 = vrot.slane %v763_v18, 3 }
  0x5d   : > { %v768_v46 = vrot.slane %v766_v19, 4  ;;  %v780_v4 = vshrl.u32 %v533_v28, 16  ;;  %3804 = vmatprep.mubr.msk.bf16.mxu1 %vm836_vm5, %v4770_v40  ;;  %v760_v36 = vor.u32 %v759_v24, %v756_v11  ;;  %v773_v54 = vrot.slane %v771_v25, 3  ;;  %v537_v24 = vld [vmem:[#allocation2 + $0x100] sm:$0xf8] }
  0x5e   : > { %v776_v56 = vrot.slane %v774_v32, 4  ;;  %v783_v51 = vshll.u32 %v533_v28, 16  ;;  %v788_v7 = vshrl.u32 %v4767_v39, 16  ;;  %v791_v55 = vshll.u32 %v4767_v39, 16 }
  0x5f   : > { %v769_v50 = vor.u32 %v768_v46, %v765_v47  ;;  %v782_v5 = vrot.slane %v780_v4, 3  ;;  %v4779_v63 = vsel %vm292_vm7, %v752_v22, %v760_v36  ;;  %v797_v11 = vshrl.u32 %v535_v49, 16  ;;  %v4786_v46 = vld [vmem:[#allocation2 + $0x108] sm:$0xf] }
  0x60   : > { %v777_v18 = vor.u32 %v776_v56, %v773_v54  ;;  %v785_v19 = vrot.slane %v783_v51, 4  ;;  %v790_v25 = vrot.slane %v788_v7, 3  ;;  %v793_v28 = vrot.slane %v791_v55, 4 }
  0x61   : > { %v800_v32 = vshll.u32 %v535_v49, 16  ;;  %v805_v47 = vshrl.u32 %v4774_v9, 16  ;;  %v799_v36 = vrot.slane %v797_v11, 3  ;;  %v808_v54 = vshll.u32 %v4774_v9, 16  ;;  %v4805_v11 = vld [vmem:[#allocation2 + $0xb0] sm:$0xf0] }
  0x62   : > { %v4789_v22 = vsel %vm292_vm7, %v769_v50, %v777_v18  ;;  %v786_v4 = vor.u32 %v785_v19, %v782_v5  ;;  %v794_v56 = vor.u32 %v793_v28, %v790_v25  ;;  %v814_v55 = vshrl.u32 %v537_v24, 16  ;;  %v505_v5 = vld [vmem:[#allocation2] sm:$0xf8]  ;;  %v4807_v25 = vld [vmem:[#allocation2 + $0x8] sm:$0xf] }
  0x63   : > { %3805 = vmatmul.mubr.msk.bf16.gmra.mrb[20].mxu1 %vm836_vm5, %v4779_v63  ;;  %v802_v51 = vrot.slane %v800_v32, 4  ;;  %v807_v7 = vrot.slane %v805_v47, 3  ;;  %v810_v49 = vrot.slane %v808_v54, 4  ;;  %v817_v12 = vshll.u32 %v537_v24, 16 }
  0x64   : > { %3808 = vmatprep.mubr.msk.bf16.mxu1 %vm836_vm5, %v4789_v22  ;;  %v822_v14 = vshrl.u32 %v4786_v46, 16  ;;  %v825_v50 = vshll.u32 %v4786_v46, 16  ;;  %v4803_v18 = vsel %vm1485_vm6, %v1513_v2, %v1514_v16  ;;  %v4810_v28 = vsel %vm292_vm7, %v786_v4, %v794_v56 }
  0x65   : > { %5450 = vst [vmem:[#allocation10_spill] sm:$0xff] %v4803_v18  ;;  %v803_v19 = vor.u32 %v802_v51, %v799_v36  ;;  %v811_v24 = vor.u32 %v810_v49, %v807_v7  ;;  %v816_v32 = vrot.slane %v814_v55, 3  ;;  %v5451_v47 = vrot.slane %v4736_v59, 4  ;;  %v4819_v51 = vld [vmem:[#allocation2 + $0xc0] sm:$0xf0]  ;;  %3967 = vmatmul.mubr.msk.bf16.gmra.mrb[12].mxu0 %vm836_vm5, %v4803_v18 }
  0x66   : > { %v5452_v54 = vrot.slane %v4740_v60, 4  ;;  %v819_v29 = vrot.slane %v817_v12, 4  ;;  %v824_v2 = vrot.slane %v822_v14, 3  ;;  %v542_v16 = vshrl.u32 %v505_v5, 16 }
  0x67   : > { %v545_v36 = vshll.u32 %v505_v5, 16  ;;  %v827_v4 = vrot.slane %v825_v50, 4  ;;  %v1519_v56 = vrot.slane %v4805_v11, 4  ;;  %v1520_v7 = vrot.slane %v4744_v61, 4 }
  0x68   : > { %v4817_v34 = vsel %vm1485_vm6, %v5452_v54, %v5451_v47  ;;  %v550_v59 = vshrl.u32 %v4807_v25, 16  ;;  %v4827_v55 = vsel %vm292_vm7, %v803_v19, %v811_v24  ;;  %v544_v12 = vrot.slane %v542_v16, 3 }
  0x69   : > { %5453 = vst [vmem:[#allocation11_spill] sm:$0xff] %v4817_v34  ;;  %3970 = vmatprep.mubr.msk.bf16.mxu0 %vm836_vm5, %v4817_v34  ;;  %v547_v14 = vrot.slane %v545_v36, 4  ;;  %v553_v49 = vshll.u32 %v4807_v25, 16  ;;  %v1522_v47 = vrot.slane %v4819_v51, 4  ;;  %v1523_v50 = vrot.slane %v4750_v41, 4 }
  0x6a   : > { %v552_v5 = vrot.slane %v550_v59, 3  ;;  %v820_v19 = vor.u32 %v819_v29, %v816_v32  ;;  %v828_v24 = vor.u32 %v827_v4, %v824_v2  ;;  %v4839_v54 = vsel %vm1485_vm6, %v1519_v56, %v1520_v7  ;;  %v4844_v34 = vld [vmem:[#allocation2 + $0xd0] sm:$0xf0]  ;;  %v4846_v41 = vld [vmem:[#allocation2 + $0xe0] sm:$0xf0] }
  0x6b   : > { %3809 = vmatmul.mubr.msk.bf16.gmra.mrb[24].mxu1 %vm836_vm5, %v4810_v28  ;;  %v555_v61 = vrot.slane %v553_v49, 4  ;;  %5454 = vst [vmem:[#allocation12_spill] sm:$0xff] %v4839_v54  ;;  %v548_v16 = vor.u32 %v547_v14, %v544_v12  ;;  %v4842_v59 = vsel %vm1485_vm6, %v1522_v47, %v1523_v50  ;;  %v1525_v32 = vrot.slane %v4844_v34, 4  ;;  %v366_v7 = vld [vmem:[#allocation2 + $0x48] sm:$0x10] }
  0x6c   : > { %3812 = vmatprep.mubr.msk.bf16.mxu1 %vm836_vm5, %v4827_v55  ;;  %5455 = vst [vmem:[#allocation13_spill] sm:$0xff] %v4842_v59  ;;  %v4849_v18 = vsel %vm292_vm7, %v820_v19, %v828_v24  ;;  %v1526_v2 = vrot.slane %v4757_v10, 4  ;;  %v1528_v4 = vrot.slane %v4846_v41, 4  ;;  %v1529_v56 = vrot.slane %v4767_v39, 4  ;;  %v4866_v14 = vld [vmem:[#allocation2 + $0xf0] sm:$0xf0] }
  0x6d   : > { %v556_v36 = vor.u32 %v555_v61, %v552_v5  ;;  %3971 = vmatmul.mubr.msk.bf16.gmra.mrb[16].mxu0 %vm836_vm5, %v4839_v54  ;;  %v369_v49 = vld [vmem:[#allocation2 + $0x58] sm:$0x10]  ;;  %v4871_v10 = vld [vmem:[#allocation2 + $0x100] sm:$0xf0]  ;;  %v367_v39 = vsel %vm4694_vm13, 0, %v366_v7  ;;  %v1531_v19 = vrot.slane %v4866_v14, 4 }
  0x6e   : > { %3974 = vmatprep.mubr.msk.bf16.mxu0 %vm836_vm5, %v4842_v59  ;;  %v4864_v12 = vsel %vm1485_vm6, %v1525_v32, %v1526_v2  ;;  %v4869_v5 = vsel %vm1485_vm6, %v1528_v4, %v1529_v56  ;;  %v4873_v47 = vld [vmem:[#allocation2] sm:$0xf0]  ;;  %v2195_v50 = vld [vmem:[#allocation2 + $0x8] sm:$0x1f]  ;;  %368 = vst [vmem:[#allocation2 + $0x48] sm:$0x10] %v367_v39 }
  0x6f   : > { %v557_v29 = vsel %vm292_vm7, %v548_v16, %v556_v36  ;;  %5456 = vst [vmem:[#allocation14_spill] sm:$0xff] %v4864_v12  ;;  %5457 = vst [vmem:[#allocation15_spill] sm:$0xff] %v4869_v5  ;;  %v372_v61 = vld [vmem:[#allocation2 + $0x68] sm:$0x10]  ;;  %v370_v24 = vsel %vm4694_vm13, 0, %v369_v49  ;;  %v1532_v36 = vrot.slane %v4774_v9, 4 }
  0x70   : > { %v4885_v16 = vld [vmem:[%s5408_s3 + $0x8] sm:$0xff]   ;;  %v1784_v32 = vrot.slane %v4786_v46, 4  ;;  %v2215_v2 = vshrl.u32 %v4873_v47, 16  ;;  %371 = vst [vmem:[#allocation2 + $0x58] sm:$0x10] %v370_v24  ;;  %v2218_v56 = vshll.u32 %v4873_v47, 16 }
  0x71   : > { %v375_v4 = vld [vmem:[#allocation2 + $0x78] sm:$0x10]  ;;  %v2223_v7 = vshrl.u32 %v2195_v50, 16  ;;  %v2226_v49 = vshll.u32 %v2195_v50, 16  ;;  %v373_v39 = vsel %vm4694_vm13, 0, %v372_v61  ;;  %v2269_v53 = vshll.u32 %v4530_v26, 16 }
  0x72   : > { %374 = vst [vmem:[#allocation2 + $0x68] sm:$0x10] %v373_v39  ;;  %v378_v9 = vld [vmem:[#allocation2 + $0x88] sm:$0x10]  ;;  %v376_v46 = vsel %vm4694_vm13, 0, %v375_v4  ;;  %v2217_v39 = vrot.slane %v2215_v2, 4 }
  0x73   : > { %3813 = vmatmul.mubr.msk.bf16.gmra.mrb[28].mxu1 %vm836_vm5, %v4849_v18  ;;  %v381_v24 = vld [vmem:[#allocation2 + $0x98] sm:$0x10]  ;;  %v4909_v61 = vld [vmem:[#allocation2 + $0x118] sm:$0xf]  ;;  %377 = vst [vmem:[#allocation2 + $0x78] sm:$0x10] %v376_v46 }
  0x74   : > { %3818 = vmatprep.mubr.msk.bf16.mxu1 %vm836_vm5, %v557_v29  ;;  %v1783_v29 = vrot.slane %v4871_v10, 4  ;;  %v2228_v59 = vrot.slane %v2226_v49, 5  ;;  %v2196_v54 = vld [vmem:[#allocation2 + $0x18] sm:$0x1f]  ;;  %v379_v4 = vsel %vm4694_vm13, 0, %v378_v9  ;;  %v2252_v2 = vshll.u32 %v4512_v8, 16 }
  0x75   : > { %3975 = vmatmul.mubr.msk.bf16.gmra.mrb[20].mxu0 %vm836_vm5, %v4864_v12  ;;  %v2225_v12 = vrot.slane %v2223_v7, 4  ;;  %380 = vst [vmem:[#allocation2 + $0x88] sm:$0x10] %v379_v4  ;;  %v1991_v49 = vrot.slane %v4909_v61, 4  ;;  %v2240_v9 = vshrl.u32 %v2196_v54, 16  ;;  %v2243_v46 = vshll.u32 %v2196_v54, 16 }
  0x76   : > { %3978 = vmatprep.mubr.msk.bf16.mxu0 %vm836_vm5, %v4869_v5  ;;  %v4904_v5 = vsel %vm1485_vm6, %v1531_v19, %v1532_v36  ;;  %v4907_v50 = vsel %vm1485_vm6, %v1783_v29, %v1784_v32  ;;  %v2232_v19 = vshrl.u32 %v4499_v62, 16  ;;  %v2197_v36 = vld [vmem:[#allocation2 + $0x28] sm:$0x1f]  ;;  %v2235_v29 = vshll.u32 %v4499_v62, 16 }
  0x77   : > { %5458 = vst [vmem:[#allocation16_spill] sm:$0xff] %v4904_v5  ;;  %5459 = vst [vmem:[#allocation17_spill] sm:$0xff] %v4907_v50  ;;  %v2249_v32 = vshrl.u32 %v4512_v8, 16  ;;  %v384_v62 = vld [vmem:[#allocation2 + $0xa8] sm:$0x10]  ;;  %v2257_v15 = vshrl.u32 %v2197_v36, 16 }
  0x78   : > { %v2260_v38 = vshll.u32 %v2197_v36, 16  ;;  %v2234_v8 = vrot.slane %v2232_v19, 4  ;;  %v2254_v36 = vrot.slane %v2252_v2, 5  ;;  %v2199_v45 = vld [vmem:[#allocation2 + $0x48] sm:$0x1f]  ;;  %v2385_v30 = vshrl.u32 %v4740_v60, 16 }
  0x79   : > { %v2259_v27 = vrot.slane %v2257_v15, 4  ;;  %v390_v15 = vld [vmem:[#allocation2 + $0xc8] sm:$0x10]  ;;  %vm3373_vm15 = vcmask 122880  }
  0x7a   : > { %v2262_v19 = vrot.slane %v2260_v38, 5  ;;  %v2286_v38 = vshll.u32 %v4536_v33, 16 }
  0x7b   : > { %3819 = vmatmul.mubr.msk.bf16.vlgmr.msra.gmra.mrb[0].mxu1 %vm836_vm5, %v4546_v6  ;;  %v4911_v6 = vld [vmem:[#allocation2 + $0x110] sm:$0xf0] }
  0x7c   : > { %3851 = vmatpush3.bf16.msra.mxu1 %v4600_v57  ;;  %3822 = vmatprep.mubr.msk.bf16.mxu1 %vm836_vm5, %v4558_v58  ;;  %5460 = vst [vmem:[#allocation18_spill] sm:$0xff] %v4911_v6  ;;  %v2220_v57 = vrot.slane %v2218_v56, 5  ;;  %v382_v56 = vsel %vm4694_vm13, 0, %v381_v24  ;;  %v1990_v7 = vrot.slane %v4911_v6, 4  ;;  %v2237_v24 = vrot.slane %v2235_v29, 5 }
  0x7d   : > { %3884 = vmatprep.subr.bf16.mxu1 %v4885_v16  ;;  %3979 = vmatmul.mubr.msk.bf16.gmra.mrb[24].mxu0 %vm836_vm5, %v4904_v5  ;;  %383 = vst [vmem:[#allocation2 + $0x98] sm:$0x10] %v382_v56  ;;  %v2229_v5 = vor.u32 %v2228_v59, %v2225_v12  ;;  %v387_v6 = vld [vmem:[#allocation2 + $0xb8] sm:$0x10]  ;;  %v2242_v56 = vrot.slane %v2240_v9, 4  ;;  %v2251_v59 = vrot.slane %v2249_v32, 4 }
  0x7e   : > { %3982 = vmatprep.mubr.msk.bf16.mxu0 %vm836_vm5, %v4907_v50  ;;  %v2221_v4 = vor.u32 %v2220_v57, %v2217_v39  ;;  %v385_v50 = vsel %vm4694_vm13, 0, %v384_v62  ;;  %v1992_v54 = vsel %vm1485_vm6, %v1990_v7, %v1991_v49  ;;  %v2245_v39 = vrot.slane %v2243_v46, 5  ;;  %v2198_v12 = vld [vmem:[#allocation2 + $0x38] sm:$0x1f] }
  0x7f   : > { %386 = vst [vmem:[#allocation2 + $0xa8] sm:$0x10] %v385_v50  ;;  %v2266_v29 = vshrl.u32 %v4530_v26, 16  ;;  %v2274_v62 = vshrl.u32 %v2198_v12, 16  ;;  %v2277_v23 = vshll.u32 %v2198_v12, 16  ;;  %v388_v7 = vsel %vm4694_vm13, 0, %v387_v6 }
  0x80   : > { %v2230_v57 = vsel %vm2213_vm14, %v2221_v4, %v2229_v5  ;;  %v2238_v32 = vor.u32 %v2237_v24, %v2234_v8  ;;  %v2246_v50 = vor.u32 %v2245_v39, %v2242_v56  ;;  %v2283_v5 = vshrl.u32 %v4536_v33, 16  ;;  %389 = vst [vmem:[#allocation2 + $0xb8] sm:$0x10] %v388_v7  ;;  %v393_v6 = vld [vmem:[#allocation2 + $0xd8] sm:$0x10] }
  0x81   : > { %v2255_v2 = vor.u32 %v2254_v36, %v2251_v59  ;;  %v2263_v26 = vor.u32 %v2262_v19, %v2259_v27  ;;  %v2291_v49 = vshrl.u32 %v2199_v45, 16  ;;  %v2294_v9 = vshll.u32 %v2199_v45, 16  ;;  %v2200_v59 = vld [vmem:[#allocation2 + $0x58] sm:$0x1f]  ;;  %v2201_v36 = vld [vmem:[#allocation2 + $0x68] sm:$0x1f] }
  0x82   : > { %v2268_v46 = vrot.slane %v2266_v29, 4  ;;  %v2271_v4 = vrot.slane %v2269_v53, 5  ;;  %v2276_v8 = vrot.slane %v2274_v62, 4  ;;  %v2279_v24 = vrot.slane %v2277_v23, 5  ;;  %v4961_v23 = vld [vmem:[%s5408_s3 + $0x40] sm:$0xff]  }
  0x83   : > { %3823 = vmatmul.mubr.msk.bf16.gmra.mrb[4].mxu1 %vm836_vm5, %v4573_v31  ;;  %v391_v33 = vsel %vm4694_vm13, 0, %v390_v15  ;;  %v2285_v27 = vrot.slane %v2283_v5, 4  ;;  %v2288_v56 = vrot.slane %v2286_v38, 5  ;;  %v4954_v45 = vsel %vm2213_vm14, %v2255_v2, %v2263_v26  ;;  %v396_v19 = vld [vmem:[#allocation2 + $0xe8] sm:$0x10] }
  0x84   : > { %3826 = vmatprep.mubr.msk.bf16.mxu1 %vm836_vm5, %v4587_v43  ;;  %392 = vst [vmem:[#allocation2 + $0xc8] sm:$0x10] %v391_v33  ;;  %v2293_v39 = vrot.slane %v2291_v49, 4  ;;  %v2296_v53 = vrot.slane %v2294_v9, 5  ;;  %v394_v12 = vsel %vm4694_vm13, 0, %v393_v6  ;;  %v2280_v29 = vor.u32 %v2279_v24, %v2276_v8 }
  0x85   : > { %3983 = vmatmul.mubr.msk.bf16.gmra.mrb[28].mxu0 %vm836_vm5, %v1992_v54  ;;  %v4951_v54 = vsel %vm2213_vm14, %v2238_v32, %v2246_v50  ;;  %395 = vst [vmem:[#allocation2 + $0xd8] sm:$0x10] %v394_v12  ;;  %v2300_v62 = vshrl.u32 %v4550_v52, 16  ;;  %v2303_v7 = vshll.u32 %v4550_v52, 16  ;;  %v2317_v32 = vshrl.u32 %v4560_v1, 16 }
  0x86   : > { %3988 = vmatprep.mubr.msk.bf16.mxu0 %vm836_vm5, %v2230_v57  ;;  %v2272_v57 = vor.u32 %v2271_v4, %v2268_v46  ;;  %v2289_v50 = vor.u32 %v2288_v56, %v2285_v27  ;;  %v2308_v5 = vshrl.u32 %v2200_v59, 16  ;;  %v2311_v38 = vshll.u32 %v2200_v59, 16  ;;  %v399_v2 = vld [vmem:[#allocation2 + $0xf8] sm:$0x10]  ;;  %v2203_v59 = vld [vmem:[#allocation2 + $0x88] sm:$0x1f] }
  0x87   : > { %v2320_v15 = vshll.u32 %v4560_v1, 16  ;;  %v2297_v26 = vor.u32 %v2296_v53, %v2293_v39  ;;  %v2325_v49 = vshrl.u32 %v2201_v36, 16  ;;  %v2328_v9 = vshll.u32 %v2201_v36, 16  ;;  %v2202_v53 = vld [vmem:[#allocation2 + $0x78] sm:$0x1f] }
  0x88   : > { %v397_v46 = vsel %vm4694_vm13, 0, %v396_v19  ;;  %v4980_v52 = vsel %vm2213_vm14, %v2272_v57, %v2280_v29  ;;  %v2302_v1 = vrot.slane %v2300_v62, 4  ;;  %v400_v4 = vsel %vm4694_vm13, 0, %v399_v2 }
  0x89   : > { %398 = vst [vmem:[#allocation2 + $0xe8] sm:$0x10] %v397_v46  ;;  %v2310_v6 = vrot.slane %v2308_v5, 4  ;;  %v2313_v8 = vrot.slane %v2311_v38, 5  ;;  %v2319_v24 = vrot.slane %v2317_v32, 4  ;;  %v2322_v33 = vrot.slane %v2320_v15, 5 }
  0x8a   : > { %401 = vst [vmem:[#allocation2 + $0xf8] sm:$0x10] %v400_v4  ;;  %v4985_v27 = vsel %vm2213_vm14, %v2289_v50, %v2297_v26  ;;  %v2327_v56 = vrot.slane %v2325_v49, 4  ;;  %v2330_v39 = vrot.slane %v2328_v9, 5  ;;  %v2334_v12 = vshrl.u32 %v4577_v37, 16 }
  0x8b   : > { %3827 = vmatmul.mubr.msk.bf16.gmra.mrb[8].mxu1 %vm836_vm5, %v4607_v20  ;;  %v2337_v36 = vshll.u32 %v4577_v37, 16  ;;  %v2351_v19 = vshrl.u32 %v4589_v48, 16  ;;  %v2354_v29 = vshll.u32 %v4589_v48, 16  ;;  %v2314_v62 = vor.u32 %v2313_v8, %v2310_v6  ;;  %v402_v26 = vld [vmem:[#allocation2 + $0x108] sm:$0x10] }
  0x8c   : > { %3830 = vmatprep.mubr.msk.bf16.mxu1 %vm836_vm5, %v4620_v35  ;;  %v2345_v32 = vshll.u32 %v2202_v53, 16  ;;  %v2359_v50 = vshrl.u32 %v2203_v59, 16  ;;  %v2323_v5 = vor.u32 %v2322_v33, %v2319_v24  ;;  %v2331_v38 = vor.u32 %v2330_v39, %v2327_v56  ;;  %v2204_v24 = vld [vmem:[#allocation2 + $0x98] sm:$0x1f]  ;;  %v2205_v39 = vld [vmem:[#allocation2 + $0xa8] sm:$0x1f] }
  0x8d   : > { %3989 = vmatmul.mubr.msk.bf16.vlgmr.msra.gmra.mrb[0].mxu0 %vm836_vm5, %v4951_v54  ;;  %v2362_v15 = vshll.u32 %v2203_v59, 16  ;;  %v1486_v2 = vrot.slane %v4873_v47, 4  ;;  %v2336_v37 = vrot.slane %v2334_v12, 4  ;;  %v2339_v48 = vrot.slane %v2337_v36, 5 }
  0x8e   : > { %4021 = vmatpush3.bf16.msra.mxu0 %v4675_v0  ;;  %3992 = vmatprep.mubr.msk.bf16.mxu0 %vm836_vm5, %v4954_v45  ;;  %v2305_v0 = vrot.slane %v2303_v7, 5  ;;  %v2342_v7 = vshrl.u32 %v2202_v53, 16  ;;  %v2353_v49 = vrot.slane %v2351_v19, 4  ;;  %v2356_v9 = vrot.slane %v2354_v29, 5 }
  0x8f   : > { %4054 = vmatprep.subr.bf16.mxu0 %v4961_v23  ;;  %v1487_v46 = vrot.slane %v4807_v25, 4  ;;  %v2347_v4 = vrot.slane %v2345_v32, 5  ;;  %v2361_v6 = vrot.slane %v2359_v50, 4  ;;  %v5005_v47 = vsel %vm2213_vm14, %v2323_v5, %v2331_v38 }
  0x90   : > { %v2306_v57 = vor.u32 %v2305_v0, %v2302_v1  ;;  %v2344_v0 = vrot.slane %v2342_v7, 4  ;;  %v2364_v8 = vrot.slane %v2362_v15, 5  ;;  %v403_v56 = vsel %vm4694_vm13, 0, %v402_v26 }
  0x91   : > { %v5008_v33 = vsel %vm1485_vm6, %v1486_v2, %v1487_v46  ;;  %404 = vst [vmem:[#allocation2 + $0x108] sm:$0x10] %v403_v56  ;;  %v2340_v25 = vor.u32 %v2339_v48, %v2336_v37  ;;  %v2357_v53 = vor.u32 %v2356_v9, %v2353_v49  ;;  %v2368_v59 = vshrl.u32 %v4681_v42, 16  ;;  %v2206_v49 = vld [vmem:[#allocation2 + $0xb8] sm:$0x1f] }
  0x92   : > { %v5002_v1 = vsel %vm2213_vm14, %v2306_v57, %v2314_v62  ;;  %v2371_v12 = vshll.u32 %v4681_v42, 16  ;;  %v2348_v57 = vor.u32 %v2347_v4, %v2344_v0  ;;  %v2376_v36 = vshrl.u32 %v2204_v24, 16  ;;  %v2207_v9 = vld [vmem:[#allocation2 + $0xc8] sm:$0x1f] }
  0x93   : > { %3831 = vmatmul.mubr.msk.bf16.gmra.mrb[12].mxu1 %vm836_vm5, %v4637_v3  ;;  %v2379_v19 = vshll.u32 %v2204_v24, 16  ;;  %v2365_v29 = vor.u32 %v2364_v8, %v2361_v6  ;;  %v2388_v62 = vshll.u32 %v4740_v60, 16  ;;  %v2393_v7 = vshrl.u32 %v2205_v39, 16 }
  0x94   : > { %3834 = vmatprep.mubr.msk.bf16.mxu1 %vm836_vm5, %v4655_v44  ;;  %v2396_v32 = vshll.u32 %v2205_v39, 16  ;;  %v2370_v42 = vrot.slane %v2368_v59, 4  ;;  %v2373_v50 = vrot.slane %v2371_v12, 5  ;;  %v5025_v5 = vsel %vm2213_vm14, %v2340_v25, %v2348_v57 }
  0x95   : > { %3993 = vmatmul.mubr.msk.bf16.gmra.mrb[4].mxu0 %vm836_vm5, %v4980_v52  ;;  %v2378_v38 = vrot.slane %v2376_v36, 4  ;;  %v2381_v15 = vrot.slane %v2379_v19, 5  ;;  %v2387_v2 = vrot.slane %v2385_v30, 4  ;;  %v5028_v37 = vsel %vm2213_vm14, %v2357_v53, %v2365_v29 }
  0x96   : > { %3996 = vmatprep.mubr.msk.bf16.mxu0 %vm836_vm5, %v4985_v27  ;;  %v2390_v60 = vrot.slane %v2388_v62, 5  ;;  %v2395_v26 = vrot.slane %v2393_v7, 4  ;;  %v2398_v48 = vrot.slane %v2396_v32, 5  ;;  %v2402_v46 = vshrl.u32 %v4805_v11, 16 }
  0x97   : > { %v2405_v0 = vshll.u32 %v4805_v11, 16  ;;  %v2419_v4 = vshrl.u32 %v4819_v51, 16  ;;  %v2422_v6 = vshll.u32 %v4819_v51, 16  ;;  %v2374_v8 = vor.u32 %v2373_v50, %v2370_v42  ;;  %v2208_v42 = vld [vmem:[#allocation2 + $0xd8] sm:$0x1f] }
  0x98   : > { %v2382_v24 = vor.u32 %v2381_v15, %v2378_v38  ;;  %v2410_v56 = vshrl.u32 %v2206_v49, 16  ;;  %v2413_v39 = vshll.u32 %v2206_v49, 16  ;;  %v2391_v25 = vor.u32 %v2390_v60, %v2387_v2  ;;  %v2209_v50 = vld [vmem:[#allocation2 + $0xe8] sm:$0x1f] }
  0x99   : > { %v2399_v53 = vor.u32 %v2398_v48, %v2395_v26  ;;  %v2427_v59 = vshrl.u32 %v2207_v9, 16  ;;  %v2430_v12 = vshll.u32 %v2207_v9, 16  ;;  %v2404_v11 = vrot.slane %v2402_v46, 4 }
  0x9a   : > { %v2407_v57 = vrot.slane %v2405_v0, 5  ;;  %v2421_v51 = vrot.slane %v2419_v4, 4  ;;  %v2424_v36 = vrot.slane %v2422_v6, 5  ;;  %v5043_v19 = vsel %vm2213_vm14, %v2374_v8, %v2382_v24 }
  0x9b   : > { %3835 = vmatmul.mubr.msk.bf16.gmra.mrb[16].mxu1 %vm836_vm5, %v4690_v21  ;;  %v2412_v30 = vrot.slane %v2410_v56, 4  ;;  %v2415_v29 = vrot.slane %v2413_v39, 5  ;;  %v5046_v62 = vsel %vm2213_vm14, %v2391_v25, %v2399_v53  ;;  %v2429_v7 = vrot.slane %v2427_v59, 4 }
  0x9c   : > { %3838 = vmatprep.mubr.msk.bf16.mxu1 %vm836_vm5, %v4760_v17  ;;  %v2432_v32 = vrot.slane %v2430_v12, 5  ;;  %v2408_v38 = vor.u32 %v2407_v57, %v2404_v11  ;;  %v2425_v15 = vor.u32 %v2424_v36, %v2421_v51  ;;  %v2436_v2 = vshrl.u32 %v4844_v34, 16  ;;  %v2210_v11 = vld [vmem:[#allocation2 + $0xf8] sm:$0x1f] }
  0x9d   : > { %3997 = vmatmul.mubr.msk.bf16.gmra.mrb[8].mxu0 %vm836_vm5, %v5002_v1  ;;  %v2439_v60 = vshll.u32 %v4844_v34, 16  ;;  %v2416_v26 = vor.u32 %v2415_v29, %v2412_v30  ;;  %v2444_v48 = vshrl.u32 %v2208_v42, 16  ;;  %v2447_v49 = vshll.u32 %v2208_v42, 16 }
  0x9e   : > { %4000 = vmatprep.mubr.msk.bf16.mxu0 %vm836_vm5, %v5005_v47  ;;  %v2453_v9 = vshrl.u32 %v4846_v41, 16  ;;  %v2433_v46 = vor.u32 %v2432_v32, %v2429_v7  ;;  %v2456_v0 = vshll.u32 %v4846_v41, 16  ;;  %v2461_v4 = vshrl.u32 %v2209_v50, 16 }
  0x9f   : > { %v2464_v6 = vshll.u32 %v2209_v50, 16  ;;  %v2438_v34 = vrot.slane %v2436_v2, 4  ;;  %v2441_v8 = vrot.slane %v2439_v60, 5  ;;  %v5061_v24 = vsel %vm2213_vm14, %v2408_v38, %v2416_v26 }
  0xa0   : > { %v2446_v56 = vrot.slane %v2444_v48, 4  ;;  %v2449_v39 = vrot.slane %v2447_v49, 5  ;;  %v2455_v25 = vrot.slane %v2453_v9, 4  ;;  %v5064_v53 = vsel %vm2213_vm14, %v2425_v15, %v2433_v46  ;;  %v5461_v49 = vld [vmem:[#allocation3_spill] sm:$0xff] }
  0xa1   : > { %v2458_v41 = vrot.slane %v2456_v0, 5  ;;  %v2463_v59 = vrot.slane %v2461_v4, 4  ;;  %v2466_v12 = vrot.slane %v2464_v6, 5  ;;  %v2442_v57 = vor.u32 %v2441_v8, %v2438_v34  ;;  %v5462_v6 = vld [vmem:[#allocation4_spill] sm:$0xff]  ;;  %v5464_v8 = vld [vmem:[#allocation6_spill] sm:$0xff] }
  0xa2   : > { %v2450_v51 = vor.u32 %v2449_v39, %v2446_v56  ;;  %v2473_v36 = vshll.u32 %v4866_v14, 16  ;;  %v2478_v30 = vshrl.u32 %v2210_v11, 16  ;;  %v2481_v29 = vshll.u32 %v2210_v11, 16  ;;  %v5465_v56 = vld [vmem:[#allocation7_spill] sm:$0xff]  ;;  %v5466_v39 = vld [vmem:[#allocation8_spill] sm:$0xff] }
  0xa3   : > { %3839 = vmatmul.mubr.msk.bf16.gmra.mrb[20].mxu1 %vm836_vm5, %v4770_v40  ;;  %v2459_v7 = vor.u32 %v2458_v41, %v2455_v25  ;;  %v2467_v32 = vor.u32 %v2466_v12, %v2463_v59  ;;  %v5467_v25 = vld [vmem:[#allocation9_spill] sm:$0xff]  ;;  %v5469_v41 = vld [vmem:[#allocation11_spill] sm:$0xff] }
  0xa4   : > { %3842 = vmatprep.mubr.msk.bf16.mxu1 %vm836_vm5, %v4779_v63  ;;  %v5078_v50 = vsel %vm2213_vm14, %v2442_v57, %v2450_v51  ;;  %v2475_v38 = vrot.slane %v2473_v36, 5  ;;  %v2480_v15 = vrot.slane %v2478_v30, 4  ;;  %v2483_v2 = vrot.slane %v2481_v29, 5  ;;  %v5476_v29 = vld [vmem:[#allocation17_spill] sm:$0xff] }
  0xa5   : > { %4001 = vmatmul.mubr.msk.bf16.gmra.mrb[12].mxu0 %vm836_vm5, %v5025_v5  ;;  %v5084_v60 = vsel %vm2213_vm14, %v2459_v7, %v2467_v32 }
  0xa6   : > { %4004 = vmatprep.mubr.msk.bf16.mxu0 %vm836_vm5, %v5028_v37 }
  0xab   : > { %3843 = vmatmul.mubr.msk.bf16.gmra.mrb[24].mxu1 %vm836_vm5, %v4789_v22 }
  0xac   : > { %3846 = vmatprep.mubr.msk.bf16.mxu1 %vm836_vm5, %v4810_v28 }
  0xad   : > { %4005 = vmatmul.mubr.msk.bf16.gmra.mrb[16].mxu0 %vm836_vm5, %v5043_v19 }
  0xae   : > { %4008 = vmatprep.mubr.msk.bf16.mxu0 %vm836_vm5, %v5046_v62 }
  0xb3   : > { %3847 = vmatmul.mubr.msk.bf16.gmra.mrb[28].mxu1 %vm836_vm5, %v4827_v55 }
  0xb4   : > { %3852 = vmatprep.mubr.msk.bf16.mxu1 %vm836_vm5, %v4558_v58  ;;  %v2470_v58 = vshrl.u32 %v4866_v14, 16  ;;  %v4363_v14 = vld [vmem:[%s5408_s3 + $0x20] sm:$0xff]  }
  0xb5   : > { %4009 = vmatmul.mubr.msk.bf16.gmra.mrb[20].mxu0 %vm836_vm5, %v5061_v24 }
  0xb6   : > { %4012 = vmatprep.mubr.msk.bf16.mxu0 %vm836_vm5, %v5064_v53  ;;  %v2472_v42 = vrot.slane %v2470_v58, 4 }
  0xbb   : > { %3853 = vmatmul.mubr.msk.bf16.vlgmr.msra.gmra.mrb[0].mxu1 %vm836_vm5, %v4573_v31  ;;  %v2476_v31 = vor.u32 %v2475_v38, %v2472_v42 }
  0xbc   : > { %3885 = vmatpush3.bf16.msra.mxu1 %v4885_v16  ;;  %3856 = vmatprep.mubr.msk.bf16.mxu1 %vm836_vm5, %v4587_v43  ;;  %v2484_v43 = vor.u32 %v2483_v2, %v2480_v15 }
  0xbd   : > { %4088 = vmatprep.subr.bf16.mxu1 %v4363_v14  ;;  %4013 = vmatmul.mubr.msk.bf16.gmra.mrb[24].mxu0 %vm836_vm5, %v5078_v50 }
  0xbe   : > { %4016 = vmatprep.mubr.msk.bf16.mxu0 %vm836_vm5, %v5084_v60  ;;  %v5095_v16 = vsel %vm2213_vm14, %v2476_v31, %v2484_v43 }
  0xc3   : > { %3857 = vmatmul.mubr.msk.bf16.gmra.mrb[4].mxu1 %vm836_vm5, %v4607_v20  ;;  %v539_v20 = vld [vmem:[#allocation2 + $0x110] sm:$0xf8] }
  0xc4   : > { %3860 = vmatprep.mubr.msk.bf16.mxu1 %vm836_vm5, %v4620_v35  ;;  %v1217_v35 = vshrl.u32 %v539_v20, 16 }
  0xc5   : > { %4017 = vmatmul.mubr.msk.bf16.gmra.mrb[28].mxu0 %vm836_vm5, %v5095_v16 }
  0xc6   : > { %4022 = vmatprep.mubr.msk.bf16.mxu0 %vm836_vm5, %v4951_v54 }
  0xcb   : > { %3861 = vmatmul.mubr.msk.bf16.gmra.mrb[8].mxu1 %vm836_vm5, %v4637_v3  ;;  %v1220_v3 = vshll.u32 %v539_v20, 16 }
  0xcc   : > { %3864 = vmatprep.mubr.msk.bf16.mxu1 %vm836_vm5, %v4655_v44  ;;  %v1225_v44 = vshrl.u32 %v4909_v61, 16 }
  0xcd   : > { %4023 = vmatmul.mubr.msk.bf16.vlgmr.msra.gmra.mrb[0].mxu0 %vm836_vm5, %v4954_v45 }
  0xce   : > { %4055 = vmatpush3.bf16.msra.mxu0 %v4961_v23  ;;  %4026 = vmatprep.mubr.msk.bf16.mxu0 %vm836_vm5, %v4980_v52  ;;  %v2211_v23 = vld [vmem:[#allocation2 + $0x108] sm:$0x1f] }
  0xcf   : > { %v2742_v26 = vshrl.u32 %v2211_v23, 16  ;;  %v2745_v48 = vshll.u32 %v2211_v23, 16 }
  0xd1   : > { %v2744_v46 = vrot.slane %v2742_v26, 4  ;;  %v2747_v0 = vrot.slane %v2745_v48, 5 }
  0xd3   : > { %3865 = vmatmul.mubr.msk.bf16.gmra.mrb[12].mxu1 %vm836_vm5, %v4690_v21  ;;  %v1228_v21 = vshll.u32 %v4909_v61, 16  ;;  %v2748_v4 = vor.u32 %v2747_v0, %v2744_v46 }
  0xd4   : > { %3868 = vmatprep.mubr.msk.bf16.mxu1 %vm836_vm5, %v4760_v17  ;;  %v1219_v17 = vrot.slane %v1217_v35, 3 }
  0xd5   : > { %4027 = vmatmul.mubr.msk.bf16.gmra.mrb[4].mxu0 %vm836_vm5, %v4985_v27  ;;  %v1230_v54 = vrot.slane %v1228_v21, 4 }
  0xd6   : > { %4030 = vmatprep.mubr.msk.bf16.mxu0 %vm836_vm5, %v5002_v1 }
  0xdb   : > { %3869 = vmatmul.mubr.msk.bf16.gmra.mrb[16].mxu1 %vm836_vm5, %v4770_v40  ;;  %v1222_v40 = vrot.slane %v1220_v3, 4 }
  0xdc   : > { %3872 = vmatprep.mubr.msk.bf16.mxu1 %vm836_vm5, %v4779_v63  ;;  %v1227_v63 = vrot.slane %v1225_v44, 3 }
  0xdd   : > { %4031 = vmatmul.mubr.msk.bf16.gmra.mrb[8].mxu0 %vm836_vm5, %v5005_v47 }
  0xde   : > { %4034 = vmatprep.mubr.msk.bf16.mxu0 %vm836_vm5, %v5025_v5 }
  0xe3   : > { %3873 = vmatmul.mubr.msk.bf16.gmra.mrb[20].mxu1 %vm836_vm5, %v4789_v22  ;;  %v1223_v22 = vor.u32 %v1222_v40, %v1219_v17 }
  0xe4   : > { %3876 = vmatprep.mubr.msk.bf16.mxu1 %vm836_vm5, %v4810_v28  ;;  %v1231_v28 = vor.u32 %v1230_v54, %v1227_v63 }
  0xe5   : > { %4035 = vmatmul.mubr.msk.bf16.gmra.mrb[12].mxu0 %vm836_vm5, %v5028_v37 }
  0xe6   : > { %4038 = vmatprep.mubr.msk.bf16.mxu0 %vm836_vm5, %v5043_v19  ;;  %v1232_v61 = vsel %vm292_vm7, %v1223_v22, %v1231_v28 }
  0xeb   : > { %3877 = vmatmul.mubr.msk.bf16.gmra.mrb[24].mxu1 %vm836_vm5, %v4827_v55  ;;  %v2737_v55 = vshll.u32 %v4871_v10, 16 }
  0xec   : > { %3880 = vmatprep.mubr.msk.bf16.mxu1 %vm836_vm5, %v4849_v18  ;;  %v2734_v18 = vshrl.u32 %v4871_v10, 16 }
  0xed   : > { %4039 = vmatmul.mubr.msk.bf16.gmra.mrb[16].mxu0 %vm836_vm5, %v5046_v62  ;;  %v2739_v9 = vrot.slane %v2737_v55, 5 }
  0xee   : > { %4042 = vmatprep.mubr.msk.bf16.mxu0 %vm836_vm5, %v5061_v24 }
  0xf3   : > { %3881 = vmatmul.mubr.msk.bf16.gmra.mrb[28].mxu1 %vm836_vm5, %v1232_v61 }
  0xf4   : > { %3886 = vmatprep.mubr.msk.bf16.mxu1 %vm836_vm5, %v5008_v33  ;;  %v2736_v33 = vrot.slane %v2734_v18, 4 }
  0xf5   : > { %4043 = vmatmul.mubr.msk.bf16.gmra.mrb[20].mxu0 %vm836_vm5, %v5064_v53 }
  0xf6   : > { %4046 = vmatprep.mubr.msk.bf16.mxu0 %vm836_vm5, %v5078_v50  ;;  %v2740_v10 = vor.u32 %v2739_v9, %v2736_v33 }
  0xf8   : > { %v2749_v34 = vsel %vm2213_vm14, %v2740_v10, %v2748_v4 }
  0xfb   : > { %3887 = vmatmul.mubr.msk.bf16.vlgmr.msra.gmra.mrb[0].mxu1 %vm836_vm5, %v4515_v13  ;;  %v5463_v13 = vld [vmem:[#allocation5_spill] sm:$0xff] }
  0xfc   : > { %4089 = vmatpush3.bf16.msra.mxu1 %v4363_v14  ;;  %3890 = vmatprep.mubr.msk.bf16.mxu1 %vm836_vm5, %v5461_v49 }
  0xfd   : > { %4047 = vmatmul.mubr.msk.bf16.gmra.mrb[24].mxu0 %vm836_vm5, %v5084_v60 }
  0xfe   : > { %4050 = vmatprep.mubr.msk.bf16.mxu0 %vm836_vm5, %v5095_v16 }
 0x103   : > { %3891 = vmatmul.mubr.msk.bf16.gmra.mrb[4].mxu1 %vm836_vm5, %v5462_v6 }
 0x104   : > { %3894 = vmatprep.mubr.msk.bf16.mxu1 %vm836_vm5, %v5463_v13 }
 0x105   : > { %4051 = vmatmul.mubr.msk.bf16.gmra.mrb[28].mxu0 %vm836_vm5, %v2749_v34 }
 0x106   : > { %4056 = vmatprep.mubr.msk.bf16.mxu0 %vm836_vm5, %v4954_v45  ;;  %v5468_v45 = vld [vmem:[#allocation10_spill] sm:$0xff] }
 0x10b   : > { %3895 = vmatmul.mubr.msk.bf16.gmra.mrb[8].mxu1 %vm836_vm5, %v5464_v8 }
 0x10c   : > { %3898 = vmatprep.mubr.msk.bf16.mxu1 %vm836_vm5, %v5465_v56 }
 0x10d   : > { %4057 = vmatmul.mubr.msk.bf16.vlgmr.msra.gmra.mrb[0].mxu0 %vm836_vm5, %v4980_v52  ;;  %v5470_v52 = vld [vmem:[#allocation12_spill] sm:$0xff] }
 0x10e   : > { %4060 = vmatprep.mubr.msk.bf16.mxu0 %vm836_vm5, %v4985_v27  ;;  %v5471_v27 = vld [vmem:[#allocation13_spill] sm:$0xff] }
 0x113   : > { %3899 = vmatmul.mubr.msk.bf16.gmra.mrb[12].mxu1 %vm836_vm5, %v5466_v39 }
 0x114   : > { %3902 = vmatprep.mubr.msk.bf16.mxu1 %vm836_vm5, %v5467_v25 }
 0x115   : > { %4061 = vmatmul.mubr.msk.bf16.gmra.mrb[4].mxu0 %vm836_vm5, %v5002_v1  ;;  %v5472_v1 = vld [vmem:[#allocation14_spill] sm:$0xff] }
 0x116   : > { %4064 = vmatprep.mubr.msk.bf16.mxu0 %vm836_vm5, %v5005_v47  ;;  %v5473_v47 = vld [vmem:[#allocation15_spill] sm:$0xff] }
 0x11b   : > { %3903 = vmatmul.mubr.msk.bf16.gmra.mrb[16].mxu1 %vm836_vm5, %v5468_v45 }
 0x11c   : > { %3906 = vmatprep.mubr.msk.bf16.mxu1 %vm836_vm5, %v5469_v41 }
 0x11d   : > { %4065 = vmatmul.mubr.msk.bf16.gmra.mrb[8].mxu0 %vm836_vm5, %v5025_v5  ;;  %v5474_v5 = vld [vmem:[#allocation16_spill] sm:$0xff] }
 0x11e   : > { %4068 = vmatprep.mubr.msk.bf16.mxu0 %vm836_vm5, %v5028_v37  ;;  %v2212_v37 = vld [vmem:[#allocation2 + $0x118] sm:$0x1f] }
 0x11f   : > { %v2961_v59 = vshrl.u32 %v2212_v37, 16  ;;  %v2964_v12 = vshll.u32 %v2212_v37, 16 }
 0x121   : > { %v2963_v57 = vrot.slane %v2961_v59, 4  ;;  %v2966_v58 = vrot.slane %v2964_v12, 5 }
 0x123   : > { %3907 = vmatmul.mubr.msk.bf16.gmra.mrb[20].mxu1 %vm836_vm5, %v5470_v52  ;;  %v2967_v36 = vor.u32 %v2966_v58, %v2963_v57 }
 0x124   : > { %3910 = vmatprep.mubr.msk.bf16.mxu1 %vm836_vm5, %v5471_v27 }
 0x125   : > { %4069 = vmatmul.mubr.msk.bf16.gmra.mrb[12].mxu0 %vm836_vm5, %v5043_v19  ;;  %v5475_v19 = vld [vmem:[#allocation18_spill] sm:$0xff] }
 0x126   : > { %4072 = vmatprep.mubr.msk.bf16.mxu0 %vm836_vm5, %v5046_v62  ;;  %v2953_v62 = vshrl.u32 %v5475_v19, 16 }
 0x12b   : > { %3911 = vmatmul.mubr.msk.bf16.gmra.mrb[24].mxu1 %vm836_vm5, %v5472_v1 }
 0x12c   : > { %3914 = vmatprep.mubr.msk.bf16.mxu1 %vm836_vm5, %v5473_v47 }
 0x12d   : > { %4073 = vmatmul.mubr.msk.bf16.gmra.mrb[16].mxu0 %vm836_vm5, %v5061_v24  ;;  %v2956_v24 = vshll.u32 %v5475_v19, 16 }
 0x12e   : > { %4076 = vmatprep.mubr.msk.bf16.mxu0 %vm836_vm5, %v5064_v53  ;;  %v2955_v53 = vrot.slane %v2953_v62, 4 }
 0x12f   : > { %v2958_v11 = vrot.slane %v2956_v24, 5 }
 0x131   : > { %v2959_v51 = vor.u32 %v2958_v11, %v2955_v53 }
 0x133   : > { %3915 = vmatmul.mubr.msk.bf16.gmra.mrb[28].mxu1 %vm836_vm5, %v5474_v5  ;;  %v2968_v30 = vsel %vm2213_vm14, %v2959_v51, %v2967_v36 }
 0x134   : > { %3936 = vmatprep.mubr.msk.bf16.mxu1 %vm836_vm5, %v5468_v45 }
 0x135   : > { %4077 = vmatmul.mubr.msk.bf16.gmra.mrb[20].mxu0 %vm836_vm5, %v5078_v50 }
 0x136   : > { %4080 = vmatprep.mubr.msk.bf16.mxu0 %vm836_vm5, %v5084_v60 }
 0x13b   : > { %3937 = vmatmul.mubr.msk.bf16.vlgmr.msra.gmra.mrb[16].mxu1 %vm836_vm5, %v5469_v41 }
 0x13c   : > { %3940 = vmatprep.mubr.msk.bf16.mxu1 %vm836_vm5, %v5470_v52 }
 0x13d   : > { %4081 = vmatmul.mubr.msk.bf16.gmra.mrb[24].mxu0 %vm836_vm5, %v5095_v16 }
 0x13e   : > { %4084 = vmatprep.mubr.msk.bf16.mxu0 %vm836_vm5, %v2749_v34 }
 0x143   : > { %3941 = vmatmul.mubr.msk.bf16.gmra.mrb[20].mxu1 %vm836_vm5, %v5471_v27 }
 0x144   : > { %3944 = vmatprep.mubr.msk.bf16.mxu1 %vm836_vm5, %v5472_v1 }
 0x145   : > { %4085 = vmatmul.mubr.msk.bf16.gmra.mrb[28].mxu0 %vm836_vm5, %v2968_v30 }
 0x14b   : > { %3945 = vmatmul.mubr.msk.bf16.gmra.mrb[24].mxu1 %vm836_vm5, %v5473_v47 }
 0x14c   : > { %3948 = vmatprep.mubr.msk.bf16.mxu1 %vm836_vm5, %v5474_v5 }
 0x153   : > { %3949 = vmatmul.mubr.msk.bf16.gmra.mrb[28].mxu1 %vm836_vm5, %v5476_v29 }
 0x1ce   : > { %v3888_v7 = vpop.f32.mrb[0].mxu1 }
 0x1cf   : > { %v1622_v32 = vpop.f32.mrb[1].mxu1 }
 0x1d0   : > { %v3889_v42 = vpop.f32.mrb[2].mxu1 }
 0x1d1   : > { %v1625_v50 = vpop.f32.mrb[3].mxu1 }
 0x1d6   : > { %v3892_v38 = vpop.f32.mrb[4].mxu1 }
 0x1d7   : > { %v1638_v15 = vpop.f32.mrb[5].mxu1 }
 0x1d8   : > { %v3893_v2 = vpop.f32.mrb[6].mxu1 }
 0x1d9   : > { %v1641_v14 = vpop.f32.mrb[7].mxu1 }
 0x1de   : > { %v5239_v60 = vpop.f32.mrb[8].mxu1 }
 0x1df   : > { %v5241_v31 = vpop.f32.mrb[9].mxu1 }
 0x1e0   : > { %v5243_v43 = vpop.f32.mrb[10].mxu1  ;;  %v4058_v20 = vpop.f32.mrb[0].mxu0 }
 0x1e1   : > { %v5245_v16 = vpop.f32.mrb[11].mxu1  ;;  %v4090_v35 = vadd.f32 %v4058_v20, %v3888_v7  ;;  %v3012_v3 = vpop.f32.mrb[1].mxu0 }
 0x1e2   : > { %v4091_v44 = vadd.f32 %v3012_v3, %v1622_v32  ;;  %v4059_v21 = vpop.f32.mrb[2].mxu0 }
 0x1e3   : > { %3173 = vst.msk [vmem:[%s5252_s19 + $0x10] sm:$0xff] %vm836_vm5, %v4090_v35  ;;  %v4092_v40 = vadd.f32 %v4059_v21, %v3889_v42  ;;  %v3015_v63 = vpop.f32.mrb[3].mxu0  ;;  %v3274_v18 = vmul.f32 %v4090_v35, %v4090_v35  ;;  %v3206_v9 = vsel %vm836_vm5, %v4090_v35, 0.0 }
 0x1e4   : > { %3171 = vst.msk [vmem:[%s5252_s19] sm:$0xff] %vm836_vm5, %v4091_v44  ;;  %v3272_v22 = vmul.f32 %v4091_v44, %v4091_v44  ;;  %v4093_v28 = vadd.f32 %v3015_v63, %v1625_v50  ;;  %v3203_v55 = vsel %vm836_vm5, %v4091_v44, 0.0 }
 0x1e5   : > { %3174 = vst.msk [vmem:[%s5252_s19 + $0x18] sm:$0xff] %vm836_vm5, %v4092_v40  ;;  %v3275_v49 = vmul.f32 %v4092_v40, %v4092_v40  ;;  %v3307_v8 = vsel %vm836_vm5, %v3274_v18, 0.0  ;;  %v3208_v56 = vsel %vm836_vm5, %v4092_v40, 0.0 }
 0x1e6   : > { %v5254_v17 = vpop.f32.mrb[12].mxu1  ;;  %3172 = vst.msk [vmem:[%s5252_s19 + $0x8] sm:$0xff] %vm836_vm5, %v4093_v28  ;;  %v3204_v26 = vsel %vm836_vm5, %v4093_v28, 0.0  ;;  %v3273_v48 = vmul.f32 %v4093_v28, %v4093_v28  ;;  %v3304_v46 = vsel %vm836_vm5, %v3272_v22, 0.0 }
 0x1e7   : > { %v5258_v54 = vpop.f32.mrb[13].mxu1  ;;  %v3205_v33 = vadd.f32 %v3204_v26, %v3203_v55  ;;  %v3309_v45 = vsel %vm836_vm5, %v3275_v49, 0.0 }
 0x1e8   : > { %v5262_v61 = vpop.f32.mrb[14].mxu1  ;;  %v3305_v0 = vsel %vm836_vm5, %v3273_v48, 0.0  ;;  %v4062_v10 = vpop.f32.mrb[4].mxu0 }
 0x1e9   : > { %v5266_v23 = vpop.f32.mrb[15].mxu1  ;;  %v3207_v4 = vadd.f32 %v3206_v9, %v3205_v33  ;;  %v3306_v6 = vadd.f32 %v3305_v0, %v3304_v46  ;;  %v4094_v13 = vadd.f32 %v4062_v10, %v3892_v38  ;;  %v3028_v34 = vpop.f32.mrb[5].mxu0 }
 0x1ea   : > { %v4095_v39 = vadd.f32 %v3028_v34, %v1638_v15  ;;  %v4063_v25 = vpop.f32.mrb[6].mxu0 }
 0x1eb   : > { %v3308_v41 = vadd.f32 %v3307_v8, %v3306_v6  ;;  %3177 = vst.msk [vmem:[%s5252_s19 + $0x30] sm:$0xff] %vm836_vm5, %v4094_v13  ;;  %v3209_v52 = vadd.f32 %v3208_v56, %v3207_v4  ;;  %v3031_v27 = vpop.f32.mrb[7].mxu0  ;;  %v4096_v5 = vadd.f32 %v4063_v25, %v3893_v2  ;;  %v3278_v12 = vmul.f32 %v4094_v13, %v4094_v13 }
 0x1ec   : > { %3175 = vst.msk [vmem:[%s5252_s19 + $0x20] sm:$0xff] %vm836_vm5, %v4095_v39  ;;  %v3210_v1 = vsel %vm836_vm5, %v4095_v39, 0.0  ;;  %v3276_v47 = vmul.f32 %v4095_v39, %v4095_v39  ;;  %v4097_v37 = vadd.f32 %v3031_v27, %v1641_v14  ;;  %v3214_v58 = vsel %vm836_vm5, %v4094_v13, 0.0 }
 0x1ed   : > { %v3211_v19 = vadd.f32 %v3210_v1, %v3209_v52  ;;  %v3310_v62 = vadd.f32 %v3309_v45, %v3308_v41  ;;  %3178 = vst.msk [vmem:[%s5252_s19 + $0x38] sm:$0xff] %vm836_vm5, %v4096_v5  ;;  %v3279_v36 = vmul.f32 %v4096_v5, %v4096_v5  ;;  %v3216_v42 = vsel %vm836_vm5, %v4096_v5, 0.0 }
 0x1ee   : > { %v3311_v24 = vsel %vm836_vm5, %v3276_v47, 0.0  ;;  %3176 = vst.msk [vmem:[%s5252_s19 + $0x28] sm:$0xff] %vm836_vm5, %v4097_v37  ;;  %v3212_v59 = vsel %vm836_vm5, %v4097_v37, 0.0  ;;  %v3277_v57 = vmul.f32 %v4097_v37, %v4097_v37  ;;  %v3315_v2 = vsel %vm836_vm5, %v3278_v12, 0.0 }
 0x1ef   : > { %v3312_v53 = vadd.f32 %v3311_v24, %v3310_v62  ;;  %v3213_v11 = vadd.f32 %v3212_v59, %v3211_v19 }
 0x1f0   : > { %v4066_v51 = vpop.f32.mrb[8].mxu0  ;;  %v3313_v29 = vsel %vm836_vm5, %v3277_v57, 0.0 }
 0x1f1   : > { %v3215_v30 = vadd.f32 %v3214_v58, %v3213_v11  ;;  %v4098_v7 = vadd.f32 %v4066_v51, %v5239_v60  ;;  %v3044_v32 = vpop.f32.mrb[9].mxu0  ;;  %v3314_v50 = vadd.f32 %v3313_v29, %v3312_v53 }
 0x1f2   : > { %v4099_v38 = vadd.f32 %v3044_v32, %v5241_v31  ;;  %v4067_v15 = vpop.f32.mrb[10].mxu0  ;;  %v3317_v31 = vsel %vm836_vm5, %v3279_v36, 0.0 }
 0x1f3   : > { %3181 = vst.msk [vmem:[%s5252_s19 + $0x50] sm:$0xff] %vm836_vm5, %v4098_v7  ;;  %v3217_v14 = vadd.f32 %v3216_v42, %v3215_v30  ;;  %v4100_v20 = vadd.f32 %v4067_v15, %v5243_v43  ;;  %v3047_v35 = vpop.f32.mrb[11].mxu0  ;;  %v3316_v3 = vadd.f32 %v3315_v2, %v3314_v50  ;;  %v3282_v18 = vmul.f32 %v4098_v7, %v4098_v7 }
 0x1f4   : > { %3179 = vst.msk [vmem:[%s5252_s19 + $0x40] sm:$0xff] %vm836_vm5, %v4099_v38  ;;  %v3218_v60 = vsel %vm836_vm5, %v4099_v38, 0.0  ;;  %v3280_v44 = vmul.f32 %v4099_v38, %v4099_v38  ;;  %v4101_v21 = vadd.f32 %v3047_v35, %v5245_v16  ;;  %v3222_v26 = vsel %vm836_vm5, %v4098_v7, 0.0 }
 0x1f5   : > { %v3219_v40 = vadd.f32 %v3218_v60, %v3217_v14  ;;  %3182 = vst.msk [vmem:[%s5252_s19 + $0x58] sm:$0xff] %vm836_vm5, %v4100_v20  ;;  %v3318_v63 = vadd.f32 %v3317_v31, %v3316_v3  ;;  %v3283_v33 = vmul.f32 %v4100_v20, %v4100_v20  ;;  %v3224_v10 = vsel %vm836_vm5, %v4100_v20, 0.0 }
 0x1f6   : > { %v3319_v22 = vsel %vm836_vm5, %v3280_v44, 0.0  ;;  %3180 = vst.msk [vmem:[%s5252_s19 + $0x48] sm:$0xff] %vm836_vm5, %v4101_v21  ;;  %v3220_v43 = vsel %vm836_vm5, %v4101_v21, 0.0  ;;  %v3281_v28 = vmul.f32 %v4101_v21, %v4101_v21  ;;  %v3323_v34 = vsel %vm836_vm5, %v3282_v18, 0.0 }
 0x1f7   : > { %v3221_v55 = vadd.f32 %v3220_v43, %v3219_v40  ;;  %v3320_v48 = vadd.f32 %v3319_v22, %v3318_v63 }
 0x1f8   : > { %v3321_v16 = vsel %vm836_vm5, %v3281_v28, 0.0  ;;  %v4070_v49 = vpop.f32.mrb[12].mxu0 }
 0x1f9   : > { %v3223_v9 = vadd.f32 %v3222_v26, %v3221_v55  ;;  %v4102_v46 = vadd.f32 %v4070_v49, %v5254_v17  ;;  %v3060_v0 = vpop.f32.mrb[13].mxu0  ;;  %v3322_v4 = vadd.f32 %v3321_v16, %v3320_v48 }
 0x1fa   : > { %v4103_v6 = vadd.f32 %v3060_v0, %v5258_v54  ;;  %v4071_v13 = vpop.f32.mrb[14].mxu0  ;;  %v3325_v54 = vsel %vm836_vm5, %v3283_v33, 0.0 }
 0x1fb   : > { %3185 = vst.msk [vmem:[%s5252_s19 + $0x70] sm:$0xff] %vm836_vm5, %v4102_v46  ;;  %v3225_v8 = vadd.f32 %v3224_v10, %v3223_v9  ;;  %v4104_v56 = vadd.f32 %v4071_v13, %v5262_v61  ;;  %v3063_v39 = vpop.f32.mrb[15].mxu0  ;;  %v3324_v25 = vadd.f32 %v3323_v34, %v3322_v4  ;;  %v3286_v5 = vmul.f32 %v4102_v46, %v4102_v46 }
 0x1fc   : > { %3183 = vst.msk [vmem:[%s5252_s19 + $0x60] sm:$0xff] %vm836_vm5, %v4103_v6  ;;  %v3226_v17 = vsel %vm836_vm5, %v4103_v6, 0.0  ;;  %v3284_v45 = vmul.f32 %v4103_v6, %v4103_v6  ;;  %v4105_v41 = vadd.f32 %v3063_v39, %v5266_v23  ;;  %v3230_v19 = vsel %vm836_vm5, %v4102_v46, 0.0 }
 0x1fd   : > { %v3227_v52 = vadd.f32 %v3226_v17, %v3225_v8  ;;  %3186 = vst.msk [vmem:[%s5252_s19 + $0x78] sm:$0xff] %vm836_vm5, %v4104_v56  ;;  %v3326_v27 = vadd.f32 %v3325_v54, %v3324_v25  ;;  %v3287_v59 = vmul.f32 %v4104_v56, %v4104_v56  ;;  %v3232_v11 = vsel %vm836_vm5, %v4104_v56, 0.0 }
 0x1fe   : > { %v3327_v1 = vsel %vm836_vm5, %v3284_v45, 0.0  ;;  %3184 = vst.msk [vmem:[%s5252_s19 + $0x68] sm:$0xff] %vm836_vm5, %v4105_v41  ;;  %v3228_v61 = vsel %vm836_vm5, %v4105_v41, 0.0  ;;  %v3285_v47 = vmul.f32 %v4105_v41, %v4105_v41  ;;  %v3331_v51 = vsel %vm836_vm5, %v3286_v5, 0.0 }
 0x1ff   : > { %v3229_v37 = vadd.f32 %v3228_v61, %v3227_v52  ;;  %v3328_v62 = vadd.f32 %v3327_v1, %v3326_v27  ;;  %v3333_v7 = vsel %vm836_vm5, %v3287_v59, 0.0 }
 0x200   : > { %v3329_v23 = vsel %vm836_vm5, %v3285_v47, 0.0  ;;  %v4074_v24 = vpop.f32.mrb[16].mxu0 }
 0x201   : > { %v3231_v12 = vadd.f32 %v3230_v19, %v3229_v37  ;;  %v3076_v53 = vpop.f32.mrb[17].mxu0  ;;  %v3330_v57 = vadd.f32 %v3329_v23, %v3328_v62 }
 0x202   : > { %v4075_v58 = vpop.f32.mrb[18].mxu0 }
 0x203   : > { %v3079_v36 = vpop.f32.mrb[19].mxu0  ;;  %v3233_v30 = vadd.f32 %v3232_v11, %v3231_v12  ;;  %v3332_v29 = vadd.f32 %v3331_v51, %v3330_v57 }
 0x205   : > { %v3334_v32 = vadd.f32 %v3333_v7, %v3332_v29 }
 0x208   : > { %v4078_v42 = vpop.f32.mrb[20].mxu0 }
 0x209   : > { %v3092_v50 = vpop.f32.mrb[21].mxu0 }
 0x20a   : > { %v4079_v38 = vpop.f32.mrb[22].mxu0 }
 0x20b   : > { %v3095_v2 = vpop.f32.mrb[23].mxu0 }
 0x20e   : > { %v3938_v15 = vpop.f32.mrb[16].mxu1 }
 0x20f   : > { %v4106_v14 = vadd.f32 %v4074_v24, %v3938_v15  ;;  %v1893_v20 = vpop.f32.mrb[17].mxu1 }
 0x210   : > { %v4107_v35 = vadd.f32 %v3076_v53, %v1893_v20  ;;  %v3939_v3 = vpop.f32.mrb[18].mxu1  ;;  %v4082_v22 = vpop.f32.mrb[24].mxu0 }
 0x211   : > { %3189 = vst.msk [vmem:[%s5252_s19 + $0x90] sm:$0xff] %vm836_vm5, %v4106_v14  ;;  %v4108_v60 = vadd.f32 %v4075_v58, %v3939_v3  ;;  %v1896_v44 = vpop.f32.mrb[19].mxu1  ;;  %v3290_v43 = vmul.f32 %v4106_v14, %v4106_v14  ;;  %v3108_v26 = vpop.f32.mrb[25].mxu0  ;;  %v3238_v9 = vsel %vm836_vm5, %v4106_v14, 0.0 }
 0x212   : > { %3187 = vst.msk [vmem:[%s5252_s19 + $0x80] sm:$0xff] %vm836_vm5, %v4107_v35  ;;  %v3234_v21 = vsel %vm836_vm5, %v4107_v35, 0.0  ;;  %v3288_v31 = vmul.f32 %v4107_v35, %v4107_v35  ;;  %v4109_v40 = vadd.f32 %v3079_v36, %v1896_v44  ;;  %v4083_v33 = vpop.f32.mrb[26].mxu0 }
 0x213   : > { %v3235_v63 = vadd.f32 %v3234_v21, %v3233_v30  ;;  %3190 = vst.msk [vmem:[%s5252_s19 + $0x98] sm:$0xff] %vm836_vm5, %v4108_v60  ;;  %v3291_v16 = vmul.f32 %v4108_v60, %v4108_v60  ;;  %v3111_v10 = vpop.f32.mrb[27].mxu0  ;;  %v3339_v8 = vsel %vm836_vm5, %v3290_v43, 0.0  ;;  %v3240_v56 = vsel %vm836_vm5, %v4108_v60, 0.0 }
 0x214   : > { %v3335_v28 = vsel %vm836_vm5, %v3288_v31, 0.0  ;;  %3188 = vst.msk [vmem:[%s5252_s19 + $0x88] sm:$0xff] %vm836_vm5, %v4109_v40  ;;  %v3236_v18 = vsel %vm836_vm5, %v4109_v40, 0.0  ;;  %v3289_v55 = vmul.f32 %v4109_v40, %v4109_v40 }
 0x215   : > { %v3336_v48 = vadd.f32 %v3335_v28, %v3334_v32  ;;  %v3237_v49 = vadd.f32 %v3236_v18, %v3235_v63  ;;  %v3341_v17 = vsel %vm836_vm5, %v3291_v16, 0.0 }
 0x216   : > { %v3337_v46 = vsel %vm836_vm5, %v3289_v55, 0.0  ;;  %v3942_v0 = vpop.f32.mrb[20].mxu1 }
 0x217   : > { %v3239_v4 = vadd.f32 %v3238_v9, %v3237_v49  ;;  %v3338_v6 = vadd.f32 %v3337_v46, %v3336_v48  ;;  %v4110_v13 = vadd.f32 %v4078_v42, %v3942_v0  ;;  %v1909_v34 = vpop.f32.mrb[21].mxu1 }
 0x218   : > { %v4111_v39 = vadd.f32 %v3092_v50, %v1909_v34  ;;  %v3943_v25 = vpop.f32.mrb[22].mxu1  ;;  %v4086_v37 = vpop.f32.mrb[28].mxu0 }
 0x219   : > { %v3340_v45 = vadd.f32 %v3339_v8, %v3338_v6  ;;  %3193 = vst.msk [vmem:[%s5252_s19 + $0xb0] sm:$0xff] %vm836_vm5, %v4110_v13  ;;  %v3241_v41 = vadd.f32 %v3240_v56, %v3239_v4  ;;  %v1912_v54 = vpop.f32.mrb[23].mxu1  ;;  %v4112_v1 = vadd.f32 %v4079_v38, %v3943_v25  ;;  %v3124_v23 = vpop.f32.mrb[29].mxu0  ;;  %v3294_v24 = vmul.f32 %v4110_v13, %v4110_v13 }
 0x21a   : > { %3191 = vst.msk [vmem:[%s5252_s19 + $0xa0] sm:$0xff] %vm836_vm5, %v4111_v39  ;;  %v3242_v52 = vsel %vm836_vm5, %v4111_v39, 0.0  ;;  %v3292_v27 = vmul.f32 %v4111_v39, %v4111_v39  ;;  %v4113_v61 = vadd.f32 %v3095_v2, %v1912_v54  ;;  %v4087_v11 = vpop.f32.mrb[30].mxu0  ;;  %v3246_v57 = vsel %vm836_vm5, %v4110_v13, 0.0 }
 0x21b   : > { %v3243_v47 = vadd.f32 %v3242_v52, %v3241_v41  ;;  %v3342_v5 = vadd.f32 %v3341_v17, %v3340_v45  ;;  %3194 = vst.msk [vmem:[%s5252_s19 + $0xb8] sm:$0xff] %vm836_vm5, %v4112_v1  ;;  %v3127_v51 = vpop.f32.mrb[31].mxu0  ;;  %v3295_v36 = vmul.f32 %v4112_v1, %v4112_v1  ;;  %v3248_v42 = vsel %vm836_vm5, %v4112_v1, 0.0 }
 0x21c   : > { %v3343_v19 = vsel %vm836_vm5, %v3292_v27, 0.0  ;;  %3192 = vst.msk [vmem:[%s5252_s19 + $0xa8] sm:$0xff] %vm836_vm5, %v4113_v61  ;;  %v3244_v62 = vsel %vm836_vm5, %v4113_v61, 0.0  ;;  %v3293_v53 = vmul.f32 %v4113_v61, %v4113_v61  ;;  %v3347_v2 = vsel %vm836_vm5, %v3294_v24, 0.0 }
 0x21d   : > { %v3344_v59 = vadd.f32 %v3343_v19, %v3342_v5  ;;  %v3245_v12 = vadd.f32 %v3244_v62, %v3243_v47  ;;  %v3349_v31 = vsel %vm836_vm5, %v3295_v36, 0.0 }
 0x21e   : > { %v3946_v58 = vpop.f32.mrb[24].mxu1  ;;  %v3345_v29 = vsel %vm836_vm5, %v3293_v53, 0.0 }
 0x21f   : > { %v3247_v30 = vadd.f32 %v3246_v57, %v3245_v12  ;;  %v4114_v7 = vadd.f32 %v4082_v22, %v3946_v58  ;;  %v1925_v32 = vpop.f32.mrb[25].mxu1  ;;  %v3346_v50 = vadd.f32 %v3345_v29, %v3344_v59 }
 0x220   : > { %v4115_v38 = vadd.f32 %v3108_v26, %v1925_v32  ;;  %v3947_v15 = vpop.f32.mrb[26].mxu1 }
 0x221   : > { %3197 = vst.msk [vmem:[%s5252_s19 + $0xd0] sm:$0xff] %vm836_vm5, %v4114_v7  ;;  %v3249_v14 = vadd.f32 %v3248_v42, %v3247_v30  ;;  %v4116_v20 = vadd.f32 %v4083_v33, %v3947_v15  ;;  %v1928_v35 = vpop.f32.mrb[27].mxu1  ;;  %v3348_v3 = vadd.f32 %v3347_v2, %v3346_v50  ;;  %v3298_v18 = vmul.f32 %v4114_v7, %v4114_v7 }
 0x222   : > { %3195 = vst.msk [vmem:[%s5252_s19 + $0xc0] sm:$0xff] %vm836_vm5, %v4115_v38  ;;  %v3250_v60 = vsel %vm836_vm5, %v4115_v38, 0.0  ;;  %v3296_v44 = vmul.f32 %v4115_v38, %v4115_v38  ;;  %v4117_v21 = vadd.f32 %v3111_v10, %v1928_v35  ;;  %v3254_v26 = vsel %vm836_vm5, %v4114_v7, 0.0 }
 0x223   : > { %v3251_v40 = vadd.f32 %v3250_v60, %v3249_v14  ;;  %3198 = vst.msk [vmem:[%s5252_s19 + $0xd8] sm:$0xff] %vm836_vm5, %v4116_v20  ;;  %v3350_v63 = vadd.f32 %v3349_v31, %v3348_v3  ;;  %v3299_v33 = vmul.f32 %v4116_v20, %v4116_v20  ;;  %v3256_v10 = vsel %vm836_vm5, %v4116_v20, 0.0 }
 0x224   : > { %v3351_v22 = vsel %vm836_vm5, %v3296_v44, 0.0  ;;  %3196 = vst.msk [vmem:[%s5252_s19 + $0xc8] sm:$0xff] %vm836_vm5, %v4117_v21  ;;  %v3252_v43 = vsel %vm836_vm5, %v4117_v21, 0.0  ;;  %v3297_v28 = vmul.f32 %v4117_v21, %v4117_v21  ;;  %v3355_v34 = vsel %vm836_vm5, %v3298_v18, 0.0 }
 0x225   : > { %v3253_v55 = vadd.f32 %v3252_v43, %v3251_v40  ;;  %v3352_v48 = vadd.f32 %v3351_v22, %v3350_v63  ;;  %v3357_v54 = vsel %vm836_vm5, %v3299_v33, 0.0 }
 0x226   : > { %v3353_v16 = vsel %vm836_vm5, %v3297_v28, 0.0  ;;  %v3950_v49 = vpop.f32.mrb[28].mxu1 }
 0x227   : > { %v3255_v9 = vadd.f32 %v3254_v26, %v3253_v55  ;;  %v4118_v46 = vadd.f32 %v4086_v37, %v3950_v49  ;;  %v1941_v0 = vpop.f32.mrb[29].mxu1  ;;  %v3354_v4 = vadd.f32 %v3353_v16, %v3352_v48 }
 0x228   : > { %v4119_v6 = vadd.f32 %v3124_v23, %v1941_v0  ;;  %v3951_v13 = vpop.f32.mrb[30].mxu1 }
 0x229   : > { %3201 = vst.msk [vmem:[%s5252_s19 + $0xf0] sm:$0xff] %vm836_vm5, %v4118_v46  ;;  %v3257_v8 = vadd.f32 %v3256_v10, %v3255_v9  ;;  %v4120_v56 = vadd.f32 %v4087_v11, %v3951_v13  ;;  %v1944_v39 = vpop.f32.mrb[31].mxu1  ;;  %v3356_v25 = vadd.f32 %v3355_v34, %v3354_v4  ;;  %v3302_v5 = vmul.f32 %v4118_v46, %v4118_v46 }
 0x22a   : > { %3199 = vst.msk [vmem:[%s5252_s19 + $0xe0] sm:$0xff] %vm836_vm5, %v4119_v6  ;;  %v3258_v17 = vsel %vm836_vm5, %v4119_v6, 0.0  ;;  %v3300_v45 = vmul.f32 %v4119_v6, %v4119_v6  ;;  %v4121_v41 = vadd.f32 %v3127_v51, %v1944_v39  ;;  %v3262_v19 = vsel %vm836_vm5, %v4118_v46, 0.0 }
 0x22b   : > { %v3259_v52 = vadd.f32 %v3258_v17, %v3257_v8  ;;  %3202 = vst.msk [vmem:[%s5252_s19 + $0xf8] sm:$0xff] %vm836_vm5, %v4120_v56  ;;  %v3358_v27 = vadd.f32 %v3357_v54, %v3356_v25  ;;  %v3303_v24 = vmul.f32 %v4120_v56, %v4120_v56  ;;  %v3264_v12 = vsel %vm836_vm5, %v4120_v56, 0.0 }
 0x22c   : > { %v3359_v1 = vsel %vm836_vm5, %v3300_v45, 0.0  ;;  %3200 = vst.msk [vmem:[%s5252_s19 + $0xe8] sm:$0xff] %vm836_vm5, %v4121_v41  ;;  %v3260_v61 = vsel %vm836_vm5, %v4121_v41, 0.0  ;;  %v3301_v47 = vmul.f32 %v4121_v41, %v4121_v41  ;;  %v3363_v11 = vsel %vm836_vm5, %v3302_v5, 0.0 }
 0x22d   : > { %v3261_v37 = vadd.f32 %v3260_v61, %v3259_v52  ;;  %v3360_v62 = vadd.f32 %v3359_v1, %v3358_v27  ;;  %v3365_v51 = vsel %vm836_vm5, %v3303_v24, 0.0 }
 0x22e   : > { %v3361_v23 = vsel %vm836_vm5, %v3301_v47, 0.0 }
 0x22f   : > { %v3263_v59 = vadd.f32 %v3262_v19, %v3261_v37  ;;  %v3362_v53 = vadd.f32 %v3361_v23, %v3360_v62 }
 0x231   : > { %v3265_v57 = vadd.f32 %v3264_v12, %v3263_v59  ;;  %v3364_v58 = vadd.f32 %v3363_v11, %v3362_v53 }
 0x233   : > { %v3266_v36 = vrot.slane %v3265_v57, 4  ;;  %v3366_v30 = vadd.f32 %v3365_v51, %v3364_v58 }
 0x235   : > { %v3267_v29 = vadd.f32 %v3266_v36, %v3265_v57  ;;  %v3367_v7 = vrot.slane %v3366_v30, 4 }
 0x237   : > { %v3268_v32 = vrot.slane %v3267_v29, 2  ;;  %v3368_v42 = vadd.f32 %v3367_v7, %v3366_v30 }
 0x239   : > { %v3269_v50 = vadd.f32 %v3268_v32, %v3267_v29  ;;  %v3369_v38 = vrot.slane %v3368_v42, 2 }
 0x23b   : > { %v3270_v15 = vrot.slane %v3269_v50, 1  ;;  %v3370_v2 = vadd.f32 %v3369_v38, %v3368_v42 }
 0x23d   : > { %v3271_v14 = vadd.f32 %v3270_v15, %v3269_v50  ;;  %v3371_v20 = vrot.slane %v3370_v2, 1 }
 0x23f   : > { %3374 = vst.msk [vmem:[%s235_s23] sm:$0x1] %vm3373_vm15, %v3271_v14  ;;  %v3372_v35 = vadd.f32 %v3371_v20, %v3370_v2 }
 0x241   : > { %3375 = vst.msk [vmem:[%s235_s23 + $0x1] sm:$0x1] %vm3373_vm15, %v3372_v35 }
 0x242 PF: > { %s16_s18 = sadd.s32 1, %s4370_s18  }
 0x243   : > { %p13_p4 = scmp.ge.s32.totalorder %s16_s18, 4  }
 0x245   :  { %15 = sbr.rel (!%p13_p4) target bundleno = 1 (0x1), region = 80 }

</bundles_post_ra>
